<compile_context>
chip_gen: v7x
topology: tpu7x:2x2x1
jax: 0.10.0
libtpu: 0.0.40
codegen_flags: <defaults>
</compile_context>

<pallas_src>
import functools
import math

import numpy as np

import jax
import jax.numpy as jnp
from jax.experimental import pallas as pl
from jax.experimental.pallas import tpu as pltpu

F32 = jnp.float32
BF16 = jnp.bfloat16
FEATURE_DIM = 50
HIDDEN = 1024
OUT_LANES = 128  # lane-dense packed head-output width (mu | pi | log_std | log_pi | pad)


# ----------------------------------------------------------------------------
# Fused kernel: conv stack -> flatten -> fc -> LayerNorm -> MLP -> policy head
# ----------------------------------------------------------------------------
def _fused_actor_kernel(x_ref, noise_ref, *refs, num_convs, geo, A,
                        sigma_min, sigma_max, eps):
    """One batch tile (bb samples) end to end, everything resident in VMEM.

    x_ref    : (bb, 4, hp*wp, Cin) bf16  2x2 phase-split padded-NHWC observation
    noise_ref: (bb, 1, A)          f32
    refs     : per-conv (w (9*Cin, Cout) bf16, b (1, Cout) f32) pairs, then
               fc_w, fc_b, ln_g, ln_b, w0, b0, w1, b1, w_head, b_head, o_ref
    o_ref    : (bb, 1, OUT_LANES)  f32   packed [mu | pi | log_std | log_pi | 0]
    """
    conv_refs = refs[:2 * num_convs]
    (fcw_ref, fcb_ref, g_ref, beta_ref, w0_ref, b0_ref, w1_ref, b1_ref,
     wh_ref, bh_ref, o_ref) = refs[2 * num_convs:]

    bb = x_ref.shape[0]

    rows = []
    for s in range(bb):                                   # small static unroll
        # ---- conv stack: each layer = one K-folded matmul (im2col in VMEM) --
        cur = None
        for li in range(num_convs):
            taps, l_out = geo[li]
            w_ref = conv_refs[2 * li]
            b_ref = conv_refs[2 * li + 1]
            if li == 0:
                cols = [x_ref[s, ph, off:off + l_out, :] for ph, off in taps]
            else:
                cols = [cur[off:off + l_out, :] for _, off in taps]
            patch = jnp.concatenate(cols, axis=-1)             # (l_out, 9*Cin)
            y = jnp.dot(patch, w_ref[...],
                        preferred_element_type=F32) + b_ref[...]
            cur = jnp.maximum(y, 0.0).astype(BF16)             # (l_out, Cout)

        # ---- flatten in VMEM (fc weight rows are pre-permuted to this order) -
        l_last, f_last = cur.shape
        n_grp = (l_last + 7) // 8
        pad_rows = n_grp * 8 - l_last
        if pad_rows:
            cur = jnp.concatenate(
                [cur, jnp.zeros((pad_rows, f_last), cur.dtype)], axis=0)
        wide = jnp.concatenate(
            [cur[8 * g:8 * (g + 1), :] for g in range(n_grp)], axis=1)
        rows.append(jnp.concatenate(
            [wide[j:j + 1, :] for j in range(8)], axis=1))     # (1, 8*n_grp*F)

    h = rows[0] if bb == 1 else jnp.concatenate(rows, axis=0)   # (bb, K) bf16
    assert h.shape[1] == fcw_ref.shape[0]

    # ---- encoder fc + LayerNorm (f32) ---------------------------------------
    f = jnp.dot(h, fcw_ref[...], preferred_element_type=F32) + fcb_ref[...]
    mean = jnp.mean(f, axis=-1, keepdims=True)
    var = jnp.mean(jnp.square(f - mean), axis=-1, keepdims=True)
    f = (f - mean) * jax.lax.rsqrt(var + eps) * g_ref[...] + beta_ref[...]

    # ---- d1 MLP (bf16 MXU, f32 accumulation) --------------------------------
    a0 = jnp.dot(f.astype(BF16), w0_ref[...],
                 preferred_element_type=F32) + b0_ref[...]
    a0 = jnp.maximum(a0, 0.0)
    a1 = jnp.dot(a0.astype(BF16), w1_ref[...],
                 preferred_element_type=F32) + b1_ref[...]
    a1 = jnp.maximum(a1, 0.0)

    # ---- policy head: ONE matmul against the combined (1024, 2A) weight -----
    hd = jnp.dot(a1.astype(BF16), wh_ref[...],
                 preferred_element_type=F32) + bh_ref[...]
    mu = hd[:, 0:A]
    ls = hd[:, A:2 * A]

    noise = noise_ref[:, 0, :]
    log_std = jnp.tanh(ls)
    log_std = sigma_min + 0.5 * (sigma_max - sigma_min) * (log_std + 1.0)
    std = jnp.exp(log_std)
    pi = mu + noise * std

    # gaussian_logprob
    residual = jnp.sum(-0.5 * noise * noise - log_std, axis=-1, keepdims=True)
    log_pi = residual - 0.5 * math.log(2.0 * math.pi) * A

    # squash
    mu_t = jnp.tanh(mu)
    pi_t = jnp.tanh(pi)
    log_pi = log_pi - jnp.sum(
        jnp.log(jnp.maximum(1.0 - pi_t * pi_t, 0.0) + 1e-6),
        axis=-1, keepdims=True)

    # ---- single dense lane-packed store -------------------------------------
    parts = [mu_t, pi_t, log_std, log_pi]
    pad = OUT_LANES - 3 * A - 1
    if pad:
        parts.append(jnp.zeros((bb, pad), F32))
    o_ref[:, 0, :] = jnp.concatenate(parts, axis=-1)


# ----------------------------------------------------------------------------
# Geometry + offline parameter preparation
# ----------------------------------------------------------------------------
def _encoder_geometry(h, w, num_convs):
    """Tap tables / flattened sizes for the padded-width conv representation."""
    assert h % 2 == 0 and w % 2 == 0, "even spatial dims required"
    hp, wp = h // 2, w // 2
    oh, ow = (h - 3) // 2 + 1, (w - 3) // 2 + 1            # stride-2 first conv
    taps0 = tuple(((ki % 2) * 2 + (kj % 2), (ki // 2) * wp + (kj // 2))
                  for ki in range(3) for kj in range(3))
    geo = [dict(taps=taps0, l_out=(oh - 1) * wp + ow)]
    hgt, wpad, wval = oh, wp, ow
    for _ in range(1, num_convs):                           # stride-1 layers
        oh2, ow2 = hgt - 2, wval - 2
        taps = tuple((0, ki * wpad + kj) for ki in range(3) for kj in range(3))
        geo.append(dict(taps=taps, l_out=(oh2 - 1) * wpad + ow2))
        hgt, wval = oh2, ow2
    return geo, (hgt, wpad, wval)


def _permute_fc_weight(fc_w_torch, c_out, oh, wpad, ow):
    """torch fc weight (50, C*OH*OW) (NCHW flatten) -> (K, 50) with rows in the
    kernel's in-VMEM flatten order; padded / garbage positions get zero rows."""
    l_out = (oh - 1) * wpad + ow
    n_grp = -(-l_out // 8)
    K = 8 * n_grp * c_out
    fc = jnp.zeros((K, fc_w_torch.shape[0]), F32)
    c_idx, h_idx, w_idx = jnp.meshgrid(
        jnp.arange(c_out), jnp.arange(oh), jnp.arange(ow), indexing="ij")
    src = (c_idx * oh * ow + h_idx * ow + w_idx).reshape(-1)
    r = (h_idx * wpad + w_idx).reshape(-1)
    dst = (r % 8) * (n_grp * c_out) + (r // 8) * c_out + c_idx.reshape(-1)
    return fc.at[dst].set(fc_w_torch.T[src])


def prepare_params(raw, *, h, w, num_filters, num_convs, action_shape):
    assert 3 * action_shape + 1 <= OUT_LANES, \
        "packed head slab too narrow for this action_shape"
    geo, (oh_f, wpad_f, ow_f) = _encoder_geometry(h, w, num_convs)
    kp = {"conv_geo": geo, "conv_w": [], "conv_b": []}
    for li in range(num_convs):
        w_t = raw["conv_w"][li]                                 # (Co, Ci, 3, 3)
        co, ci = w_t.shape[0], w_t.shape[1]
        wk = jnp.transpose(w_t, (2, 3, 1, 0)).reshape(9 * ci, co)  # tap-major K
        if li == 0:
            wk = wk / 255.0                                     # fold obs/255
        kp["conv_w"].append(wk.astype(BF16))
        kp["conv_b"].append(raw["conv_b"][li].reshape(1, co).astype(F32))
    kp["fc_w"] = _permute_fc_weight(
        raw["fc_w"], num_filters, oh_f, wpad_f, ow_f).astype(BF16)
    kp["fc_b"] = raw["fc_b"].reshape(1, -1).astype(F32)
    kp["ln_g"] = raw["ln_g"].reshape(1, -1).astype(F32)
    kp["ln_b"] = raw["ln_b"].reshape(1, -1).astype(F32)
    kp["w0"] = raw["d1_w0"].T.astype(BF16)
    kp["b0"] = raw["d1_b0"].reshape(1, -1).astype(F32)
    kp["w1"] = raw["d1_w1"].T.astype(BF16)
    kp["b1"] = raw["d1_b1"].reshape(1, -1).astype(F32)
    kp["w_head"] = raw["d1_w2"].T.astype(BF16)          # combined (1024, 2A)
    kp["b_head"] = raw["d1_b2"].reshape(1, -1).astype(F32)
    n_grp = -(-geo[-1]["l_out"] // 8)
    assert kp["fc_w"].shape[0] == 8 * n_grp * num_filters
    return kp


def _pick_batch_tile(batch):
    """Largest divisor of batch that is <= 8 while keeping >= 2 grid steps
    (so v7x's second TensorCore always has work)."""
    if batch <= 1:
        return 1
    best = 1
    for d in range(1, min(8, batch) + 1):
        if batch % d == 0 and batch // d >= 2:
            best = d
    return best


# ----------------------------------------------------------------------------
# Forward
# ----------------------------------------------------------------------------
def sac_actor_forward(kp, x_nchw, noise, *, sigma_min=-10.0, sigma_max=2.0):
    """Reproduces SACContinuousActorImages.forward (compute_pi=True,
    compute_log_pi=True). Returns (mu, pi, log_pi, log_std)."""
    B, C, H, W = x_nchw.shape
    A = noise.shape[1]
    assert 3 * A + 1 <= OUT_LANES
    num_convs = len(kp["conv_w"])

    # NCHW -> NHWC + 2x2 phase split for the stride-2 first conv (one small XLA
    # prep fusion; the fused kernel reads it exactly once, in bf16).
    # TODO(synk): consume NCHW observations directly in-kernel (strided phase
    # loads) to drop this one prep pass.
    x = jnp.transpose(x_nchw, (0, 2, 3, 1)).astype(F32)
    hp, wp = H // 2, W // 2
    phases = jnp.stack(
        [x[:, p::2, q::2, :] for p, q in ((0, 0), (0, 1), (1, 0), (1, 1))],
        axis=1)
    xph = phases.reshape(B, 4, hp * wp, C).astype(BF16)
    noise3 = noise.reshape(B, 1, A).astype(F32)

    bb = _pick_batch_tile(B)
    grid = (B // bb,)

    args = [xph, noise3]
    in_specs = [
        pl.BlockSpec((bb, 4, hp * wp, C), lambda i: (i, 0, 0, 0)),
        pl.BlockSpec((bb, 1, A), lambda i: (i, 0, 0)),
    ]

    def _whole(a):                     # whole-array block, resident across grid
        nd = a.ndim
        return pl.BlockSpec(a.shape, lambda i, _nd=nd: (0,) * _nd)

    for wk, bk in zip(kp["conv_w"], kp["conv_b"]):
        args += [wk, bk]
        in_specs += [_whole(wk), _whole(bk)]
    for name in ("fc_w", "fc_b", "ln_g", "ln_b", "w0", "b0", "w1", "b1",
                 "w_head", "b_head"):
        args.append(kp[name])
        in_specs.append(_whole(kp[name]))

    geo_t = tuple((tuple(g["taps"]), int(g["l_out"])) for g in kp["conv_geo"])

    flops = 0
    for li, g in enumerate(kp["conv_geo"]):
        kin, cout = kp["conv_w"][li].shape
        flops += 2 * B * g["l_out"] * kin * cout
    flops += 2 * B * (kp["fc_w"].shape[0] * FEATURE_DIM + FEATURE_DIM * HIDDEN
                      + HIDDEN * HIDDEN + HIDDEN * 2 * A)
    bytes_acc = int(sum(int(a.size) * a.dtype.itemsize for a in args)
                    + B * OUT_LANES * 4)

    out = pl.pallas_call(
        functools.partial(_fused_actor_kernel, num_convs=num_convs, geo=geo_t,
                          A=A, sigma_min=float(sigma_min),
                          sigma_max=float(sigma_max), eps=1e-5),
        out_shape=jax.ShapeDtypeStruct((B, 1, OUT_LANES), F32),
        grid=grid,
        in_specs=in_specs,
        out_specs=pl.BlockSpec((bb, 1, OUT_LANES), lambda i: (i, 0, 0)),
        compiler_params=pltpu.CompilerParams(
            dimension_semantics=("parallel",),       # 2-TC sharding on v7x
            vmem_limit_bytes=32 * 1024 * 1024),      # raises v5e's 16 MiB default
        cost_estimate=pl.CostEstimate(flops=int(flops),
                                      transcendentals=int(B * (5 * A + 2)),
                                      bytes_accessed=bytes_acc),
    )(*args)

    out = out[:, 0, :]
    mu = out[:, 0:A]
    pi = out[:, A:2 * A]
    log_std = out[:, 2 * A:3 * A]
    log_pi = out[:, 3 * A:3 * A + 1]
    return mu, pi, log_pi, log_std


# ----------------------------------------------------------------------------
# Pure-JAX f32 reference of the torch module (for the tolerance check)
# ----------------------------------------------------------------------------
def _reference_forward(raw, x_nchw, noise, *, num_convs, action_shape,
                       sigma_min, sigma_max):
    A = action_shape
    h = x_nchw / 255.0
    for li in range(num_convs):
        stride = 2 if li == 0 else 1
        h = jax.lax.conv_general_dilated(
            h, raw["conv_w"][li], (stride, stride), "VALID",
            dimension_numbers=("NCHW", "OIHW", "NCHW"))
        h = jnp.maximum(h + raw["conv_b"][li].reshape(1, -1, 1, 1), 0.0)
    B = x_nchw.shape[0]
    hf = h.reshape(B, -1)
    f = hf @ raw["fc_w"].T + raw["fc_b"]
    mean = f.mean(-1, keepdims=True)
    var = ((f - mean) ** 2).mean(-1, keepdims=True)
    f = (f - mean) / jnp.sqrt(var + 1e-5) * raw["ln_g"] + raw["ln_b"]
    a0 = jnp.maximum(f @ raw["d1_w0"].T + raw["d1_b0"], 0.0)
    a1 = jnp.maximum(a0 @ raw["d1_w1"].T + raw["d1_b1"], 0.0)
    hd = a1 @ raw["d1_w2"].T + raw["d1_b2"]
    mu, ls = hd[:, :A], hd[:, A:]
    log_std = jnp.tanh(ls)
    log_std = sigma_min + 0.5 * (sigma_max - sigma_min) * (log_std + 1.0)
    std = jnp.exp(log_std)
    pi = mu + noise * std
    log_pi = (jnp.sum(-0.5 * noise ** 2 - log_std, -1, keepdims=True)
              - 0.5 * math.log(2.0 * math.pi) * A)
    mu_t, pi_t = jnp.tanh(mu), jnp.tanh(pi)
    log_pi = log_pi - jnp.sum(
        jnp.log(jnp.maximum(1.0 - pi_t ** 2, 0.0) + 1e-6), -1, keepdims=True)
    return mu_t, pi_t, log_pi, log_std


# ----------------------------------------------------------------------------
# Deterministic synthetic parameters in torch layouts (shapes from __init__)
# ----------------------------------------------------------------------------
def init_torch_params(key, c_in, h, w, num_filters, num_convs, action_shape):
    keys = iter(jax.random.split(key, 2 * num_convs + 10))
    p = {"conv_w": [], "conv_b": []}
    ci = c_in
    for _ in range(num_convs):
        p["conv_w"].append(
            0.1 * jax.random.normal(next(keys), (num_filters, ci, 3, 3), F32))
        p["conv_b"].append(
            0.01 * jax.random.normal(next(keys), (num_filters,), F32))
        ci = num_filters
    oh, ow = (h - 3) // 2 + 1, (w - 3) // 2 + 1
    for _ in range(1, num_convs):
        oh, ow = oh - 2, ow - 2
    flat = num_filters * oh * ow
    p["fc_w"] = 0.1 * jax.random.normal(next(keys), (FEATURE_DIM, flat), F32)
    p["fc_b"] = 0.01 * jax.random.normal(next(keys), (FEATURE_DIM,), F32)
    p["ln_g"] = 1.0 + 0.01 * jax.random.normal(next(keys), (FEATURE_DIM,), F32)
    p["ln_b"] = 0.01 * jax.random.normal(next(keys), (FEATURE_DIM,), F32)
    p["d1_w0"] = 0.05 * jax.random.normal(next(keys), (HIDDEN, FEATURE_DIM), F32)
    p["d1_b0"] = 0.01 * jax.random.normal(next(keys), (HIDDEN,), F32)
    p["d1_w1"] = 0.05 * jax.random.normal(next(keys), (HIDDEN, HIDDEN), F32)
    p["d1_b1"] = 0.01 * jax.random.normal(next(keys), (HIDDEN,), F32)
    p["d1_w2"] = 0.05 * jax.random.normal(next(keys), (2 * action_shape, HIDDEN), F32)
    p["d1_b2"] = 0.01 * jax.random.normal(next(keys), (2 * action_shape,), F32)
    return p


if __name__ == "__main__":
    B, C, H, W = 2, 4, 16, 16
    num_filters, num_convs, action_shape = 8, 2, 3

    key = jax.random.PRNGKey(0)
    k_x, k_noise, k_params = jax.random.split(key, 3)
    x = jax.random.uniform(k_x, (B, C, H, W), F32, 0.0, 255.0)    # NCHW pixels
    # TODO(synk): torch.randn_like noise is drawn host-side with jax.random and
    # passed into the fused kernel (no in-kernel PRNG needed).
    noise = jax.random.normal(k_noise, (B, action_shape), F32)

    raw = init_torch_params(k_params, C, H, W, num_filters, num_convs,
                            action_shape)
    kp = prepare_params(raw, h=H, w=W, num_filters=num_filters,
                        num_convs=num_convs, action_shape=action_shape)

    mu, pi, log_pi, log_std = jax.block_until_ready(
        sac_actor_forward(kp, x, noise, sigma_min=-10.0, sigma_max=2.0))

    assert mu.shape == (B, action_shape)
    assert pi.shape == (B, action_shape)
    assert log_pi.shape == (B, 1)
    assert log_std.shape == (B, action_shape)
    for t in (mu, pi, log_pi, log_std):
        assert bool(jnp.all(jnp.isfinite(t)))

    # Tolerance check against the f32 pure-JAX reference of the torch module
    # (kernel uses bf16 matmul operands, hence the loose-ish tolerances).
    r_mu, r_pi, r_log_pi, r_log_std = _reference_forward(
        raw, x, noise, num_convs=num_convs, action_shape=action_shape,
        sigma_min=-10.0, sigma_max=2.0)
    np.testing.assert_allclose(np.asarray(mu), np.asarray(r_mu),
                               rtol=0.1, atol=0.05)
    np.testing.assert_allclose(np.asarray(pi), np.asarray(r_pi),
                               rtol=0.1, atol=0.05)
    np.testing.assert_allclose(np.asarray(log_std), np.asarray(r_log_std),
                               rtol=0.1, atol=0.1)
    np.testing.assert_allclose(np.asarray(log_pi), np.asarray(r_log_pi),
                               rtol=0.1, atol=0.2)

    print("KERNEL_OK")
</pallas_src>

<mosaic_0001>
module attributes {stable_mosaic.version = 11 : i64} {
  func.func @_fused_actor_kernel(%arg0: i32, %arg1: memref<1x4x64x4xbf16, #tpu.memory_space<vmem>>, %arg2: memref<1x1x3xf32, #tpu.memory_space<vmem>>, %arg3: memref<36x8xbf16, #tpu.memory_space<vmem>>, %arg4: memref<1x8xf32, #tpu.memory_space<vmem>>, %arg5: memref<72x8xbf16, #tpu.memory_space<vmem>>, %arg6: memref<1x8xf32, #tpu.memory_space<vmem>>, %arg7: memref<320x50xbf16, #tpu.memory_space<vmem>>, %arg8: memref<1x50xf32, #tpu.memory_space<vmem>>, %arg9: memref<1x50xf32, #tpu.memory_space<vmem>>, %arg10: memref<1x50xf32, #tpu.memory_space<vmem>>, %arg11: memref<50x1024xbf16, #tpu.memory_space<vmem>>, %arg12: memref<1x1024xf32, #tpu.memory_space<vmem>>, %arg13: memref<1024x1024xbf16, #tpu.memory_space<vmem>>, %arg14: memref<1x1024xf32, #tpu.memory_space<vmem>>, %arg15: memref<1024x6xbf16, #tpu.memory_space<vmem>>, %arg16: memref<1x6xf32, #tpu.memory_space<vmem>>, %arg17: memref<1x1x128xf32, #tpu.memory_space<vmem>>) attributes {dimension_semantics = [#tpu.dimension_semantics<parallel>], iteration_bounds = array<i64: 2>, scalar_prefetch = 0 : i64, scratch_operands = 0 : i64, tpu.core_type = #tpu.core_type<tc>, window_params = [{transform_indices = @transform_0, window_bounds = array<i64: 1, 4, 64, 4>}, {transform_indices = @transform_1, window_bounds = array<i64: 1, 1, 3>}, {pipeline_mode = #tpu.pipeline_mode<synchronous>, transform_indices = @transform_2, window_bounds = array<i64: 36, 8>}, {pipeline_mode = #tpu.pipeline_mode<synchronous>, transform_indices = @transform_3, window_bounds = array<i64: 1, 8>}, {pipeline_mode = #tpu.pipeline_mode<synchronous>, transform_indices = @transform_4, window_bounds = array<i64: 72, 8>}, {pipeline_mode = #tpu.pipeline_mode<synchronous>, transform_indices = @transform_5, window_bounds = array<i64: 1, 8>}, {pipeline_mode = #tpu.pipeline_mode<synchronous>, transform_indices = @transform_6, window_bounds = array<i64: 320, 50>}, {pipeline_mode = #tpu.pipeline_mode<synchronous>, transform_indices = @transform_7, window_bounds = array<i64: 1, 50>}, {pipeline_mode = #tpu.pipeline_mode<synchronous>, transform_indices = @transform_8, window_bounds = array<i64: 1, 50>}, {pipeline_mode = #tpu.pipeline_mode<synchronous>, transform_indices = @transform_9, window_bounds = array<i64: 1, 50>}, {pipeline_mode = #tpu.pipeline_mode<synchronous>, transform_indices = @transform_10, window_bounds = array<i64: 50, 1024>}, {pipeline_mode = #tpu.pipeline_mode<synchronous>, transform_indices = @transform_11, window_bounds = array<i64: 1, 1024>}, {pipeline_mode = #tpu.pipeline_mode<synchronous>, transform_indices = @transform_12, window_bounds = array<i64: 1024, 1024>}, {pipeline_mode = #tpu.pipeline_mode<synchronous>, transform_indices = @transform_13, window_bounds = array<i64: 1, 1024>}, {pipeline_mode = #tpu.pipeline_mode<synchronous>, transform_indices = @transform_14, window_bounds = array<i64: 1024, 6>}, {pipeline_mode = #tpu.pipeline_mode<synchronous>, transform_indices = @transform_15, window_bounds = array<i64: 1, 6>}, {transform_indices = @transform_16, window_bounds = array<i64: 1, 1, 128>}]} {
    %c0 = arith.constant 0 : index
    %c0_0 = arith.constant 0 : index
    %c0_1 = arith.constant 0 : index
    %c0_2 = arith.constant 0 : index
    %0 = vector.load %arg1[%c0, %c0_0, %c0_1, %c0_2] : memref<1x4x64x4xbf16, #tpu.memory_space<vmem>>, vector<1x1x55x4xbf16>
    %1 = vector.shape_cast %0 : vector<1x1x55x4xbf16> to vector<55x4xbf16>
    %c0_3 = arith.constant 0 : index
    %c1 = arith.constant 1 : index
    %c0_4 = arith.constant 0 : index
    %c0_5 = arith.constant 0 : index
    %2 = vector.load %arg1[%c0_3, %c1, %c0_4, %c0_5] : memref<1x4x64x4xbf16, #tpu.memory_space<vmem>>, vector<1x1x55x4xbf16>
    %3 = vector.shape_cast %2 : vector<1x1x55x4xbf16> to vector<55x4xbf16>
    %c0_6 = arith.constant 0 : index
    %c0_7 = arith.constant 0 : index
    %c1_8 = arith.constant 1 : index
    %c0_9 = arith.constant 0 : index
    %4 = vector.load %arg1[%c0_6, %c0_7, %c1_8, %c0_9] : memref<1x4x64x4xbf16, #tpu.memory_space<vmem>>, vector<1x1x55x4xbf16>
    %5 = vector.shape_cast %4 : vector<1x1x55x4xbf16> to vector<55x4xbf16>
    %c0_10 = arith.constant 0 : index
    %c2 = arith.constant 2 : index
    %c0_11 = arith.constant 0 : index
    %c0_12 = arith.constant 0 : index
    %6 = vector.load %arg1[%c0_10, %c2, %c0_11, %c0_12] : memref<1x4x64x4xbf16, #tpu.memory_space<vmem>>, vector<1x1x55x4xbf16>
    %7 = vector.shape_cast %6 : vector<1x1x55x4xbf16> to vector<55x4xbf16>
    %c0_13 = arith.constant 0 : index
    %c3 = arith.constant 3 : index
    %c0_14 = arith.constant 0 : index
    %c0_15 = arith.constant 0 : index
    %8 = vector.load %arg1[%c0_13, %c3, %c0_14, %c0_15] : memref<1x4x64x4xbf16, #tpu.memory_space<vmem>>, vector<1x1x55x4xbf16>
    %9 = vector.shape_cast %8 : vector<1x1x55x4xbf16> to vector<55x4xbf16>
    %c0_16 = arith.constant 0 : index
    %c2_17 = arith.constant 2 : index
    %c1_18 = arith.constant 1 : index
    %c0_19 = arith.constant 0 : index
    %10 = vector.load %arg1[%c0_16, %c2_17, %c1_18, %c0_19] : memref<1x4x64x4xbf16, #tpu.memory_space<vmem>>, vector<1x1x55x4xbf16>
    %11 = vector.shape_cast %10 : vector<1x1x55x4xbf16> to vector<55x4xbf16>
    %c0_20 = arith.constant 0 : index
    %c0_21 = arith.constant 0 : index
    %c8 = arith.constant 8 : index
    %c0_22 = arith.constant 0 : index
    %12 = vector.load %arg1[%c0_20, %c0_21, %c8, %c0_22] : memref<1x4x64x4xbf16, #tpu.memory_space<vmem>>, vector<1x1x55x4xbf16>
    %13 = vector.shape_cast %12 : vector<1x1x55x4xbf16> to vector<55x4xbf16>
    %c0_23 = arith.constant 0 : index
    %c1_24 = arith.constant 1 : index
    %c8_25 = arith.constant 8 : index
    %c0_26 = arith.constant 0 : index
    %14 = vector.load %arg1[%c0_23, %c1_24, %c8_25, %c0_26] : memref<1x4x64x4xbf16, #tpu.memory_space<vmem>>, vector<1x1x55x4xbf16>
    %15 = vector.shape_cast %14 : vector<1x1x55x4xbf16> to vector<55x4xbf16>
    %c0_27 = arith.constant 0 : index
    %c0_28 = arith.constant 0 : index
    %c9 = arith.constant 9 : index
    %c0_29 = arith.constant 0 : index
    %16 = vector.load %arg1[%c0_27, %c0_28, %c9, %c0_29] : memref<1x4x64x4xbf16, #tpu.memory_space<vmem>>, vector<1x1x55x4xbf16>
    %17 = vector.shape_cast %16 : vector<1x1x55x4xbf16> to vector<55x4xbf16>
    %18 = tpu.concatenate %1, %3, %5, %7, %9, %11, %13, %15, %17 in 1 : vector<55x4xbf16>, vector<55x4xbf16>, vector<55x4xbf16>, vector<55x4xbf16>, vector<55x4xbf16>, vector<55x4xbf16>, vector<55x4xbf16>, vector<55x4xbf16>, vector<55x4xbf16> -> vector<55x36xbf16>
    %c0_30 = arith.constant 0 : index
    %c0_31 = arith.constant 0 : index
    %19 = vector.load %arg3[%c0_30, %c0_31] : memref<36x8xbf16, #tpu.memory_space<vmem>>, vector<36x8xbf16>
    %cst = arith.constant dense<0.000000e+00> : vector<55x8xf32>
    %20 = tpu.matmul %18, %19, %cst {dimension_numbers = #tpu.dot_dimension_numbers<[1], [0], [0], [1], [0, 0, 1, 1], [], []>} : vector<55x36xbf16>, vector<36x8xbf16>, vector<55x8xf32> -> vector<55x8xf32>
    %c0_32 = arith.constant 0 : index
    %c0_33 = arith.constant 0 : index
    %21 = vector.load %arg4[%c0_32, %c0_33] : memref<1x8xf32, #tpu.memory_space<vmem>>, vector<1x8xf32>
    %22 = vector.broadcast %21 : vector<1x8xf32> to vector<55x8xf32>
    %23 = arith.addf %20, %22 : vector<55x8xf32>
    %cst_34 = arith.constant 0.000000e+00 : f32
    %24 = vector.broadcast %cst_34 : f32 to vector<55x8xf32>
    %25 = arith.maximumf %23, %24 : vector<55x8xf32>
    %26 = arith.truncf %25 : vector<55x8xf32> to vector<55x8xbf16>
    %27 = vector.extract_strided_slice %26 {offsets = [0, 0], sizes = [37, 8], strides = [1, 1]} : vector<55x8xbf16> to vector<37x8xbf16>
    %28 = vector.extract_strided_slice %26 {offsets = [1, 0], sizes = [37, 8], strides = [1, 1]} : vector<55x8xbf16> to vector<37x8xbf16>
    %29 = vector.extract_strided_slice %26 {offsets = [2, 0], sizes = [37, 8], strides = [1, 1]} : vector<55x8xbf16> to vector<37x8xbf16>
    %30 = vector.extract_strided_slice %26 {offsets = [8, 0], sizes = [37, 8], strides = [1, 1]} : vector<55x8xbf16> to vector<37x8xbf16>
    %31 = vector.extract_strided_slice %26 {offsets = [9, 0], sizes = [37, 8], strides = [1, 1]} : vector<55x8xbf16> to vector<37x8xbf16>
    %32 = vector.extract_strided_slice %26 {offsets = [10, 0], sizes = [37, 8], strides = [1, 1]} : vector<55x8xbf16> to vector<37x8xbf16>
    %33 = vector.extract_strided_slice %26 {offsets = [16, 0], sizes = [37, 8], strides = [1, 1]} : vector<55x8xbf16> to vector<37x8xbf16>
    %34 = vector.extract_strided_slice %26 {offsets = [17, 0], sizes = [37, 8], strides = [1, 1]} : vector<55x8xbf16> to vector<37x8xbf16>
    %35 = vector.extract_strided_slice %26 {offsets = [18, 0], sizes = [37, 8], strides = [1, 1]} : vector<55x8xbf16> to vector<37x8xbf16>
    %36 = tpu.concatenate %27, %28, %29, %30, %31, %32, %33, %34, %35 in 1 : vector<37x8xbf16>, vector<37x8xbf16>, vector<37x8xbf16>, vector<37x8xbf16>, vector<37x8xbf16>, vector<37x8xbf16>, vector<37x8xbf16>, vector<37x8xbf16>, vector<37x8xbf16> -> vector<37x72xbf16>
    %c0_35 = arith.constant 0 : index
    %c0_36 = arith.constant 0 : index
    %37 = vector.load %arg5[%c0_35, %c0_36] : memref<72x8xbf16, #tpu.memory_space<vmem>>, vector<72x8xbf16>
    %cst_37 = arith.constant dense<0.000000e+00> : vector<37x8xf32>
    %38 = tpu.matmul %36, %37, %cst_37 {dimension_numbers = #tpu.dot_dimension_numbers<[1], [0], [0], [1], [0, 0, 1, 1], [], []>} : vector<37x72xbf16>, vector<72x8xbf16>, vector<37x8xf32> -> vector<37x8xf32>
    %c0_38 = arith.constant 0 : index
    %c0_39 = arith.constant 0 : index
    %39 = vector.load %arg6[%c0_38, %c0_39] : memref<1x8xf32, #tpu.memory_space<vmem>>, vector<1x8xf32>
    %40 = vector.broadcast %39 : vector<1x8xf32> to vector<37x8xf32>
    %41 = arith.addf %38, %40 : vector<37x8xf32>
    %cst_40 = arith.constant 0.000000e+00 : f32
    %42 = vector.broadcast %cst_40 : f32 to vector<37x8xf32>
    %43 = arith.maximumf %41, %42 : vector<37x8xf32>
    %44 = arith.truncf %43 : vector<37x8xf32> to vector<37x8xbf16>
    %cst_41 = arith.constant 0.000000e+00 : bf16
    %45 = vector.broadcast %cst_41 : bf16 to vector<3x8xbf16>
    %46 = tpu.concatenate %44, %45 in 0 : vector<37x8xbf16>, vector<3x8xbf16> -> vector<40x8xbf16>
    %47 = vector.extract_strided_slice %46 {offsets = [0, 0], sizes = [8, 8], strides = [1, 1]} : vector<40x8xbf16> to vector<8x8xbf16>
    %48 = vector.extract_strided_slice %46 {offsets = [8, 0], sizes = [8, 8], strides = [1, 1]} : vector<40x8xbf16> to vector<8x8xbf16>
    %49 = vector.extract_strided_slice %46 {offsets = [16, 0], sizes = [8, 8], strides = [1, 1]} : vector<40x8xbf16> to vector<8x8xbf16>
    %50 = vector.extract_strided_slice %46 {offsets = [24, 0], sizes = [8, 8], strides = [1, 1]} : vector<40x8xbf16> to vector<8x8xbf16>
    %51 = vector.extract_strided_slice %46 {offsets = [32, 0], sizes = [8, 8], strides = [1, 1]} : vector<40x8xbf16> to vector<8x8xbf16>
    %52 = tpu.concatenate %47, %48, %49, %50, %51 in 1 : vector<8x8xbf16>, vector<8x8xbf16>, vector<8x8xbf16>, vector<8x8xbf16>, vector<8x8xbf16> -> vector<8x40xbf16>
    %53 = vector.extract_strided_slice %52 {offsets = [0, 0], sizes = [1, 40], strides = [1, 1]} : vector<8x40xbf16> to vector<1x40xbf16>
    %54 = vector.extract_strided_slice %52 {offsets = [1, 0], sizes = [1, 40], strides = [1, 1]} : vector<8x40xbf16> to vector<1x40xbf16>
    %55 = vector.extract_strided_slice %52 {offsets = [2, 0], sizes = [1, 40], strides = [1, 1]} : vector<8x40xbf16> to vector<1x40xbf16>
    %56 = vector.extract_strided_slice %52 {offsets = [3, 0], sizes = [1, 40], strides = [1, 1]} : vector<8x40xbf16> to vector<1x40xbf16>
    %57 = vector.extract_strided_slice %52 {offsets = [4, 0], sizes = [1, 40], strides = [1, 1]} : vector<8x40xbf16> to vector<1x40xbf16>
    %58 = vector.extract_strided_slice %52 {offsets = [5, 0], sizes = [1, 40], strides = [1, 1]} : vector<8x40xbf16> to vector<1x40xbf16>
    %59 = vector.extract_strided_slice %52 {offsets = [6, 0], sizes = [1, 40], strides = [1, 1]} : vector<8x40xbf16> to vector<1x40xbf16>
    %60 = vector.extract_strided_slice %52 {offsets = [7, 0], sizes = [1, 40], strides = [1, 1]} : vector<8x40xbf16> to vector<1x40xbf16>
    %61 = tpu.concatenate %53, %54, %55, %56, %57, %58, %59, %60 in 1 : vector<1x40xbf16>, vector<1x40xbf16>, vector<1x40xbf16>, vector<1x40xbf16>, vector<1x40xbf16>, vector<1x40xbf16>, vector<1x40xbf16>, vector<1x40xbf16> -> vector<1x320xbf16>
    %c0_42 = arith.constant 0 : index
    %c0_43 = arith.constant 0 : index
    %62 = vector.load %arg7[%c0_42, %c0_43] : memref<320x50xbf16, #tpu.memory_space<vmem>>, vector<320x50xbf16>
    %cst_44 = arith.constant dense<0.000000e+00> : vector<1x50xf32>
    %63 = tpu.matmul %61, %62, %cst_44 {dimension_numbers = #tpu.dot_dimension_numbers<[1], [0], [0], [1], [0, 0, 1, 1], [], []>} : vector<1x320xbf16>, vector<320x50xbf16>, vector<1x50xf32> -> vector<1x50xf32>
    %c0_45 = arith.constant 0 : index
    %c0_46 = arith.constant 0 : index
    %64 = vector.load %arg8[%c0_45, %c0_46] : memref<1x50xf32, #tpu.memory_space<vmem>>, vector<1x50xf32>
    %65 = arith.addf %63, %64 : vector<1x50xf32>
    %cst_47 = arith.constant dense<0.000000e+00> : vector<1xf32>
    %66 = vector.multi_reduction <add>, %65, %cst_47 [1] : vector<1x50xf32> to vector<1xf32>
    %67 = vector.shape_cast %66 : vector<1xf32> to vector<1x1xf32>
    %cst_48 = arith.constant 5.000000e+01 : f32
    %68 = vector.broadcast %cst_48 : f32 to vector<1x1xf32>
    %69 = arith.divf %67, %68 : vector<1x1xf32>
    %70 = vector.broadcast %69 : vector<1x1xf32> to vector<1x50xf32>
    %71 = arith.subf %65, %70 : vector<1x50xf32>
    %72 = arith.mulf %71, %71 : vector<1x50xf32>
    %cst_49 = arith.constant dense<0.000000e+00> : vector<1xf32>
    %73 = vector.multi_reduction <add>, %72, %cst_49 [1] : vector<1x50xf32> to vector<1xf32>
    %74 = vector.shape_cast %73 : vector<1xf32> to vector<1x1xf32>
    %cst_50 = arith.constant 5.000000e+01 : f32
    %75 = vector.broadcast %cst_50 : f32 to vector<1x1xf32>
    %76 = arith.divf %74, %75 : vector<1x1xf32>
    %77 = vector.broadcast %69 : vector<1x1xf32> to vector<1x50xf32>
    %78 = arith.subf %65, %77 : vector<1x50xf32>
    %cst_51 = arith.constant 9.99999974E-6 : f32
    %79 = vector.broadcast %cst_51 : f32 to vector<1x1xf32>
    %80 = arith.addf %76, %79 : vector<1x1xf32>
    %81 = math.rsqrt %80 : vector<1x1xf32>
    %82 = vector.broadcast %81 : vector<1x1xf32> to vector<1x50xf32>
    %83 = arith.mulf %78, %82 : vector<1x50xf32>
    %c0_52 = arith.constant 0 : index
    %c0_53 = arith.constant 0 : index
    %84 = vector.load %arg9[%c0_52, %c0_53] : memref<1x50xf32, #tpu.memory_space<vmem>>, vector<1x50xf32>
    %85 = arith.mulf %83, %84 : vector<1x50xf32>
    %c0_54 = arith.constant 0 : index
    %c0_55 = arith.constant 0 : index
    %86 = vector.load %arg10[%c0_54, %c0_55] : memref<1x50xf32, #tpu.memory_space<vmem>>, vector<1x50xf32>
    %87 = arith.addf %85, %86 : vector<1x50xf32>
    %88 = arith.truncf %87 : vector<1x50xf32> to vector<1x50xbf16>
    %c0_56 = arith.constant 0 : index
    %c0_57 = arith.constant 0 : index
    %89 = vector.load %arg11[%c0_56, %c0_57] : memref<50x1024xbf16, #tpu.memory_space<vmem>>, vector<50x1024xbf16>
    %cst_58 = arith.constant dense<0.000000e+00> : vector<1x1024xf32>
    %90 = tpu.matmul %88, %89, %cst_58 {dimension_numbers = #tpu.dot_dimension_numbers<[1], [0], [0], [1], [0, 0, 1, 1], [], []>} : vector<1x50xbf16>, vector<50x1024xbf16>, vector<1x1024xf32> -> vector<1x1024xf32>
    %c0_59 = arith.constant 0 : index
    %c0_60 = arith.constant 0 : index
    %91 = vector.load %arg12[%c0_59, %c0_60] : memref<1x1024xf32, #tpu.memory_space<vmem>>, vector<1x1024xf32>
    %92 = arith.addf %90, %91 : vector<1x1024xf32>
    %cst_61 = arith.constant 0.000000e+00 : f32
    %93 = vector.broadcast %cst_61 : f32 to vector<1x1024xf32>
    %94 = arith.maximumf %92, %93 : vector<1x1024xf32>
    %95 = arith.truncf %94 : vector<1x1024xf32> to vector<1x1024xbf16>
    %c0_62 = arith.constant 0 : index
    %c0_63 = arith.constant 0 : index
    %96 = vector.load %arg13[%c0_62, %c0_63] : memref<1024x1024xbf16, #tpu.memory_space<vmem>>, vector<1024x1024xbf16>
    %cst_64 = arith.constant dense<0.000000e+00> : vector<1x1024xf32>
    %97 = tpu.matmul %95, %96, %cst_64 {dimension_numbers = #tpu.dot_dimension_numbers<[1], [0], [0], [1], [0, 0, 1, 1], [], []>} : vector<1x1024xbf16>, vector<1024x1024xbf16>, vector<1x1024xf32> -> vector<1x1024xf32>
    %c0_65 = arith.constant 0 : index
    %c0_66 = arith.constant 0 : index
    %98 = vector.load %arg14[%c0_65, %c0_66] : memref<1x1024xf32, #tpu.memory_space<vmem>>, vector<1x1024xf32>
    %99 = arith.addf %97, %98 : vector<1x1024xf32>
    %cst_67 = arith.constant 0.000000e+00 : f32
    %100 = vector.broadcast %cst_67 : f32 to vector<1x1024xf32>
    %101 = arith.maximumf %99, %100 : vector<1x1024xf32>
    %102 = arith.truncf %101 : vector<1x1024xf32> to vector<1x1024xbf16>
    %c0_68 = arith.constant 0 : index
    %c0_69 = arith.constant 0 : index
    %103 = vector.load %arg15[%c0_68, %c0_69] : memref<1024x6xbf16, #tpu.memory_space<vmem>>, vector<1024x6xbf16>
    %cst_70 = arith.constant dense<0.000000e+00> : vector<1x6xf32>
    %104 = tpu.matmul %102, %103, %cst_70 {dimension_numbers = #tpu.dot_dimension_numbers<[1], [0], [0], [1], [0, 0, 1, 1], [], []>} : vector<1x1024xbf16>, vector<1024x6xbf16>, vector<1x6xf32> -> vector<1x6xf32>
    %c0_71 = arith.constant 0 : index
    %c0_72 = arith.constant 0 : index
    %105 = vector.load %arg16[%c0_71, %c0_72] : memref<1x6xf32, #tpu.memory_space<vmem>>, vector<1x6xf32>
    %106 = arith.addf %104, %105 : vector<1x6xf32>
    %107 = vector.extract_strided_slice %106 {offsets = [0, 0], sizes = [1, 3], strides = [1, 1]} : vector<1x6xf32> to vector<1x3xf32>
    %108 = vector.extract_strided_slice %106 {offsets = [0, 3], sizes = [1, 3], strides = [1, 1]} : vector<1x6xf32> to vector<1x3xf32>
    %c0_73 = arith.constant 0 : index
    %c0_74 = arith.constant 0 : index
    %c0_75 = arith.constant 0 : index
    %109 = vector.load %arg2[%c0_73, %c0_74, %c0_75] : memref<1x1x3xf32, #tpu.memory_space<vmem>>, vector<1x1x3xf32>
    %110 = vector.shape_cast %109 : vector<1x1x3xf32> to vector<1x3xf32>
    %111 = math.tanh %108 : vector<1x3xf32>
    %cst_76 = arith.constant 1.000000e+00 : f32
    %112 = vector.broadcast %cst_76 : f32 to vector<1x3xf32>
    %113 = arith.addf %111, %112 : vector<1x3xf32>
    %cst_77 = arith.constant 6.000000e+00 : f32
    %114 = vector.broadcast %cst_77 : f32 to vector<1x3xf32>
    %115 = arith.mulf %114, %113 : vector<1x3xf32>
    %cst_78 = arith.constant -1.000000e+01 : f32
    %116 = vector.broadcast %cst_78 : f32 to vector<1x3xf32>
    %117 = arith.addf %116, %115 : vector<1x3xf32>
    %118 = math.exp %117 : vector<1x3xf32>
    %119 = arith.mulf %110, %118 : vector<1x3xf32>
    %120 = arith.addf %107, %119 : vector<1x3xf32>
    %cst_79 = arith.constant -5.000000e-01 : f32
    %121 = vector.broadcast %cst_79 : f32 to vector<1x3xf32>
    %122 = arith.mulf %121, %110 : vector<1x3xf32>
    %123 = arith.mulf %122, %110 : vector<1x3xf32>
    %124 = arith.subf %123, %117 : vector<1x3xf32>
    %cst_80 = arith.constant dense<0.000000e+00> : vector<1xf32>
    %125 = vector.multi_reduction <add>, %124, %cst_80 [1] : vector<1x3xf32> to vector<1xf32>
    %126 = vector.shape_cast %125 : vector<1xf32> to vector<1x1xf32>
    %cst_81 = arith.constant 2.75681567 : f32
    %127 = vector.broadcast %cst_81 : f32 to vector<1x1xf32>
    %128 = arith.subf %126, %127 : vector<1x1xf32>
    %129 = math.tanh %107 : vector<1x3xf32>
    %130 = math.tanh %120 : vector<1x3xf32>
    %131 = arith.mulf %130, %130 : vector<1x3xf32>
    %cst_82 = arith.constant 1.000000e+00 : f32
    %132 = vector.broadcast %cst_82 : f32 to vector<1x3xf32>
    %133 = arith.subf %132, %131 : vector<1x3xf32>
    %cst_83 = arith.constant 0.000000e+00 : f32
    %134 = vector.broadcast %cst_83 : f32 to vector<1x3xf32>
    %135 = arith.maximumf %133, %134 : vector<1x3xf32>
    %cst_84 = arith.constant 9.99999997E-7 : f32
    %136 = vector.broadcast %cst_84 : f32 to vector<1x3xf32>
    %137 = arith.addf %135, %136 : vector<1x3xf32>
    %138 = math.log %137 : vector<1x3xf32>
    %cst_85 = arith.constant dense<0.000000e+00> : vector<1xf32>
    %139 = vector.multi_reduction <add>, %138, %cst_85 [1] : vector<1x3xf32> to vector<1xf32>
    %140 = vector.shape_cast %139 : vector<1xf32> to vector<1x1xf32>
    %141 = arith.subf %128, %140 : vector<1x1xf32>
    %cst_86 = arith.constant 0.000000e+00 : f32
    %142 = vector.broadcast %cst_86 : f32 to vector<1x118xf32>
    %143 = tpu.concatenate %129, %130, %117, %141, %142 in 1 : vector<1x3xf32>, vector<1x3xf32>, vector<1x3xf32>, vector<1x1xf32>, vector<1x118xf32> -> vector<1x128xf32>
    %c0_87 = arith.constant 0 : index
    %c0_88 = arith.constant 0 : index
    %c0_89 = arith.constant 0 : index
    %144 = vector.load %arg17[%c0_87, %c0_88, %c0_89] : memref<1x1x128xf32, #tpu.memory_space<vmem>>, vector<1x1x128xf32>
    %145 = vector.shape_cast %144 : vector<1x1x128xf32> to vector<1x128xf32>
    %146 = vector.shape_cast %143 : vector<1x128xf32> to vector<1x1x128xf32>
    tpu.vector_store %arg17[%c0_87, %c0_88, %c0_89], %146 {strides = array<i32>} : memref<1x1x128xf32, #tpu.memory_space<vmem>>, vector<1x1x128xf32>,
    return
  }
  func.func @transform_0(%arg0: i32) -> (i32, i32, i32, i32) {
    %c0_i32 = arith.constant 0 : i32
    %c0_i32_0 = arith.constant 0 : i32
    %c0_i32_1 = arith.constant 0 : i32
    %c0_i32_2 = arith.constant 0 : i32
    return %arg0, %c0_i32, %c0_i32_0, %c0_i32_1 : i32, i32, i32, i32
  }
  func.func @transform_1(%arg0: i32) -> (i32, i32, i32) {
    %c0_i32 = arith.constant 0 : i32
    %c0_i32_0 = arith.constant 0 : i32
    %c0_i32_1 = arith.constant 0 : i32
    return %arg0, %c0_i32, %c0_i32_0 : i32, i32, i32
  }
  func.func @transform_2(%arg0: i32) -> (i32, i32) {
    %c0_i32 = arith.constant 0 : i32
    %c0_i32_0 = arith.constant 0 : i32
    %c0_i32_1 = arith.constant 0 : i32
    return %c0_i32, %c0_i32_0 : i32, i32
  }
  func.func @transform_3(%arg0: i32) -> (i32, i32) {
    %c0_i32 = arith.constant 0 : i32
    %c0_i32_0 = arith.constant 0 : i32
    %c0_i32_1 = arith.constant 0 : i32
    return %c0_i32, %c0_i32_0 : i32, i32
  }
  func.func @transform_4(%arg0: i32) -> (i32, i32) {
    %c0_i32 = arith.constant 0 : i32
    %c0_i32_0 = arith.constant 0 : i32
    %c0_i32_1 = arith.constant 0 : i32
    return %c0_i32, %c0_i32_0 : i32, i32
  }
  func.func @transform_5(%arg0: i32) -> (i32, i32) {
    %c0_i32 = arith.constant 0 : i32
    %c0_i32_0 = arith.constant 0 : i32
    %c0_i32_1 = arith.constant 0 : i32
    return %c0_i32, %c0_i32_0 : i32, i32
  }
  func.func @transform_6(%arg0: i32) -> (i32, i32) {
    %c0_i32 = arith.constant 0 : i32
    %c0_i32_0 = arith.constant 0 : i32
    %c0_i32_1 = arith.constant 0 : i32
    return %c0_i32, %c0_i32_0 : i32, i32
  }
  func.func @transform_7(%arg0: i32) -> (i32, i32) {
    %c0_i32 = arith.constant 0 : i32
    %c0_i32_0 = arith.constant 0 : i32
    %c0_i32_1 = arith.constant 0 : i32
    return %c0_i32, %c0_i32_0 : i32, i32
  }
  func.func @transform_8(%arg0: i32) -> (i32, i32) {
    %c0_i32 = arith.constant 0 : i32
    %c0_i32_0 = arith.constant 0 : i32
    %c0_i32_1 = arith.constant 0 : i32
    return %c0_i32, %c0_i32_0 : i32, i32
  }
  func.func @transform_9(%arg0: i32) -> (i32, i32) {
    %c0_i32 = arith.constant 0 : i32
    %c0_i32_0 = arith.constant 0 : i32
    %c0_i32_1 = arith.constant 0 : i32
    return %c0_i32, %c0_i32_0 : i32, i32
  }
  func.func @transform_10(%arg0: i32) -> (i32, i32) {
    %c0_i32 = arith.constant 0 : i32
    %c0_i32_0 = arith.constant 0 : i32
    %c0_i32_1 = arith.constant 0 : i32
    return %c0_i32, %c0_i32_0 : i32, i32
  }
  func.func @transform_11(%arg0: i32) -> (i32, i32) {
    %c0_i32 = arith.constant 0 : i32
    %c0_i32_0 = arith.constant 0 : i32
    %c0_i32_1 = arith.constant 0 : i32
    return %c0_i32, %c0_i32_0 : i32, i32
  }
  func.func @transform_12(%arg0: i32) -> (i32, i32) {
    %c0_i32 = arith.constant 0 : i32
    %c0_i32_0 = arith.constant 0 : i32
    %c0_i32_1 = arith.constant 0 : i32
    return %c0_i32, %c0_i32_0 : i32, i32
  }
  func.func @transform_13(%arg0: i32) -> (i32, i32) {
    %c0_i32 = arith.constant 0 : i32
    %c0_i32_0 = arith.constant 0 : i32
    %c0_i32_1 = arith.constant 0 : i32
    return %c0_i32, %c0_i32_0 : i32, i32
  }
  func.func @transform_14(%arg0: i32) -> (i32, i32) {
    %c0_i32 = arith.constant 0 : i32
    %c0_i32_0 = arith.constant 0 : i32
    %c0_i32_1 = arith.constant 0 : i32
    return %c0_i32, %c0_i32_0 : i32, i32
  }
  func.func @transform_15(%arg0: i32) -> (i32, i32) {
    %c0_i32 = arith.constant 0 : i32
    %c0_i32_0 = arith.constant 0 : i32
    %c0_i32_1 = arith.constant 0 : i32
    return %c0_i32, %c0_i32_0 : i32, i32
  }
  func.func @transform_16(%arg0: i32) -> (i32, i32, i32) {
    %c0_i32 = arith.constant 0 : i32
    %c0_i32_0 = arith.constant 0 : i32
    %c0_i32_1 = arith.constant 0 : i32
    return %arg0, %c0_i32, %c0_i32_0 : i32, i32, i32
  }
}

</mosaic_0001>

<bundles_post_ra>
// kernel: tpu_custom_call.1
= control target key start
LH: loop header
LB: loop body
LE: loop exit
PB: predicated region body
PF: predicated region fallthrough
CT: control target
= control target key end

     0   :  { %s9866_s0 = inlined_call_operand.vmem [shape: bf16[2,4,64,4], index: 0, kind: input, shape index: {}]   ;;  %s9867_s1 = inlined_call_operand.hbm [shape: f32[2,1,3], index: 1, kind: input, shape index: {}]   ;;  %s9868_s2 = inlined_call_operand.vmem [shape: bf16[36,8], index: 2, kind: input, shape index: {}]   ;;  %s9869_s3 = inlined_call_operand.hbm [shape: f32[1,8], index: 3, kind: input, shape index: {}]   ;;  %s9870_s4 = inlined_call_operand.vmem [shape: bf16[72,8], index: 4, kind: input, shape index: {}]   ;;  %s9871_s5 = inlined_call_operand.hbm [shape: f32[1,8], index: 5, kind: input, shape index: {}]   ;;  %s9872_s6 = inlined_call_operand.vmem [shape: bf16[320,50], index: 6, kind: input, shape index: {}]   ;;  %s9873_s7 = inlined_call_operand.hbm [shape: f32[1,50], index: 7, kind: input, shape index: {}]   ;;  %s9874_s8 = inlined_call_operand.hbm [shape: f32[1,50], index: 8, kind: input, shape index: {}]   ;;  %s9875_s9 = inlined_call_operand.hbm [shape: f32[1,50], index: 9, kind: input, shape index: {}]   ;;  %s9876_s10 = inlined_call_operand.hbm [shape: bf16[50,1024], index: 10, kind: input, shape index: {}]   ;;  %s9877_s11 = inlined_call_operand.hbm [shape: f32[1,1024], index: 11, kind: input, shape index: {}]   ;;  %s9878_s12 = inlined_call_operand.hbm [shape: bf16[1024,1024], index: 12, kind: input, shape index: {}]   ;;  %s9879_s13 = inlined_call_operand.hbm [shape: f32[1,1024], index: 13, kind: input, shape index: {}]   ;;  %s9880_s14 = inlined_call_operand.vmem [shape: bf16[1024,6], index: 14, kind: input, shape index: {}]   ;;  %s9881_s15 = inlined_call_operand.hbm [shape: f32[1,6], index: 15, kind: input, shape index: {}]   ;;  %s9882_s16 = inlined_call_operand.hbm [shape: f32[2,1,128], index: 16, kind: output, shape index: {}]  }
   0x1   :  { %9898 = sst [smem:[#allocation29_spill]] %s9866_s0 }
   0x2   :  { %9899 = sst [smem:[#allocation30_spill]] %s9867_s1 }
   0x3   :  { %9900 = sst [smem:[#allocation31_spill]] %s9868_s2 }
   0x4   :  { %9901 = sst [smem:[#allocation32_spill]] %s9869_s3 }
   0x5   :  { %9902 = sst [smem:[#allocation33_spill]] %s9870_s4 }
   0x6   :  { %9903 = sst [smem:[#allocation34_spill]] %s9871_s5 }
   0x7   :  { %9904 = sst [smem:[#allocation35_spill]] %s9872_s6 }
   0x8   :  { %9905 = sst [smem:[#allocation36_spill]] %s9880_s14 }
   0x9   :  { %9906 = sst [smem:[#allocation37_spill]] %s9882_s16 }
   0xa   :  { %21 = vsyncpa [#allocation3], 0 }
   0xb   :  { %23 = vsyncpa [#allocation3 + $0x1], 0 }
   0xc   :  { %24 = vsyncpa [#allocation6], 0 }
   0xd   :  { %25 = vsyncpa [#allocation9], 0 }
   0xe   :  { %26 = vsyncpa [#allocation12], 0 }
   0xf   :  { %27 = vsyncpa [#allocation15], 0 }
  0x10   :  { %28 = vsyncpa [#allocation18], 0 }
  0x11   :  { %29 = vsyncpa [#allocation4], 0 }
  0x12   :  { %31 = vsyncpa [#allocation4 + $0x1], 0  ;;  %s8693_s21 = smov 0   ;;  %s8695_s22 = smov 0  }
  0x13   :  { %s8697_s23 = smov 0   ;;  %s8699_s24 = smov 0  }
  0x14 LB: > { %s8572_s25 = smov [#allocation5]   ;;  %s8714_s27 = sadd.s32 4294967295, %s8570_s24   ;;  %s8570_s24 = sphi %s8699_s24, %s9948_s24   ;;  %s8566_s23 = sphi %s8697_s23, %s9947_s23   ;;  %s8562_s22 = sphi %s8695_s22, %s9946_s22   ;;  %s8558_s21 = sphi %s8693_s21, %s9945_s21  }
  0x15   : > { %s430_s26 = sshll.u32 %s8572_s25, 4  ;;  %p6902_p0 = scmp.ge.s32.totalorder %s8570_s24, 1  ;;  %s8719_s26 = int_to_ptr.vmem [resolvable:$true] %s430_s26 }
  0x16   : > { %p9889_p1 = scmp.eq.s32.totalorder %s8714_s27, 0  ;;  %p414_p2 = scmp.lt.s32.totalorder %s8570_s24, 3 }
  0x17   : > { %s8573_s29 = smov [#allocation8]   ;;  %s8574_s0 = smov [#allocation11]  }
  0x18   : > { %p8721_p3 = pnand %p6902_p0, %p414_p2  ;;  %s458_s30 = sshll.u32 %s8573_s29, 4  ;;  %s8728_s30 = int_to_ptr.vmem [resolvable:$true] %s458_s30 }
  0x19   : > { %s480_s17 = sshll.u32 %s8574_s0, 4  ;;  %s8575_s19 = smov [#allocation14]   ;;  %s8736_s17 = int_to_ptr.vmem [resolvable:$true] %s480_s17 }
  0x1a   : > { %s9907_s28 = scalar_select %p8721_p3, 1, 0 }
  0x1b   : > { %p7912_p5 = pneg %p8721_p3  ;;  %s8738_s20 = sshll.u32 %s8575_s19, 4  ;;  %s505_s20 = int_to_ptr.vmem [resolvable:$true] %s8738_s20 }
  0x1c   : > { %9908 = sst [smem:[#allocation28_spill]] %s9907_s28  ;;  %s9910_s3 = sld [smem:[#allocation32_spill]] }
  0x1d   : > { %p8732_p6 = pnand %p7912_p5, %p9889_p1 }
  0x1f   : > { %p8748_p8 = pneg %p8732_p6 }
  0x22   : > { %s8174_s14 = scalar_lea.hbm %s9910_s3, 16 }
  0x23   : > { %p8175_p7 = scmp.ne.s32.totalorder %s9910_s3, %s8174_s14  ;;  %p8181_p11 = scmp.lt.u32.totalorder %s8174_s14, %s9910_s3 }
  0x25   : > { %p8177_p9 = pnand %p8748_p8, %p8175_p7 }
  0x27   : > { %p8178_p10 = pneg %p8177_p9 }
  0x29   : > { %p8183_p12 = pnand %p8181_p11, %p8178_p10 }
  0x2b   : > { %8186 = shalt.err (!%p8183_p12)
}
  0x2c   : > { %s8187_s6 = scalar_lea.vmem %s8719_s26, 16  ;;  %s8194_s16 = scalar_lea.vmem %s8719_s26, 32 }
  0x2d   : > { %p8188_p13 = scmp.ne.s32.totalorder %s8719_s26, %s8187_s6  ;;  %p8195_p5 = scmp.lt.s32.totalorder %s8719_s26, %s8719_s26 }
  0x2e   : > { %p8196_p7 = scmp.lt.s32.totalorder %s8194_s16, %s8187_s6 }
  0x2f   : > { %p8190_p0 = pnand %p8188_p13, %p8748_p8 }
  0x30   : > { %p8197_p9 = por %p8196_p7, %p8195_p5 }
  0x31   : > { %p8191_p2 = pneg %p8190_p0 }
  0x33   : > { %p8198_p4 = pnand %p8197_p9, %p8191_p2 }
  0x35   : > { %8201 = shalt.err (!%p8198_p4)
}
  0x36   : > { %7915 = dma.hbm_to_vmem [thread:$0]  (!%p8732_p6), %s9910_s3, 16, %s8719_s26, [#allocation6]  }
  0x37   : > { %s8202_s19 = scalar_lea.hbm %s9873_s7, 16 }
  0x38   : > { %p8203_p10 = scmp.ne.s32.totalorder %s9873_s7, %s8202_s19  ;;  %p8209_p4 = scmp.lt.u32.totalorder %s8202_s19, %s9873_s7 }
  0x3a   : > { %p8205_p11 = pnand %p8203_p10, %p8748_p8 }
  0x3c   : > { %p8206_p12 = pneg %p8205_p11 }
  0x3e   : > { %p8211_p13 = pnand %p8209_p4, %p8206_p12 }
  0x40   : > { %8214 = shalt.err (!%p8211_p13)
}
  0x41   : > { %s8215_s26 = scalar_lea.vmem %s8728_s30, 16  ;;  %s8222_s2 = scalar_lea.vmem %s8728_s30, 32 }
  0x42   : > { %p8216_p0 = scmp.ne.s32.totalorder %s8728_s30, %s8215_s26  ;;  %p8223_p7 = scmp.lt.s32.totalorder %s8728_s30, %s8728_s30 }
  0x43   : > { %p8224_p9 = scmp.lt.s32.totalorder %s8222_s2, %s8215_s26 }
  0x44   : > { %p8218_p2 = pnand %p8216_p0, %p8748_p8 }
  0x45   : > { %p8225_p10 = por %p8224_p9, %p8223_p7 }
  0x46   : > { %p8219_p5 = pneg %p8218_p2 }
  0x48   : > { %p8226_p11 = pnand %p8225_p10, %p8219_p5 }
  0x4a   : > { %8229 = shalt.err (!%p8226_p11)
}
  0x4b   : > { %7921 = dma.hbm_to_vmem [thread:$0]  (!%p8732_p6), %s9873_s7, 16, %s8728_s30, [#allocation9]  }
  0x4c   : > { %s8230_s29 = scalar_lea.hbm %s9875_s9, 16 }
  0x4d   : > { %p8231_p12 = scmp.ne.s32.totalorder %s9875_s9, %s8230_s29  ;;  %p8237_p0 = scmp.lt.u32.totalorder %s8230_s29, %s9875_s9 }
  0x4f   : > { %p8233_p4 = pnand %p8231_p12, %p8748_p8 }
  0x51   : > { %p8234_p13 = pneg %p8233_p4 }
  0x53   : > { %p8239_p2 = pnand %p8237_p0, %p8234_p13 }
  0x55   : > { %8242 = shalt.err (!%p8239_p2)
}
  0x56   : > { %s8243_s30 = scalar_lea.vmem %s8736_s17, 16  ;;  %s8250_s2 = scalar_lea.vmem %s8736_s17, 32 }
  0x57   : > { %p8244_p5 = scmp.ne.s32.totalorder %s8736_s17, %s8243_s30  ;;  %p8251_p10 = scmp.lt.s32.totalorder %s8736_s17, %s8736_s17 }
  0x58   : > { %p8252_p11 = scmp.lt.s32.totalorder %s8250_s2, %s8243_s30 }
  0x59   : > { %p8246_p7 = pnand %p8244_p5, %p8748_p8 }
  0x5a   : > { %p8253_p12 = por %p8252_p11, %p8251_p10 }
  0x5b   : > { %p8247_p9 = pneg %p8246_p7 }
  0x5d   : > { %p8254_p4 = pnand %p8253_p12, %p8247_p9 }
  0x5f   : > { %8257 = shalt.err (!%p8254_p4)
}
  0x60   : > { %7927 = dma.hbm_to_vmem [thread:$0]  (!%p8732_p6), %s9875_s9, 16, %s8736_s17, [#allocation12]  }
  0x61   : > { %s8576_s14 = smov [#allocation17]   ;;  %s8258_s6 = scalar_lea.hbm %s9877_s11, 128 }
  0x62   : > { %s528_s25 = sshll.u32 %s8576_s14, 4  ;;  %p8259_p13 = scmp.ne.s32.totalorder %s9877_s11, %s8258_s6  ;;  %s529_s25 = int_to_ptr.vmem [resolvable:$true] %s528_s25 }
  0x63   : > { %p8265_p5 = scmp.lt.u32.totalorder %s8258_s6, %s9877_s11 }
  0x64   : > { %p8261_p0 = pnand %p8259_p13, %p8748_p8 }
  0x66   : > { %p8262_p2 = pneg %p8261_p0 }
  0x68   : > { %p8267_p7 = pnand %p8265_p5, %p8262_p2 }
  0x6a   : > { %8270 = shalt.err (!%p8267_p7)
}
  0x6b   : > { %s8271_s17 = scalar_lea.vmem %s505_s20, 128  ;;  %p8279_p12 = scmp.lt.s32.totalorder %s505_s20, %s505_s20 }
  0x6c   : > { %p8272_p9 = scmp.ne.s32.totalorder %s505_s20, %s8271_s17  ;;  %p8280_p4 = scmp.lt.s32.totalorder %s8271_s17, %s8271_s17 }
  0x6e   : > { %p8274_p10 = pnand %p8272_p9, %p8748_p8  ;;  %p8281_p1 = por %p8280_p4, %p8279_p12 }
  0x70   : > { %p8275_p11 = pneg %p8274_p10 }
  0x72   : > { %p8282_p3 = pnand %p8281_p1, %p8275_p11 }
  0x74   : > { %8285 = shalt.err (!%p8282_p3)
}
  0x75   : > { %7933 = dma.hbm_to_vmem [thread:$0]  (!%p8732_p6), %s9877_s11, 128, %s505_s20, [#allocation15]  }
  0x76   : > { %s8286_s19 = scalar_lea.hbm %s9879_s13, 128 }
  0x77   : > { %p8287_p13 = scmp.ne.s32.totalorder %s9879_s13, %s8286_s19  ;;  %p8293_p3 = scmp.lt.u32.totalorder %s8286_s19, %s9879_s13 }
  0x79   : > { %p8289_p0 = pnand %p8287_p13, %p8748_p8 }
  0x7b   : > { %p8290_p1 = pneg %p8289_p0 }
  0x7d   : > { %p8295_p2 = pnand %p8293_p3, %p8290_p1 }
  0x7f   : > { %8298 = shalt.err (!%p8295_p2)
}
  0x80   : > { %s8299_s2 = scalar_lea.vmem %s529_s25, 128  ;;  %p8307_p10 = scmp.lt.s32.totalorder %s529_s25, %s529_s25 }
  0x81   : > { %p8300_p5 = scmp.ne.s32.totalorder %s529_s25, %s8299_s2  ;;  %p8308_p11 = scmp.lt.s32.totalorder %s8299_s2, %s8299_s2 }
  0x83   : > { %p8302_p7 = pnand %p8300_p5, %p8748_p8  ;;  %p8309_p12 = por %p8308_p11, %p8307_p10 }
  0x85   : > { %p8303_p9 = pneg %p8302_p7 }
  0x87   : > { %p8310_p4 = pnand %p8309_p12, %p8303_p9 }
  0x89   : > { %8313 = shalt.err (!%p8310_p4)
}
  0x8a   : > { %7939 = dma.hbm_to_vmem [thread:$0]  (!%p8732_p6), %s9879_s13, 128, %s529_s25, [#allocation18]  }
  0x8b   : > { %s8577_s28 = smov [#allocation7]   ;;  %s8578_s14 = smov [#allocation10]  }
  0x8c   : > { %s444_s4 = sshll.u32 %s8577_s28, 4  ;;  %s469_s29 = sshll.u32 %s8578_s14, 4  ;;  %s445_s4 = int_to_ptr.vmem [resolvable:$true] %s444_s4  ;;  %s470_s29 = int_to_ptr.vmem [resolvable:$true] %s469_s29 }
  0x8d   : > { %s9912_s5 = sld [smem:[#allocation34_spill]] }
  0x93   : > { %s8314_s16 = scalar_lea.hbm %s9912_s5, 16 }
  0x94   : > { %p8315_p13 = scmp.ne.s32.totalorder %s9912_s5, %s8314_s16  ;;  %p8321_p3 = scmp.lt.u32.totalorder %s8314_s16, %s9912_s5 }
  0x96   : > { %p8317_p0 = pnand %p8315_p13, %p8748_p8 }
  0x98   : > { %p8318_p1 = pneg %p8317_p0 }
  0x9a   : > { %p8323_p2 = pnand %p8321_p3, %p8318_p1 }
  0x9c   : > { %8326 = shalt.err (!%p8323_p2)
}
  0x9d   : > { %s8327_s25 = scalar_lea.vmem %s445_s4, 16  ;;  %s8334_s17 = scalar_lea.vmem %s445_s4, 32 }
  0x9e   : > { %p8328_p5 = scmp.ne.s32.totalorder %s445_s4, %s8327_s25  ;;  %p8335_p10 = scmp.lt.s32.totalorder %s445_s4, %s445_s4 }
  0x9f   : > { %p8336_p11 = scmp.lt.s32.totalorder %s8334_s17, %s8327_s25 }
  0xa0   : > { %p8330_p7 = pnand %p8328_p5, %p8748_p8 }
  0xa1   : > { %p8337_p12 = por %p8336_p11, %p8335_p10 }
  0xa2   : > { %p8331_p9 = pneg %p8330_p7 }
  0xa4   : > { %p8338_p4 = pnand %p8337_p12, %p8331_p9 }
  0xa6   : > { %8341 = shalt.err (!%p8338_p4)
}
  0xa7   : > { %7918 = dma.hbm_to_vmem [thread:$0]  (!%p8732_p6), %s9912_s5, 16, %s445_s4, [#allocation6]  }
  0xa8   : > { %s8342_s16 = scalar_lea.hbm %s9874_s8, 16 }
  0xa9   : > { %p8343_p13 = scmp.ne.s32.totalorder %s9874_s8, %s8342_s16  ;;  %p8349_p3 = scmp.lt.u32.totalorder %s8342_s16, %s9874_s8 }
  0xab   : > { %p8345_p0 = pnand %p8343_p13, %p8748_p8 }
  0xad   : > { %p8346_p1 = pneg %p8345_p0 }
  0xaf   : > { %p8351_p2 = pnand %p8349_p3, %p8346_p1 }
  0xb1   : > { %8354 = shalt.err (!%p8351_p2)
}
  0xb2   : > { %s8355_s25 = scalar_lea.vmem %s470_s29, 16  ;;  %s8362_s4 = scalar_lea.vmem %s470_s29, 32 }
  0xb3   : > { %p8356_p5 = scmp.ne.s32.totalorder %s470_s29, %s8355_s25  ;;  %p8363_p10 = scmp.lt.s32.totalorder %s470_s29, %s470_s29 }
  0xb4   : > { %p8364_p11 = scmp.lt.s32.totalorder %s8362_s4, %s8355_s25 }
  0xb5   : > { %p8358_p7 = pnand %p8356_p5, %p8748_p8 }
  0xb6   : > { %p8365_p12 = por %p8364_p11, %p8363_p10 }
  0xb7   : > { %p8359_p9 = pneg %p8358_p7 }
  0xb9   : > { %p8366_p4 = pnand %p8365_p12, %p8359_p9 }
  0xbb   : > { %8369 = shalt.err (!%p8366_p4)
}
  0xbc   : > { %7924 = dma.hbm_to_vmem [thread:$0]  (!%p8732_p6), %s9874_s8, 16, %s470_s29, [#allocation9]  }
  0xbd   : > { %s8579_s14 = smov [#allocation13]   ;;  %s8370_s26 = scalar_lea.hbm %s9876_s10, 3584 }
  0xbe   : > { %s490_s19 = sshll.u32 %s8579_s14, 4  ;;  %p8371_p13 = scmp.ne.s32.totalorder %s9876_s10, %s8370_s26  ;;  %s491_s19 = int_to_ptr.vmem [resolvable:$true] %s490_s19 }
  0xbf   : > { %p8377_p3 = scmp.lt.u32.totalorder %s8370_s26, %s9876_s10 }
  0xc0   : > { %p8373_p0 = pnand %p8371_p13, %p8748_p8 }
  0xc2   : > { %p8374_p1 = pneg %p8373_p0 }
  0xc4   : > { %p8379_p2 = pnand %p8377_p3, %p8374_p1 }
  0xc6   : > { %8382 = shalt.err (!%p8379_p2)
}
  0xc7   : > { %s8383_s29 = scalar_lea.vmem %s491_s19, 3584  ;;  %p8391_p10 = scmp.lt.s32.totalorder %s491_s19, %s491_s19 }
  0xc8   : > { %p8384_p5 = scmp.ne.s32.totalorder %s491_s19, %s8383_s29  ;;  %p8392_p11 = scmp.lt.s32.totalorder %s8383_s29, %s8383_s29 }
  0xca   : > { %p8386_p7 = pnand %p8384_p5, %p8748_p8  ;;  %p8393_p12 = por %p8392_p11, %p8391_p10 }
  0xcc   : > { %p8387_p9 = pneg %p8386_p7 }
  0xce   : > { %p8394_p4 = pnand %p8393_p12, %p8387_p9 }
  0xd0   : > { %8397 = shalt.err (!%p8394_p4)
}
  0xd1   : > { %s8580_s4 = smov 512   ;;  %s8581_s17 = smov 32  }
  0xd2   : > { %7930 = dma.hbm_to_vmem [thread:$0]  (!%p8732_p6), %s9876_s10, 3584, %s491_s19, [#allocation12], %s8580_s4, %s8580_s4, %s8581_s17  }
  0xd3   : > { %s8582_s6 = smov [#allocation16]   ;;  %s8583_s26 = smov [#allocation19]  }
  0xd4   : > { %s514_s16 = sshll.u32 %s8582_s6, 4  ;;  %s542_s30 = sshll.u32 %s8583_s26, 4  ;;  %s515_s16 = int_to_ptr.vmem [resolvable:$true] %s514_s16  ;;  %s8909_s30 = int_to_ptr.vmem [resolvable:$true] %s542_s30 }
  0xd5   : > { %s8398_s25 = scalar_lea.hbm %s9878_s12, 65536 }
  0xd6   : > { %p8399_p13 = scmp.ne.s32.totalorder %s9878_s12, %s8398_s25  ;;  %p8405_p3 = scmp.lt.u32.totalorder %s8398_s25, %s9878_s12 }
  0xd8   : > { %p8401_p0 = pnand %p8399_p13, %p8748_p8 }
  0xda   : > { %p8402_p1 = pneg %p8401_p0 }
  0xdc   : > { %p8407_p2 = pnand %p8405_p3, %p8402_p1 }
  0xde   : > { %8410 = shalt.err (!%p8407_p2)
}
  0xdf   : > { %s8411_s14 = scalar_lea.vmem %s515_s16, 65536  ;;  %p8419_p10 = scmp.lt.s32.totalorder %s515_s16, %s515_s16 }
  0xe0   : > { %p8412_p5 = scmp.ne.s32.totalorder %s515_s16, %s8411_s14  ;;  %p8420_p11 = scmp.lt.s32.totalorder %s8411_s14, %s8411_s14 }
  0xe2   : > { %p8414_p7 = pnand %p8412_p5, %p8748_p8  ;;  %p8421_p12 = por %p8420_p11, %p8419_p10 }
  0xe4   : > { %p8415_p9 = pneg %p8414_p7 }
  0xe6   : > { %p8422_p4 = pnand %p8421_p12, %p8415_p9 }
  0xe8   : > { %8425 = shalt.err (!%p8422_p4)
}
  0xe9   : > { %7936 = dma.hbm_to_vmem [thread:$0]  (!%p8732_p6), %s9878_s12, 65536, %s515_s16, [#allocation15], %s8580_s4, %s8580_s4, %s8581_s17  }
  0xea   : > { %s8426_s20 = scalar_lea.hbm %s9881_s15, 16 }
  0xeb   : > { %p8427_p13 = scmp.ne.s32.totalorder %s9881_s15, %s8426_s20  ;;  %p8433_p3 = scmp.lt.u32.totalorder %s8426_s20, %s9881_s15 }
  0xed   : > { %p8429_p0 = pnand %p8427_p13, %p8748_p8 }
  0xef   : > { %p8430_p1 = pneg %p8429_p0 }
  0xf1   : > { %p8435_p2 = pnand %p8433_p3, %p8430_p1 }
  0xf3   : > { %8438 = shalt.err (!%p8435_p2)
}
  0xf4   : > { %s8439_s4 = scalar_lea.vmem %s8909_s30, 16  ;;  %s8446_s17 = scalar_lea.vmem %s8909_s30, 32 }
  0xf5   : > { %p8440_p5 = scmp.ne.s32.totalorder %s8909_s30, %s8439_s4  ;;  %p8447_p10 = scmp.lt.s32.totalorder %s8909_s30, %s8909_s30 }
  0xf6   : > { %p8448_p11 = scmp.lt.s32.totalorder %s8446_s17, %s8439_s4 }
  0xf7   : > { %p8442_p7 = pnand %p8440_p5, %p8748_p8 }
  0xf8   : > { %p8449_p12 = por %p8448_p11, %p8447_p10 }
  0xf9   : > { %p8443_p9 = pneg %p8442_p7 }
  0xfb   : > { %p8450_p4 = pnand %p8449_p12, %p8443_p9 }
  0xfd   : > { %8453 = shalt.err (!%p8450_p4)
}
  0xfe   : > { %7942 = dma.hbm_to_vmem [thread:$0]  (!%p8732_p6), %s9881_s15, 16, %s8909_s30, [#allocation18]  }
  0xff   : > { %s6901_s18 = sadd.s32 4294967294, %s8570_s24   ;;  %s8955_s0 = sadd.s32 1, %s8570_s24  }
 0x100   : > { %s67_s3 = ssub.s32 %s8570_s24, %s8955_s0  ;;  %s70_s6 = sadd.s32 1, %s8566_s23 }
 0x101   : > { %p68_p8 = scmp.eq.s32.totalorder %s67_s3, 0  ;;  %p77_p13 = scmp.ne.s32.totalorder %s8566_s23, %s8562_s22 }
 0x102   : > { %p78_p0 = scmp.eq.s32.totalorder %s8570_s24, 0  ;;  %p83_p1 = scmp.ne.s32.totalorder %s8562_s22, %s8558_s21 }
 0x103   : > { %s8966_s26 = scalar_select %p68_p8, %s8566_s23, %s70_s6  }
 0x104   : > { %p8968_p3 = por %p78_p0, %p77_p13  ;;  %p9914_p2 = scmp.eq.s32.totalorder %s8714_s27, 0 }
 0x105   : > { %p401_p5 = scmp.eq.s32.totalorder %s8714_s27, 1  ;;  %p407_p7 = scmp.eq.s32.totalorder %s6901_s18, 1 }
 0x106   : > { %p8974_p6 = por %p9914_p2, %p83_p1  ;;  %p7961_p9 = scmp.lt.s32.totalorder %s8570_s24, 2 }
 0x107   : > { %s561_s20 = sand.u32 1, %s8566_s23   ;;  %p8981_p10 = por %p401_p5, %p77_p13 }
 0x108   : > { %p8985_p11 = por %p407_p7, %p83_p1  ;;  %s6914_s28 = sshll.u32 %s8570_s24, 4 }
 0x109   : > { %s9916_s25 = scalar_select %p8981_p10, 1, 0 }
 0x10a   : > { %s9917_s29 = scalar_select %p8985_p11, 1, 0 }
 0x10b   : > { %s564_s19 = scalar_lea.vmem [#allocation2], %s561_s20  ;;  %s9918_s1 = sld [smem:[#allocation30_spill]] }
 0x10c   : > { %s571_s4 = sshll.u32 %s564_s19, 4  ;;  %p8999_p12 = pnand %p7961_p9, %p8968_p3  ;;  %s8995_s4 = int_to_ptr.vmem [resolvable:$true] %s571_s4 }
 0x10d   : > { %s562_s3 = scalar_lea.sflag [#allocation3], %s561_s20 }
 0x10e   : > { %p8456_p8 = pneg %p8999_p12 }
 0x111   : > { %s8993_s14 = scalar_lea.hbm %s9918_s1, %s6914_s28  ;;  %s8459_s17 = scalar_lea.hbm %s9918_s1, 32 }
 0x112   : > { %s8454_s6 = scalar_lea.hbm %s8993_s14, 16  ;;  %p8460_p1 = scmp.lt.u32.totalorder %s8993_s14, %s9918_s1 }
 0x113   : > { %p8455_p4 = scmp.ne.s32.totalorder %s8993_s14, %s8454_s6  ;;  %p8461_p3 = scmp.lt.u32.totalorder %s8459_s17, %s8454_s6 }
 0x114   : > { %p8463_p5 = scmp.lt.u32.totalorder %s8454_s6, %s8993_s14 }
 0x115   : > { %p8457_p13 = pnand %p8456_p8, %p8455_p4  ;;  %p8462_p2 = por %p8461_p3, %p8460_p1 }
 0x117   : > { %p8458_p0 = pneg %p8457_p13  ;;  %p8464_p7 = por %p8463_p5, %p8462_p2 }
 0x119   : > { %p8465_p9 = pnand %p8464_p7, %p8458_p0 }
 0x11b   : > { %8468 = shalt.err (!%p8465_p9)
}
 0x11c   : > { %s8469_s20 = scalar_lea.vmem %s8995_s4, 16  ;;  %s8584_s28 = smov [#allocation2]  }
 0x11d   : > { %p8470_p4 = scmp.ne.s32.totalorder %s8995_s4, %s8469_s20  ;;  %s8474_s19 = sshll.u32 %s8584_s28, 4  ;;  %s8475_s19 = int_to_ptr.vmem [resolvable:$false] %s8474_s19 }
 0x11e   : > { %s8476_s2 = scalar_lea.vmem %s8475_s19, 32  ;;  %p8477_p10 = scmp.lt.s32.totalorder %s8995_s4, %s8475_s19 }
 0x11f   : > { %p8472_p13 = pnand %p8470_p4, %p8456_p8  ;;  %p8478_p1 = scmp.lt.s32.totalorder %s8476_s2, %s8469_s20 }
 0x121   : > { %p8473_p11 = pneg %p8472_p13  ;;  %p8479_p3 = por %p8478_p1, %p8477_p10 }
 0x123   : > { %p8480_p2 = pnand %p8479_p3, %p8473_p11 }
 0x125   : > { %8483 = shalt.err (!%p8480_p2)
}
 0x126   : > { %7946 = dma.hbm_to_vmem [thread:$0]  (!%p8999_p12), %s8993_s14, 16, %s8995_s4, %s562_s3  }
 0x127   : > { %s9920_s6 = sld [smem:[#allocation28_spill]] }
 0x12d   : > { %p9921_p0 = scmp.ne.s32.totalorder %s9920_s6, 0 }
 0x12e   : > { %s9031_s17 = sand.u32 (!%p9921_p0), 1, %s8562_s22  }
 0x12f   : > { %580 = sbr.rel (%p9921_p0) target bundleno = 3339 (0xd0b), region = 84  ;;  %s583_s16 = scalar_lea.sflag (!%p9921_p0), [#allocation3], %s9031_s17 }
 0x136   : > { %8529 = dma.done.wait (%p8974_p6), %s583_s16, 16  }
 0x137   : > { %8531 = vsyncadd (%p8974_p6), %s583_s16, 4294967280  ;;  %p9922_p10 = scmp.eq.s32.totalorder %s8714_s27, 0 }
 0x139   : > { %8533 = dma.done.wait (%p9922_p10), [#allocation6], 32   ;;  %p9923_p11 = pmov %p9922_p10 }
 0x13a   : > { %p9924_p12 = pmov %p9922_p10 }
 0x13b   : > { %8535 = vsyncadd (%p9923_p11), [#allocation6], 4294967264 }
 0x13c   : > { %8537 = dma.done.wait (%p9924_p12), [#allocation9], 32   ;;  %p9925_p8 = pmov %p9922_p10 }
 0x13e   : > { %8539 = vsyncadd (%p9925_p8), [#allocation9], 4294967264  ;;  %p9926_p5 = pmov %p9925_p8 }
 0x140   : > { %8541 = dma.done.wait (%p9926_p5), [#allocation12], 3600   ;;  %p9927_p7 = pmov %p9926_p5 }
 0x141   : > { %p9928_p6 = pmov %p9926_p5 }
 0x142   : > { %8543 = vsyncadd (%p9927_p7), [#allocation12], 4294963696 }
 0x143   : > { %8545 = dma.done.wait (%p9928_p6), [#allocation15], 65664   ;;  %p9929_p9 = pmov %p9926_p5 }
 0x144   : > { %p9930_p4 = pmov %p9926_p5 }
 0x145   : > { %8547 = vsyncadd (%p9929_p9), [#allocation15], 4294901632 }
 0x146   : > { %8549 = dma.done.wait (%p9930_p4), [#allocation18], 144   ;;  %p9931_p13 = pmov %p9930_p4 }
 0x147   : > { %p677_p1 = scmp.lt.s32.totalorder %s8714_s27, 1  ;;  %s9932_s3 = sld [smem:[#allocation29_spill]]  ;;  %vm760_vm0 = vsmask.f32 7424  ;;  %vm1066_vm1 = vcmask 1041408   ;;  %vm958_vm2 = vcmask 31744  }
 0x148   : > { %8551 = vsyncadd (%p9931_p13), [#allocation18], 4294967152  ;;  %s8585_s19 = smov 12   ;;  %s8586_s2 = smov 4   ;;  %vm967_vm3 = vcmask 64512   ;;  %vm976_vm4 = vcmask 97280  }
 0x149   : > { %s678_s30 = scalar_select %p677_p1, %s8714_s27, 1  ;;  %vm985_vm5 = vcmask 130048   ;;  %vm994_vm6 = vcmask 162816   ;;  %vm1003_vm7 = vcmask 195584   ;;  %vm1012_vm8 = vcmask 228352  }
 0x14a   : > { %s8587_s6 = smov 16   ;;  %s8588_s14 = smov 8   ;;  %vm1021_vm9 = vcmask 261120   ;;  %vm1057_vm10 = vcmask 293888   ;;  %vm1189_vm11 = vcmask 1043456   ;;  %vm1177_vm12 = vcmask 1046528  }
 0x14b   : > { %s7632_s4 = sshll.u32 %s678_s30, 7  ;;  %s8589_s16 = smov 20   ;;  %vm1219_vm13 = vcmask 1042432   ;;  %vm1201_vm14 = vsmask.f32 3328  ;;  %vm8596_vm15 = vmmov 0  }
 0x14c   : > { %s8591_s30 = smov 28   ;;  %s9896_s18 = smov 32  }
 0x14d   : > { %s9064_s20 = scalar_lea.vmem %s9932_s3, %s7632_s4  ;;  %s9933_s4 = sld [smem:[#allocation31_spill]] }
 0x14e   : > { %v8039_v0 = vld [vmem:[%s9064_s20 + $0x48] sm:$0xff]   ;;  %v6928_v1 = vld [vmem:[%s9064_s20 + $0x20] sm:$0xf]  ;;  %v9069_v2 = vld [vmem:[%s9064_s20 + $0x24] sm:$0xf]  ;;  %s9894_s3 = smov 24  }
 0x14f   : > { %v9072_v3 = vld [vmem:[%s9064_s20 + $0x28] sm:$0xf]  ;;  %820 = vrot.lane.b32.xlu1 %v8039_v0, %s8585_s19  ;;  %v6954_v4 = vcombine.low %v6928_v1, %v9069_v2  ;;  %v9078_v6 = vld [vmem:[%s9064_s20 + $0x2c] sm:$0xf]  ;;  %v8044_v8 = vld [vmem:[%s9064_s20 + $0x40] sm:$0xff]   ;;  %v860_v17 = vshll.u32 %v8039_v0, 16 }
 0x150   : > { %v8042_v5 = vld [vmem:[%s9064_s20 + $0x68] sm:$0xff]   ;;  %v6955_v7 = vcombine.low %v9072_v3, %v9078_v6  ;;  %v683_v9 = vld [vmem:[%s9064_s20] sm:$0xf]  ;;  %v684_v10 = vld [vmem:[%s9064_s20 + $0x4] sm:$0xf]  ;;  %v855_v14 = vshll.u32 %v8044_v8, 16 }
 0x151   : > { %752 = vrot.lane.b32.xlu0 %v6954_v4, %s8586_s2  ;;  %v685_v11 = vld [vmem:[%s9064_s20 + $0x8] sm:$0xf]  ;;  %v686_v12 = vld [vmem:[%s9064_s20 + $0xc] sm:$0xf]  ;;  %v9088_v13 = vcombine.low %v683_v9, %v684_v10  ;;  %v687_v16 = vld [vmem:[%s9064_s20 + $0x10] sm:$0xf] }
 0x152   : > { %v9091_v15 = vcombine.low %v685_v11, %v686_v12  ;;  %v688_v20 = vld [vmem:[%s9064_s20 + $0x14] sm:$0xf]  ;;  %v853_v26 = vshrl.u32 %v8044_v8, 16  ;;  %v857_v27 = vrot.slane %v855_v14, 1  ;;  %v9105_v28 = vcombine.low %v684_v10, %v685_v11  ;;  %v689_v35 = vld [vmem:[%s9064_s20 + $0x18] sm:$0xf] }
 0x153   : > { %846 = vrot.lane.b32.xlu1 %v8042_v5, %s8587_s6  ;;  %v762_v18 = vshrl.u32 %v9088_v13, 16  ;;  %v764_v19 = vshll.u32 %v9088_v13, 16  ;;  %v9098_v21 = vld [vmem:[%s9064_s20 + $0x50] sm:$0xff]   ;;  %v9102_v23 = vcombine.low %v687_v16, %v688_v20  ;;  %v862_v31 = vrot.slane %v860_v17, 1  ;;  %v8047_v36 = vld [vmem:[%s9064_s20 + $0x60] sm:$0xff]   ;;  %v8064_v54 = vld [vmem:[%s9933_s4 + $0x8] sm:$0xff]  }
 0x154   : > { %v769_v22 = vshll.u32 %v9091_v15, 16  ;;  %v773_v24 = vshrl.u32 %v9091_v15, 16  ;;  %v864_v32 = vshrl.u32 %v8039_v0, 16  ;;  %v868_v34 = vshll.u32 %v9098_v21, 16  ;;  %v8063_v43 = vld [vmem:[%s9933_s4] sm:$0xff]   ;;  %s8598_s28 = smov 56  }
 0x155   : > { %754 = vrot.lane.b32.xlu0 %v6955_v7, %s8586_s2  ;;  %v766_v25 = vrot.slane %v764_v19, 1  ;;  %v777_v30 = vshll.u32 %v9102_v23, 16  ;;  %v858_v40 = vor.u32 %v857_v27, %v853_v26  ;;  %v922_v41 = vshll.u32 %v9105_v28, 16  ;;  %7763 = vmatprep.subr.bf16.mxu0 %v8063_v43  ;;  %v9130_v50 = vld [vmem:[%s9064_s20 + $0x58] ss:$0 sps:$4 sm:$0xff]   ;;  %s8602_s1 = smov 80  }
 0x156   : > { %v771_v29 = vrot.slane %v769_v22, 1  ;;  %v6967_v42 = vcombine.low %v686_v12, %v687_v16  ;;  %v866_v44 = vor.u32 %v864_v32, %v862_v31  ;;  %v9120_v45 = vcombine.low %v688_v20, %v689_v35  ;;  %7764 = vmatpush3.bf16.msra.mxu0 %v8063_v43  ;;  %v9141_v57 = vld [vmem:[%s9064_s20 + $0x1c] ss:$0 sps:$4 sm:$0xff]   ;;  %v6932_v0 = vld [vmem:[%s9064_s20 + $0x30] sm:$0xf]  ;;  %s7629_s5 = sshll.u32 %s8714_s27, 4 }
 0x157   : > { %v767_v33 = vor.u32 %v766_v25, %v762_v18  ;;  %v9112_v38 = vrot.slane %v777_v30, 1  ;;  %v9124_v47 = vrot.slane %v868_v34, 1  ;;  %v9126_v49 = vcombine.low %v689_v35, %v689_v35  ;;  %7765 = vmatprep.subr.bf16.mxu0 %v8064_v54  ;;  %v8065_v4 = vld [vmem:[%s9933_s4 + $0x10] ss:$0 sps:$4 sm:$0x33]   ;;  %s9938_s4 = smov 24  }
 0x158   : > { %v775_v37 = vor.u32 %v773_v24, %v771_v29  ;;  %v927_v48 = vshll.u32 %v6967_v42, 16  ;;  %v863_v51 = vsel %vm760_vm0, %v858_v40, %v862_v31  ;;  %v920_v52 = vshrl.u32 %v9105_v28, 16  ;;  %v6933_v19 = vld [vmem:[%s9064_s20 + $0x34] sm:$0xf]  ;;  %v6934_v22 = vld [vmem:[%s9064_s20 + $0x38] sm:$0xf] }
 0x159   : > { %818 = vrot.lane.b32.xlu0 %v8044_v8, %s8585_s19  ;;  %v772_v39 = vsel %vm760_vm0, %v767_v33, %v771_v29  ;;  %v924_v53 = vrot.slane %v922_v41, 1  ;;  %v935_v55 = vshll.u32 %v9120_v45, 16  ;;  %v876_v56 = vshll.u32 %v9130_v50, 16  ;;  %v8058_v29 = vld [vmem:[%s9064_s20 + $0x70] sm:$0xff]   ;;  %v8059_v30 = vld [vmem:[%s9064_s20 + $0x78] ss:$0 sps:$4 sm:$0xff]  }
 0x15a   : > { %792 = vrot.lane.b32.xlu1 %v772_v39, %s8588_s14  ;;  %v780_v46 = vsel %vm760_vm0, %v775_v37, %v9112_v38  ;;  %v871_v58 = vsel %vm760_vm0, %v866_v44, %v9124_v47  ;;  %v929_v59 = vrot.slane %v927_v48, 1  ;;  %v931_v60 = vshrl.u32 %v6967_v42, 16  ;;  %7766 = vmatpush3.bf16.msra.mxu0 %v8064_v54  ;;  %v8062_v34 = vld [vmem:[%s9064_s20 + $0x3c] ss:$0 sps:$4 sm:$0xff]   ;;  %s8593_s20 = smov 48   ;;  %s6719_s27 = scalar_lea.sflag [#allocation4], %s9031_s17 }
 0x15b   : > { %v785_v61 = vshll.u32 %v9126_v49, 16  ;;  %v781_v62 = vshrl.u32 %v9102_v23, 16  ;;  %v943_v63 = vshll.u32 %v9141_v57, 16  ;;  %v872_v1 = vshrl.u32 %v9098_v21, 16  ;;  %7867 = vmatprep.subr.msk.bf16.mxu0 %vm1066_vm1, %v8065_v4  ;;  %p9942_p2 = scmp.ne.s32.totalorder %s9916_s25, 0 }
 0x15c   : > { %v937_v5 = vrot.slane %v935_v55, 1  ;;  %v789_v7 = vshrl.u32 %v9126_v49, 16  ;;  %v878_v8 = vrot.slane %v876_v56, 1  ;;  %v880_v9 = vshrl.u32 %v9130_v50, 16 }
 0x15d   : > { %844 = vrot.lane.b32.xlu0 %v8047_v36, %s8587_s6  ;;  %v6970_v10 = vcombine.low %v9069_v2, %v9072_v3  ;;  %v787_v11 = vrot.slane %v785_v61, 1  ;;  %v939_v12 = vshrl.u32 %v9120_v45, 16  ;;  %v945_v14 = vrot.slane %v943_v63, 1 }
 0x15e   : > { %794 = vrot.lane.b32.xlu1 %v780_v46, %s8588_s14  ;;  %v947_v16 = vshrl.u32 %v9141_v57, 16  ;;  %v1068_v17 = vsel %vm1066_vm1, %v8065_v4, 0  ;;  %v925_v18 = vor.u32 %v924_v53, %v920_v52  ;;  %v6971_v2 = vcombine.low %v9078_v6, %v6932_v0 }
 0x15f   : > { %7768 = vmatpush3.bf16.msra.mxu0 %v1068_v17  ;;  %v933_v20 = vor.u32 %v931_v60, %v929_v59  ;;  %v6956_v24 = vcombine.low %v6932_v0, %v6933_v19  ;;  %v783_v26 = vor.u32 %v781_v62, %v9112_v38  ;;  %v6957_v6 = vcombine.low %v6934_v22, %v6934_v22 }
 0x160   : > { %v930_v3 = vsel %vm760_vm0, %v925_v18, %v929_v59  ;;  %v874_v31 = vor.u32 %v872_v1, %v9124_v47  ;;  %v882_v33 = vor.u32 %v880_v9, %v878_v8  ;;  %v941_v35 = vor.u32 %v939_v12, %v937_v5 }
 0x161   : > { %883 = vrot.lane.b32.xlu0 %v863_v51, %s8589_s16  ;;  %v938_v25 = vsel %vm760_vm0, %v933_v20, %v937_v5  ;;  %v788_v27 = vsel %vm760_vm0, %v783_v26, %v787_v11  ;;  %v949_v37 = vor.u32 %v947_v16, %v945_v14  ;;  %vm1291_vm1 = vcmask 392192  }
 0x162   : > { %885 = vrot.lane.b32.xlu1 %v871_v58, %s8589_s16  ;;  %v879_v32 = vsel %vm760_vm0, %v874_v31, %v878_v8  ;;  %v946_v36 = vsel %vm760_vm0, %v941_v35, %v945_v14 }
 0x165   : > { %897 = vrot.lane.b32.xlu0 %v9105_v28, %s9894_s3  ;;  %v791_v28 = vor.u32 %v789_v7, %v787_v11 }
 0x166   : > { %899 = vrot.lane.b32.xlu1 %v6967_v42, %s9894_s3 }
 0x169   : > { %911 = vrot.lane.b32.xlu0 %v6970_v10, %s8591_s30 }
 0x16a   : > { %913 = vrot.lane.b32.xlu1 %v6971_v2, %s8591_s30 }
 0x16d   : > { %950 = vrot.lane.b32.xlu0 %v930_v3, %s9896_s18 }
 0x16e   : > { %756 = vrot.lane.b32.xlu1 %v6956_v24, %s8586_s2 }
 0x171   : > { %952 = vrot.lane.b32.xlu0 %v938_v25, %s9896_s18 }
 0x172   : > { %758 = vrot.lane.b32.xlu1 %v6957_v6, %s8586_s2  ;;  %s9935_s2 = smov 40  }
 0x175   : > { %796 = vrot.lane.b32.xlu0 %v788_v27, %s8588_s14 }
 0x176   : > { %798 = vrot.lane.b32.xlu1 %v791_v28, %s8588_s14 }
 0x179   : > { %822 = vrot.lane.b32.xlu0 %v9098_v21, %s8585_s19  ;;  %v6972_v21 = vcombine.low %v6933_v19, %v6934_v22 }
 0x17a   : > { %824 = vrot.lane.b32.xlu1 %v9130_v50, %s8585_s19  ;;  %s8597_s19 = smov 64  }
 0x17d   : > { %848 = vrot.lane.b32.xlu0 %v8058_v29, %s8587_s6 }
 0x17e   : > { %850 = vrot.lane.b32.xlu1 %v8059_v30, %s8587_s6 }
 0x181   : > { %887 = vrot.lane.b32.xlu0 %v879_v32, %s8589_s16 }
 0x182   : > { %889 = vrot.lane.b32.xlu1 %v882_v33, %s8589_s16  ;;  %s9934_s16 = sld [smem:[#allocation33_spill]] }
 0x185   : > { %901 = vrot.lane.b32.xlu0 %v9120_v45, %s9894_s3 }
 0x186   : > { %903 = vrot.lane.b32.xlu1 %v9141_v57, %s9894_s3 }
 0x189   : > { %915 = vrot.lane.b32.xlu0 %v6972_v21, %s8591_s30 }
 0x18a   : > { %917 = vrot.lane.b32.xlu1 %v8062_v34, %s8591_s30  ;;  %s9892_s30 = smov 40  }
 0x18d   : > { %954 = vrot.lane.b32.xlu0 %v946_v36, %s9896_s18 }
 0x18e   : > { %956 = vrot.lane.b32.xlu1 %v949_v37, %s9896_s18 }
 0x1c1   : > { %v821_v38 = vpop.permute.xlu1 %820 }
 0x1c3   : > { %v753_v39 = vpop.permute.xlu0 %752 }
 0x1c4   : > { %v960_v48 = vsel %vm958_vm2, %v9088_v13, %v753_v39 }
 0x1c5   : > { %v847_v40 = vpop.permute.xlu1 %846 }
 0x1c7   : > { %v755_v41 = vpop.permute.xlu0 %754 }
 0x1c8   : > { %v962_v50 = vsel %vm958_vm2, %v9091_v15, %v755_v41 }
 0x1cb   : > { %v819_v42 = vpop.permute.xlu0 %818 }
 0x1cc   : > { %v793_v43 = vpop.permute.xlu1 %792 }
 0x1cd   : > { %v969_v52 = vsel %vm967_vm3, %v960_v48, %v793_v43 }
 0x1ce   : > { %v978_v55 = vsel %vm976_vm4, %v969_v52, %v819_v42 }
 0x1cf   : > { %v845_v44 = vpop.permute.xlu0 %844 }
 0x1d0   : > { %v795_v45 = vpop.permute.xlu1 %794  ;;  %v987_v13 = vsel %vm985_vm5, %v978_v55, %v845_v44 }
 0x1d1   : > { %v971_v53 = vsel %vm967_vm3, %v962_v50, %v795_v45 }
 0x1d2   : > { %v980_v56 = vsel %vm976_vm4, %v971_v53, %v821_v38  ;;  %v9241_v38 = vld [vmem:[#allocation5] ss:$0 sm:$0xff] }
 0x1d3   : > { %v884_v46 = vpop.permute.xlu0 %883  ;;  %v989_v59 = vsel %vm985_vm5, %v980_v56, %v847_v40 }
 0x1d4   : > { %v886_v47 = vpop.permute.xlu1 %885  ;;  %v996_v15 = vsel %vm994_vm6, %v987_v13, %v884_v46 }
 0x1d5   : > { %v998_v0 = vsel %vm994_vm6, %v989_v59, %v886_v47 }
 0x1d7   : > { %v898_v51 = vpop.permute.xlu0 %897 }
 0x1d8   : > { %v900_v54 = vpop.permute.xlu1 %899  ;;  %v1005_v60 = vsel %vm1003_vm7, %v996_v15, %v898_v51 }
 0x1d9   : > { %v1007_v4 = vsel %vm1003_vm7, %v998_v0, %v900_v54 }
 0x1db   : > { %v912_v57 = vpop.permute.xlu0 %911 }
 0x1dc   : > { %v914_v58 = vpop.permute.xlu1 %913  ;;  %v1014_v61 = vsel %vm1012_vm8, %v1005_v60, %v912_v57 }
 0x1dd   : > { %v1016_v5 = vsel %vm1012_vm8, %v1007_v4, %v914_v58  ;;  %v8066_v4 = vld [vmem:[%s9934_s16] sm:$0xff]  }
 0x1df   : > { %v951_v62 = vpop.permute.xlu0 %950 }
 0x1e0   : > { %v1023_v63 = vsel %vm1021_vm9, %v1014_v61, %v951_v62  ;;  %v757_v1 = vpop.permute.xlu1 %756 }
 0x1e1   : > { %7769 = vmatprep.mubr.msk.bf16.mxu0 %vm1057_vm10, %v1023_v63  ;;  %v964_v3 = vsel %vm958_vm2, %v9102_v23, %v757_v1 }
 0x1e3   : > { %v953_v7 = vpop.permute.xlu0 %952 }
 0x1e4   : > { %v1025_v8 = vsel %vm1021_vm9, %v1016_v5, %v953_v7  ;;  %v759_v9 = vpop.permute.xlu1 %758 }
 0x1e5   : > { %7770 = vmatmul.mubr.msk.bf16.vlgmr.msra.gmra.mrb[0].mxu0 %vm1057_vm10, %v1025_v8  ;;  %v966_v20 = vsel %vm958_vm2, %v9126_v49, %v759_v9  ;;  %vm1298_vm2 = vcmask 457728  }
 0x1e7   : > { %v797_v10 = vpop.permute.xlu0 %796 }
 0x1e8   : > { %v799_v11 = vpop.permute.xlu1 %798  ;;  %v973_v24 = vsel %vm967_vm3, %v964_v3, %v797_v10  ;;  %v8068_v3 = vld [vmem:[%s9934_s16 + $0x10] sm:$0xff]  }
 0x1e9   : > { %v975_v6 = vsel %vm967_vm3, %v966_v20, %v799_v11  ;;  %v8594_v11 = vmov 0.0  }
 0x1ea   : > { %7777 = vmatprep.subr.bf16.mxu1 %v8594_v11  ;;  %7787 = vmatprep.mubr.msk.bf16.mxu1 %vm8596_vm15, %v8594_v11 }
 0x1eb   : > { %v823_v12 = vpop.permute.xlu0 %822  ;;  %7778 = vmatpush3.bf16.msra.mxu1 %v8066_v4 }
 0x1ec   : > { %v825_v14 = vpop.permute.xlu1 %824  ;;  %v982_v25 = vsel %vm976_vm4, %v973_v24, %v823_v12  ;;  %7779 = vmatprep.subr.bf16.mxu1 %v8594_v11 }
 0x1ed   : > { %v984_v28 = vsel %vm976_vm4, %v975_v6, %v825_v14  ;;  %v8069_v6 = vld [vmem:[%s9934_s16 + $0x18] sm:$0xff]   ;;  %vm1305_vm4 = vcmask 523264  }
 0x1ef   : > { %v849_v16 = vpop.permute.xlu0 %848 }
 0x1f0   : > { %v851_v17 = vpop.permute.xlu1 %850  ;;  %v991_v27 = vsel %vm985_vm5, %v982_v25, %v849_v16 }
 0x1f1   : > { %v993_v23 = vsel %vm985_vm5, %v984_v28, %v851_v17 }
 0x1f3   : > { %v888_v18 = vpop.permute.xlu0 %887 }
 0x1f4   : > { %v890_v19 = vpop.permute.xlu1 %889  ;;  %v1000_v29 = vsel %vm994_vm6, %v991_v27, %v888_v18 }
 0x1f5   : > { %v1002_v49 = vsel %vm994_vm6, %v993_v23, %v890_v19  ;;  %v8067_v19 = vld [vmem:[%s9934_s16 + $0x8] sm:$0xff]   ;;  %vm1355_vm6 = vcmask 588800  }
 0x1f6   : > { %7780 = vmatpush3.bf16.msra.mxu1 %v8067_v19 }
 0x1f7   : > { %v902_v2 = vpop.permute.xlu0 %901  ;;  %7781 = vmatprep.subr.bf16.mxu1 %v8594_v11 }
 0x1f8   : > { %v904_v22 = vpop.permute.xlu1 %903  ;;  %v1009_v31 = vsel %vm1003_vm7, %v1000_v29, %v902_v2 }
 0x1f9   : > { %v1011_v21 = vsel %vm1003_vm7, %v1002_v49, %v904_v22 }
 0x1fa   : > { %7782 = vmatpush3.bf16.msra.mxu1 %v8068_v3 }
 0x1fb   : > { %v916_v26 = vpop.permute.xlu0 %915  ;;  %7783 = vmatprep.subr.bf16.mxu1 %v8594_v11 }
 0x1fc   : > { %v918_v30 = vpop.permute.xlu1 %917  ;;  %v1018_v32 = vsel %vm1012_vm8, %v1009_v31, %v916_v26 }
 0x1fd   : > { %v1020_v35 = vsel %vm1012_vm8, %v1011_v21, %v918_v30  ;;  %v8070_v30 = vld [vmem:[%s9934_s16 + $0x20] ss:$0 sps:$4 sm:$0xff]   ;;  %vm1430_vm8 = vsmask.f32 2304 }
 0x1fe   : > { %7784 = vmatpush3.bf16.msra.mxu1 %v8069_v6  ;;  %v1364_v49 = vsel %vm1189_vm11, %v8070_v30, 0 }
 0x1ff   : > { %v955_v33 = vpop.permute.xlu0 %954  ;;  %7785 = vmatprep.subr.bf16.mxu1 %v8594_v11 }
 0x200   : > { %v1027_v34 = vsel %vm1021_vm9, %v1018_v32, %v955_v33  ;;  %v957_v36 = vpop.permute.xlu1 %956 }
 0x201   : > { %7773 = vmatprep.mubr.msk.bf16.mxu0 %vm1057_vm10, %v1027_v34  ;;  %v1029_v37 = vsel %vm1021_vm9, %v1020_v35, %v957_v36 }
 0x202   : > { %7774 = vmatmul.mubr.msk.bf16.gmra.mrb[4].mxu0 %vm1057_vm10, %v1029_v37  ;;  %7786 = vmatpush3.bf16.msra.mxu1 %v1364_v49  ;;  %vm1431_vm10 = vmand %vm1219_vm13, %vm1430_vm8 }
 0x203   : > { %7799 = vmatprep.subr.bf16.mxu1 %v8594_v11 }
 0x2b8   : > { %v7771_v39 = vpop.f32.mrb[0].mxu0 }
 0x2b9   : > { %v1113_v40 = vadd.f32 %v7771_v39, %v9241_v38  ;;  %v1104_v41 = vpop.f32.mrb[1].mxu0 }
 0x2ba   : > { %v1105_v42 = vadd.f32 %v9241_v38, %v1104_v41  ;;  %v7772_v43 = vpop.f32.mrb[2].mxu0 }
 0x2bb   : > { %v1116_v44 = vadd.f32 %v7772_v43, %v9241_v38  ;;  %v1107_v45 = vpop.f32.mrb[3].mxu0  ;;  %v1136_v47 = vmax.f32 %v1113_v40, 0.0 }
 0x2bc   : > { %v1108_v46 = vadd.f32 %v9241_v38, %v1107_v45  ;;  %v1134_v50 = vmax.f32 %v1105_v42, 0.0 }
 0x2bd   : > { %v1137_v48 = vmax.f32 %v1116_v44, 0.0 }
 0x2be   : > { %v1135_v51 = vmax.f32 %v1108_v46, 0.0 }
 0x2bf   : > { %v9247_v52 = vpack.c.bf16 %v1137_v48, %v1136_v47 }
 0x2c0   : > { %v9249_v53 = vpack.c.bf16 %v1135_v51, %v1134_v50 }
 0x2c1   : > { %1232 = vrot.lane.b32.xlu1 %v9247_v52, %s8593_s20  ;;  %v1191_v54 = vrot.slane %v9247_v52, 4  ;;  %v1179_v55 = vrot.slane %v9247_v52, 1  ;;  %v1153_v56 = vshll.u32 %v9247_v52, 16  ;;  %v1221_v58 = vrot.slane %v9247_v52, 5 }
 0x2c2   : > { %v1190_v57 = vrot.slane %v9249_v53, 4  ;;  %v1178_v13 = vrot.slane %v9249_v53, 1  ;;  %v1146_v15 = vshrl.u32 %v9249_v53, 16  ;;  %v1148_v59 = vshll.u32 %v9249_v53, 16 }
 0x2c3   : > { %v1157_v60 = vshrl.u32 %v9247_v52, 16  ;;  %v1206_v61 = vrot.slane %v1153_v56, 5  ;;  %v1220_v0 = vrot.slane %v9249_v53, 5  ;;  %v1155_v17 = vrot.slane %v1153_v56, 1 }
 0x2c4   : > { %v1192_v62 = vsel %vm1189_vm11, %v1190_v57, %v1191_v54  ;;  %v1180_v63 = vsel %vm1177_vm12, %v1178_v13, %v1179_v55  ;;  %v1202_v1 = vrot.slane %v1146_v15, 4  ;;  %v1203_v5 = vrot.slane %v1148_v59, 5 }
 0x2c5   : > { %1195 = vrot.lane.b32.xlu0 %v1192_v62, %s9894_s3  ;;  %1183 = vrot.lane.b32.xlu1 %v1180_v63, %s8587_s6  ;;  %v1205_v7 = vrot.slane %v1157_v60, 4  ;;  %v1150_v8 = vrot.slane %v1148_v59, 1  ;;  %v1222_v12 = vsel %vm1219_vm13, %v1220_v0, %v1221_v58  ;;  %v1159_v41 = vor.u32 %v1157_v60, %v1155_v17 }
 0x2c6   : > { %v1204_v9 = vor.u32 %v1203_v5, %v1202_v1 }
 0x2c7   : > { %v9276_v10 = vor.u32 %v1206_v61, %v1205_v7  ;;  %v1151_v14 = vor.u32 %v1150_v8, %v1146_v15 }
 0x2c9   : > { %1225 = vrot.lane.b32.xlu0 %v1222_v12, %s9892_s30  ;;  %v1208_v16 = vsel %vm1201_vm14, %v1204_v9, %v9276_v10  ;;  %v1156_v18 = vsel %vm760_vm0, %v1151_v14, %v1155_v17  ;;  %s9936_s30 = sld [smem:[#allocation35_spill]] }
 0x2ca   : > { %1213 = vrot.lane.b32.xlu1 %v1208_v16, %s9896_s18 }
 0x2cd   : > { %1168 = vrot.lane.b32.xlu0 %v1156_v18, %s8588_s14 }
 0x2d5   : > { %v7775_v2 = vpop.f32.mrb[4].mxu0 }
 0x2d6   : > { %v1120_v20 = vpop.f32.mrb[5].mxu0  ;;  %v1129_v31 = vadd.f32 %v7775_v2, %v9241_v38 }
 0x2d7   : > { %v1121_v22 = vadd.f32 %v9241_v38, %v1120_v20  ;;  %v7776_v24 = vpop.f32.mrb[6].mxu0 }
 0x2d8   : > { %v1123_v25 = vpop.f32.mrb[7].mxu0  ;;  %v1140_v33 = vmax.f32 %v1129_v31, 0.0 }
 0x2d9   : > { %v1124_v26 = vadd.f32 %v9241_v38, %v1123_v25  ;;  %v1138_v27 = vmax.f32 %v1121_v22, 0.0 }
 0x2da   : > { %v1144_v38 = vpack.c.bf16 %v1140_v33, %v1140_v33 }
 0x2db   : > { %v1139_v28 = vmax.f32 %v1124_v26, 0.0 }
 0x2dc   : > { %v1252_v45 = vrot.slane %v1144_v38, 1  ;;  %v1239_v50 = vshll.u32 %v1144_v38, 16  ;;  %v1243_v56 = vshrl.u32 %v1144_v38, 16 }
 0x2dd   : > { %v9303_v29 = vpack.c.bf16 %v1139_v28, %v1138_v27 }
 0x2df   : > { %1234 = vrot.lane.b32.xlu1 %v9303_v29, %s8593_s20  ;;  %v1193_v23 = vrot.slane %v9303_v29, 4  ;;  %v1181_v32 = vrot.slane %v9303_v29, 1  ;;  %v1223_v34 = vrot.slane %v9303_v29, 5  ;;  %v1161_v35 = vshll.u32 %v9303_v29, 16 }
 0x2e0   : > { %v1165_v37 = vshrl.u32 %v9303_v29, 16 }
 0x2e1   : > { %1199 = vrot.lane.b32.xlu0 %v1193_v23, %s9894_s3  ;;  %v1194_v21 = vsel %vm1189_vm11, %v1191_v54, %v1193_v23  ;;  %v1182_v36 = vsel %vm1177_vm12, %v1179_v55, %v1181_v32  ;;  %v1224_v39 = vsel %vm1219_vm13, %v1221_v58, %v1223_v34  ;;  %v1163_v40 = vrot.slane %v1161_v35, 1 }
 0x2e2   : > { %v1209_v42 = vrot.slane %v1165_v37, 4  ;;  %v1210_v43 = vrot.slane %v1161_v35, 5  ;;  %v1253_v46 = vsel %vm1177_vm12, %v1181_v32, %v1252_v45  ;;  %v1241_v54 = vrot.slane %v1239_v50, 1 }
 0x2e3   : > { %1187 = vrot.lane.b32.xlu1 %v1181_v32, %s8587_s6  ;;  %v1164_v44 = vsel %vm760_vm0, %v1159_v41, %v1163_v40  ;;  %v1167_v51 = vor.u32 %v1165_v37, %v1163_v40  ;;  %v6982_v40 = vld [vmem:[#allocation7] ss:$0 sm:$0xff]  ;;  %vm1483_vm11 = vcmask 982016   ;;  %vm1970_vm12 = vcmask 408576  }
 0x2e4   : > { %v1211_v47 = vor.u32 %v1210_v43, %v1209_v42  ;;  %v1245_v57 = vor.u32 %v1243_v56, %v1241_v54  ;;  %vm6686_vm13 = vcmask 16384  }
 0x2e5   : > { %1197 = vrot.lane.b32.xlu0 %v1194_v21, %s9894_s3  ;;  %v1242_v55 = vsel %vm760_vm0, %v1167_v51, %v1241_v54  ;;  %vm1284_vm0 = vcmask 326656  }
 0x2e6   : > { %v1212_v48 = vsel %vm1201_vm14, %v9276_v10, %v1211_v47  ;;  %vm6709_vm14 = vcmask 23552  }
 0x2e7   : > { %1254 = vrot.lane.b32.xlu1 %v1182_v36, %s8597_s19 }
 0x2e9   : > { %1227 = vrot.lane.b32.xlu0 %v1224_v39, %s9935_s2 }
 0x2eb   : > { %1185 = vrot.lane.b32.xlu1 %v1182_v36, %s8587_s6 }
 0x2ed   : > { %1246 = vrot.lane.b32.xlu0 %v1164_v44, %s8598_s28 }
 0x2ef   : > { %1256 = vrot.lane.b32.xlu1 %v1253_v46, %s8597_s19 }
 0x2f1   : > { %1170 = vrot.lane.b32.xlu0 %v1164_v44, %s8588_s14 }
 0x2f3   : > { %1215 = vrot.lane.b32.xlu1 %v1212_v48, %s9896_s18 }
 0x2f5   : > { %1172 = vrot.lane.b32.xlu0 %v1167_v51, %s8588_s14 }
 0x2f7   : > { %1217 = vrot.lane.b32.xlu1 %v1211_v47, %s9896_s18 }
 0x2f9   : > { %1248 = vrot.lane.b32.xlu0 %v1242_v55, %s8598_s28 }
 0x2fb   : > { %1236 = vrot.lane.b32.xlu1 %v1144_v38, %s8593_s20  ;;  %s8599_s20 = smov 72  }
 0x2fd   : > { %1229 = vrot.lane.b32.xlu0 %v1223_v34, %s9935_s2 }
 0x2ff   : > { %1258 = vrot.lane.b32.xlu1 %v1252_v45, %s8597_s19  ;;  %s8600_s19 = smov 120  }
 0x301   : > { %1250 = vrot.lane.b32.xlu0 %v1245_v57, %s8598_s28 }
 0x333   : > { %v1233_v13 = vpop.permute.xlu1 %1232 }
 0x337   : > { %v1196_v15 = vpop.permute.xlu0 %1195  ;;  %v1184_v58 = vpop.permute.xlu1 %1183 }
 0x33b   : > { %v1226_v59 = vpop.permute.xlu0 %1225 }
 0x33c   : > { %v1214_v60 = vpop.permute.xlu1 %1213 }
 0x33f   : > { %v1169_v61 = vpop.permute.xlu0 %1168 }
 0x340   : > { %v1261_v62 = vsel %vm967_vm3, %v9249_v53, %v1169_v61 }
 0x341   : > { %v1267_v0 = vsel %vm985_vm5, %v1261_v62, %v1184_v58 }
 0x342   : > { %v1273_v5 = vsel %vm1003_vm7, %v1267_v0, %v1196_v15 }
 0x343   : > { %v1279_v9 = vsel %vm1021_vm9, %v1273_v5, %v1214_v60 }
 0x344   : > { %v1286_v12 = vsel %vm1284_vm0, %v1279_v9, %v1226_v59  ;;  %v8071_v9 = vld [vmem:[%s9936_s30 + $0x40] sm:$0xff]  }
 0x345   : > { %v1293_v16 = vsel %vm1291_vm1, %v1286_v12, %v1233_v13  ;;  %v8073_v12 = vld [vmem:[%s9936_s30 + $0x48] sm:$0xff]   ;;  %7648 = vmatprep.subr.bf16.mxu0 %v8071_v9 }
 0x351   : > { %v1235_v63 = vpop.permute.xlu1 %1234 }
 0x353   : > { %v1200_v1 = vpop.permute.xlu0 %1199 }
 0x355   : > { %v1188_v4 = vpop.permute.xlu1 %1187 }
 0x357   : > { %v1198_v7 = vpop.permute.xlu0 %1197 }
 0x359   : > { %v1255_v8 = vpop.permute.xlu1 %1254 }
 0x35b   : > { %v1228_v10 = vpop.permute.xlu0 %1227 }
 0x35d   : > { %v1186_v14 = vpop.permute.xlu1 %1185 }
 0x35f   : > { %v1247_v53 = vpop.permute.xlu0 %1246 }
 0x360   : > { %v1300_v17 = vsel %vm1298_vm2, %v1293_v16, %v1247_v53  ;;  %v8074_v53 = vld [vmem:[%s9936_s30 + $0x8] sm:$0xff]   ;;  %v8075_v16 = vld [vmem:[%s9936_s30 + $0x50] sm:$0xff]  }
 0x361   : > { %v1257_v18 = vpop.permute.xlu1 %1256  ;;  %v1307_v19 = vsel %vm1305_vm4, %v1300_v17, %v1255_v8  ;;  %v8082_v17 = vld [vmem:[%s9936_s30 + $0x88] sm:$0xff]  }
 0x362   : > { %7788 = vmatmul.mubr.msk.bf16.vlgmr.msra.gmra.mrb[0].mxu1 %vm1355_vm6, %v1307_v19  ;;  %v8077_v19 = vld [vmem:[%s9936_s30 + $0x58] sm:$0xff]  }
 0x363   : > { %v1171_v2 = vpop.permute.xlu0 %1170  ;;  %7791 = vmatprep.mubr.msk.bf16.mxu1 %vm8596_vm15, %v8594_v11 }
 0x364   : > { %v1263_v3 = vsel %vm967_vm3, %v9247_v52, %v1171_v2  ;;  %v8078_v2 = vld [vmem:[%s9936_s30 + $0x18] sm:$0xff]  }
 0x365   : > { %v1269_v20 = vsel %vm985_vm5, %v1263_v3, %v1186_v14  ;;  %v1216_v22 = vpop.permute.xlu1 %1215  ;;  %v8079_v14 = vld [vmem:[%s9936_s30 + $0x80] sm:$0xff]  }
 0x366   : > { %v1275_v24 = vsel %vm1003_vm7, %v1269_v20, %v1198_v7  ;;  %7800 = vmatpush3.bf16.msra.mxu1 %v8079_v14  ;;  %v8080_v3 = vld [vmem:[%s9936_s30 + $0x60] sm:$0xff]   ;;  %v1760_v14 = vld [vmem:[#allocation13] sm:$0xff] }
 0x367   : > { %v1281_v25 = vsel %vm1021_vm9, %v1275_v24, %v1216_v22  ;;  %v1173_v26 = vpop.permute.xlu0 %1172  ;;  %7801 = vmatprep.subr.bf16.mxu1 %v8594_v11  ;;  %v8081_v20 = vld [vmem:[%s9936_s30 + $0x20] sm:$0xff]   ;;  %v8083_v22 = vld [vmem:[%s9936_s30 + $0x68] sm:$0xff]  }
 0x368   : > { %v1288_v6 = vsel %vm1284_vm0, %v1281_v25, %v1228_v10  ;;  %v1265_v27 = vsel %vm967_vm3, %v9303_v29, %v1173_v26  ;;  %v8072_v10 = vld [vmem:[%s9936_s30] sm:$0xff]   ;;  %v8084_v24 = vld [vmem:[%s9936_s30 + $0x28] sm:$0xff]   ;;  %v8085_v25 = vld [vmem:[%s9936_s30 + $0x70] sm:$0xff]  }
 0x369   : > { %v1271_v28 = vsel %vm985_vm5, %v1265_v27, %v1188_v4  ;;  %v1218_v30 = vpop.permute.xlu1 %1217  ;;  %v1295_v31 = vsel %vm1291_vm1, %v1288_v6, %v1235_v63  ;;  %7649 = vmatpush3.bf16.msra.mxu0 %v8072_v10  ;;  %v8086_v26 = vld [vmem:[%s9936_s30 + $0x30] sm:$0xff]  }
 0x36a   : > { %v1277_v52 = vsel %vm1003_vm7, %v1271_v28, %v1200_v1  ;;  %7650 = vmatprep.subr.bf16.mxu0 %v8073_v12  ;;  %7802 = vmatpush3.bf16.msra.mxu1 %v8082_v17  ;;  %v8087_v6 = vld [vmem:[%s9936_s30 + $0x90] sm:$0xff]  }
 0x36b   : > { %v1249_v23 = vpop.permute.xlu0 %1248  ;;  %v1283_v21 = vsel %vm1021_vm9, %v1277_v52, %v1218_v30  ;;  %7803 = vmatprep.subr.bf16.mxu1 %v8594_v11  ;;  %v8088_v30 = vld [vmem:[%s9936_s30 + $0x78] sm:$0xff]  }
 0x36c   : > { %v1302_v49 = vsel %vm1298_vm2, %v1295_v31, %v1249_v23  ;;  %v8089_v23 = vld [vmem:[%s9936_s30 + $0x38] sm:$0xff]  }
 0x36d   : > { %v1309_v32 = vsel %vm1305_vm4, %v1302_v49, %v1257_v18  ;;  %v1237_v33 = vpop.permute.xlu1 %1236  ;;  %7651 = vmatpush3.bf16.msra.mxu0 %v8074_v53  ;;  %v8076_v18 = vld [vmem:[%s9936_s30 + $0x10] sm:$0xff]  }
 0x36e   : > { %7792 = vmatmul.mubr.msk.bf16.gmra.mrb[4].mxu1 %vm1355_vm6, %v1309_v32  ;;  %7652 = vmatprep.subr.bf16.mxu0 %v8075_v16  ;;  %v1764_v53 = vld [vmem:[#allocation13 + $0x20] sm:$0xff]  ;;  %v1761_v16 = vld [vmem:[#allocation13 + $0x8] sm:$0xff] }
 0x36f   : > { %v1230_v34 = vpop.permute.xlu0 %1229  ;;  %7795 = vmatprep.mubr.msk.bf16.mxu1 %vm8596_vm15, %v8594_v11  ;;  %7804 = vmatpush3.bf16.msra.mxu1 %v8087_v6  ;;  %v7013_v17 = vcombine.high %v1760_v14, %v1764_v53 }
 0x370   : > { %v1290_v29 = vsel %vm1284_vm0, %v1283_v21, %v1230_v34  ;;  %7805 = vmatprep.subr.bf16.mxu1 %v8594_v11 }
 0x371   : > { %v1297_v36 = vsel %vm1291_vm1, %v1290_v29, %v1237_v33  ;;  %v1259_v37 = vpop.permute.xlu1 %1258  ;;  %7653 = vmatpush3.bf16.msra.mxu0 %v8076_v18  ;;  %v1765_v18 = vld [vmem:[#allocation13 + $0x28] sm:$0xff]  ;;  %vm6715_vm1 = vcmask 80896  }
 0x372   : > { %7654 = vmatprep.subr.bf16.mxu0 %v8077_v19  ;;  %v7012_v19 = vcombine.low %v1760_v14, %v1764_v53  ;;  %v1786_v53 = vld [vmem:[#allocation13 + $0xd0] sm:$0x11] }
 0x373   : > { %v1251_v35 = vpop.permute.xlu0 %1250 }
 0x374   : > { %v1304_v38 = vsel %vm1298_vm2, %v1297_v36, %v1251_v35 }
 0x375   : > { %v1311_v39 = vsel %vm1305_vm4, %v1304_v38, %v1259_v37  ;;  %7655 = vmatpush3.bf16.msra.mxu0 %v8078_v2  ;;  %v7014_v2 = vcombine.low %v1761_v16, %v1765_v18 }
 0x376   : > { %7796 = vmatmul.mubr.msk.bf16.gmra.mrb[8].mxu1 %vm1355_vm6, %v1311_v39  ;;  %7656 = vmatprep.subr.bf16.mxu0 %v8080_v3  ;;  %v7015_v3 = vcombine.high %v1761_v16, %v1765_v18  ;;  %v1787_v16 = vld [vmem:[#allocation13 + $0xd8] sm:$0x11] }
 0x377   : > { %7807 = vmatprep.mubr.msk.bf16.mxu1 %vm8596_vm15, %v8594_v11  ;;  %v8090_v11 = vld [vmem:[%s9936_s30 + $0x98] sm:$0xff]   ;;  %vm6711_vm15 = vcmask 48128  }
 0x378   : > { %7806 = vmatpush3.bf16.msra.mxu1 %v8090_v11 }
 0x379   : > { %7657 = vmatpush3.bf16.msra.mxu0 %v8081_v20  ;;  %2040 = vmatprep.subr.bf16.mxu1 %v7015_v3  ;;  %v1768_v20 = vld [vmem:[#allocation13 + $0x40] sm:$0xff]  ;;  %v7040_v3 = vcombine.low %v1786_v53, %v1786_v53 }
 0x37a   : > { %7658 = vmatprep.subr.bf16.mxu0 %v8083_v22  ;;  %v1772_v22 = vld [vmem:[#allocation13 + $0x60] sm:$0xff] }
 0x37b   : > { %v7020_v6 = vcombine.low %v1768_v20, %v1772_v22 }
 0x37d   : > { %7659 = vmatpush3.bf16.msra.mxu0 %v8084_v24  ;;  %v1769_v24 = vld [vmem:[#allocation13 + $0x48] sm:$0xff] }
 0x37e   : > { %7660 = vmatprep.subr.bf16.mxu0 %v8085_v25  ;;  %v7021_v25 = vcombine.high %v1768_v20, %v1772_v22  ;;  %v7042_v20 = vcombine.low %v1787_v16, %v1787_v16  ;;  %v2179_v22 = vld [vmem:[#allocation16] sm:$0xff] }
 0x381   : > { %7661 = vmatpush3.bf16.msra.mxu0 %v8086_v26  ;;  %v1773_v26 = vld [vmem:[#allocation13 + $0x68] sm:$0xff] }
 0x382   : > { %7662 = vmatprep.subr.bf16.mxu0 %v8088_v30  ;;  %v1776_v30 = vld [vmem:[#allocation13 + $0x80] sm:$0xff] }
 0x385   : > { %7663 = vmatpush3.bf16.msra.mxu0 %v8089_v23  ;;  %v1780_v23 = vld [vmem:[#allocation13 + $0xa0] sm:$0xff] }
 0x386   : > { %1999 = vmatprep.subr.bf16.mxu0 %v7013_v17 }
 0x435   : > { %v1400_v41 = vpop.f32.mrb[0].mxu1 }
 0x436   : > { %v1401_v42 = vadd.f32 %v6982_v40, %v1400_v41  ;;  %v7789_v43 = vpop.f32.mrb[1].mxu1 }
 0x437   : > { %v1403_v44 = vpop.f32.mrb[2].mxu1 }
 0x438   : > { %v1404_v45 = vadd.f32 %v6982_v40, %v1403_v44  ;;  %v7790_v46 = vpop.f32.mrb[3].mxu1  ;;  %v1422_v47 = vmax.f32 %v1401_v42, 0.0 }
 0x43a   : > { %v1423_v48 = vmax.f32 %v1404_v45, 0.0 }
 0x43c   : > { %v9383_v50 = vpack.c.bf16 %v1423_v48, %v1422_v47 }
 0x43e   : > { %v1434_v51 = vrot.slane %v9383_v50, 4 }
 0x440   : > { %1435 = vrot.lane.b32.xlu0 %v1434_v51, %s8588_s14  ;;  %s9937_s14 = smov 32  }
 0x441   : > { %v1408_v54 = vpop.f32.mrb[4].mxu1 }
 0x442   : > { %v1409_v55 = vadd.f32 %v6982_v40, %v1408_v54  ;;  %v7793_v56 = vpop.f32.mrb[5].mxu1 }
 0x443   : > { %v1411_v57 = vpop.f32.mrb[6].mxu1 }
 0x444   : > { %v1412_v13 = vadd.f32 %v6982_v40, %v1411_v57  ;;  %v7794_v15 = vpop.f32.mrb[7].mxu1  ;;  %v1424_v58 = vmax.f32 %v1409_v55, 0.0 }
 0x445   : > { %v1537_v15 = vld [vmem:[#allocation8] sm:$0x1] }
 0x446   : > { %v1425_v59 = vmax.f32 %v1412_v13, 0.0 }
 0x448   : > { %v1428_v60 = vpack.c.bf16 %v1425_v59, %v1424_v58 }
 0x449   : > { %v1416_v61 = vpop.f32.mrb[8].mxu1 }
 0x44a   : > { %v1417_v62 = vadd.f32 %v6982_v40, %v1416_v61  ;;  %1438 = vrot.lane.b32.xlu1 %v1428_v60, %s8587_s6  ;;  %v7797_v63 = vpop.f32.mrb[9].mxu1  ;;  %v1440_v0 = vrot.slane %v1428_v60, 4  ;;  %s8601_s6 = smov 112  }
 0x44b   : > { %v1419_v1 = vpop.f32.mrb[10].mxu1 }
 0x44c   : > { %v1426_v4 = vmax.f32 %v1417_v62, 0.0  ;;  %1441 = vrot.lane.b32.xlu0 %v1440_v0, %s9894_s3  ;;  %v7798_v5 = vpop.f32.mrb[11].mxu1  ;;  %s9939_s3 = sld [smem:[#allocation36_spill]] }
 0x44e   : > { %v1429_v7 = vpack.c.bf16 %v1426_v4, %v1426_v4 }
 0x450   : > { %v1432_v8 = vsel %vm1431_vm10, %v1429_v7, 0 }
 0x451   : > { %1444 = vrot.lane.b32.xlu1 %v1432_v8, %s9896_s18  ;;  %s676_s18 = scalar_lea.vmem [#allocation20], %s9031_s17 }
 0x452   : > { %s6731_s28 = sshll.u32 %s676_s18, 4  ;;  %s9824_s28 = int_to_ptr.vmem [resolvable:$true] %s6731_s28 }
 0x4b2   : > { %v1436_v27 = vpop.permute.xlu0 %1435 }
 0x4b3   : > { %v1448_v31 = vsel %vm967_vm3, %v9383_v50, %v1436_v27  ;;  %vm1480_vm3 = vcmask 654336   ;;  %v7022_v27 = vcombine.low %v1769_v24, %v1773_v26 }
 0x4bc   : > { %v1439_v28 = vpop.permute.xlu1 %1438 }
 0x4bd   : > { %v1450_v52 = vsel %vm985_vm5, %v1448_v31, %v1439_v28  ;;  %vm1491_vm5 = vcmask 916480   ;;  %v7023_v28 = vcombine.high %v1769_v24, %v1773_v26  ;;  %v1777_v31 = vld [vmem:[#allocation13 + $0x88] sm:$0xff]  ;;  %v2184_v26 = vld [vmem:[#allocation16 + $0x28] sm:$0xff] }
 0x4be   : > { %v1442_v49 = vpop.permute.xlu0 %1441  ;;  %v2183_v24 = vld [vmem:[#allocation16 + $0x20] sm:$0xff] }
 0x4bf   : > { %v1452_v32 = vsel %vm1003_vm7, %v1450_v52, %v1442_v49  ;;  %v7029_v52 = vcombine.high %v1776_v30, %v1780_v23  ;;  %v1781_v49 = vld [vmem:[#allocation13 + $0xa8] sm:$0xff] }
 0x4c0   : > { %v7031_v11 = vcombine.high %v1777_v31, %v1781_v49 }
 0x4c3   : > { %v1445_v33 = vpop.permute.xlu1 %1444 }
 0x4c4   : > { %v1454_v21 = vsel %vm1021_vm9, %v1452_v32, %v1445_v33  ;;  %v7028_v32 = vcombine.low %v1776_v30, %v1780_v23  ;;  %v7030_v33 = vcombine.low %v1777_v31, %v1781_v49  ;;  %v2187_v23 = vld [vmem:[#allocation16 + $0x40] sm:$0xff]  ;;  %v2192_v49 = vld [vmem:[#allocation16 + $0x68] sm:$0xff] }
 0x4c5   : > { %v1466_v34 = vrot.slane %v1454_v21, 2  ;;  %v1455_v29 = vshrl.u32 %v1454_v21, 16  ;;  %v1472_v37 = vrot.slane %v1454_v21, 3  ;;  %v1460_v38 = vrot.slane %v1454_v21, 1  ;;  %v2191_v31 = vld [vmem:[#allocation16 + $0x60] sm:$0xff] }
 0x4c7   : > { %1467 = vrot.lane.b32.xlu1 %v1466_v34, %s9937_s14  ;;  %1457 = vrot.lane.b32.xlu0 %v1455_v29, %s9935_s2  ;;  %v1469_v35 = vrot.slane %v1455_v29, 2  ;;  %v1463_v36 = vrot.slane %v1455_v29, 1  ;;  %v1475_v39 = vrot.slane %v1455_v29, 3  ;;  %v1785_v34 = vld [vmem:[#allocation13 + $0xc8] sm:$0x11]  ;;  %v1762_v29 = vld [vmem:[#allocation13 + $0x10] sm:$0xff] }
 0x4c8   : > { %s8606_s2 = smov 3  }
 0x4cb   : > { %1470 = vrot.lane.b32.xlu1 %v1469_v35, %s8599_s20  ;;  %1464 = vrot.lane.b32.xlu0 %v1463_v36, %s8600_s19  ;;  %v7039_v36 = vcombine.high %v1785_v34, %v1785_v34  ;;  %s9941_s19 = sld [smem:[#allocation37_spill]] }
 0x4cf   : > { %1473 = vrot.lane.b32.xlu1 %v1472_v37, %s8601_s6  ;;  %1461 = vrot.lane.b32.xlu0 %v1460_v38, %s8602_s1  ;;  %v7038_v38 = vcombine.low %v1785_v34, %v1785_v34  ;;  %v2195_v34 = vld [vmem:[#allocation16 + $0x80] sm:$0xff]  ;;  %s8605_s1 = smov 125  }
 0x4d1   : > { %s9822_s6 = scalar_lea.hbm %s9941_s19, %s7629_s5 }
 0x4d3   : > { %1476 = vrot.lane.b32.xlu0 %v1475_v39, %s9938_s4  ;;  %v1766_v39 = vld [vmem:[#allocation13 + $0x30] sm:$0xff]  ;;  %s9940_s4 = scalar_lea.vmem [#allocation2], %s9031_s17 }
 0x539   : > { %v1468_v40 = vpop.permute.xlu1 %1467  ;;  %v1458_v41 = vpop.permute.xlu0 %1457 }
 0x53a   : > { %v1479_v45 = vsel %vm1284_vm0, %v1454_v21, %v1458_v41  ;;  %v1784_v21 = vld [vmem:[#allocation13 + $0xc0] sm:$0x11]  ;;  %v1767_v41 = vld [vmem:[#allocation13 + $0x38] sm:$0xff]  ;;  %vm6713_vm0 = vcmask 72704  }
 0x53b   : > { %v7037_v35 = vcombine.high %v1784_v21, %v1784_v21  ;;  %v7036_v37 = vcombine.low %v1784_v21, %v1784_v21 }
 0x53d   : > { %v1471_v42 = vpop.permute.xlu1 %1470  ;;  %v1465_v43 = vpop.permute.xlu0 %1464 }
 0x53e   : > { %v1488_v44 = vsel %vm1021_vm9, %v1465_v43, %v1468_v40  ;;  %vm1740_vm9 = vcmask 401408   ;;  %v1763_v40 = vld [vmem:[#allocation13 + $0x18] sm:$0xff] }
 0x53f   : > { %v1490_v48 = vsel %vm1355_vm6, %v1488_v44, %v1471_v42  ;;  %v7016_v42 = vcombine.low %v1762_v29, %v1766_v39 }
 0x541   : > { %v1474_v46 = vpop.permute.xlu1 %1473  ;;  %v1462_v47 = vpop.permute.xlu0 %1461 }
 0x542   : > { %v1482_v50 = vsel %vm1480_vm3, %v1479_v45, %v1462_v47  ;;  %v1493_v51 = vsel %vm1491_vm5, %v1490_v48, %v1474_v46  ;;  %v7017_v45 = vcombine.high %v1762_v29, %v1766_v39  ;;  %v8603_v47 = vmov 0   ;;  %v2199_v29 = vld [vmem:[#allocation16 + $0xa0] sm:$0xff] }
 0x543   : > { %v1485_v54 = vsel %vm1483_vm11, %v1482_v50, %v1465_v43  ;;  %1692 = vmatprep.mubr.bf16.mxu0 %v1493_v51  ;;  %v7018_v43 = vcombine.low %v1763_v40, %v1767_v41  ;;  %v7019_v48 = vcombine.high %v1763_v40, %v1767_v41  ;;  %v7069_v39 = vcombine.high %v2195_v34, %v2199_v29  ;;  %v2203_v41 = vld [vmem:[#allocation16 + $0xc0] sm:$0xff] }
 0x544   : > { %1693 = vmatmul.mubr.bf16.vlgmr.msra.gmra.mrb[8].mxu0 %v1485_v54 }
 0x545   : > { %v1477_v55 = vpop.permute.xlu0 %1476  ;;  %2000 = vmatpush1.bf16.msra.mxu0 %v7012_v19  ;;  %2031 = vmatprep.mubr.bf16.mxu0 %v8603_v47  ;;  %v7041_v19 = vcombine.high %v1786_v53, %v1786_v53  ;;  %v2235_v53 = vld [vmem:[#allocation16 + $0x1c0] sm:$0xff] }
 0x546   : > { %v1496_v56 = vsel %vm1003_vm7, %v1474_v46, %v1477_v55  ;;  %2001 = vmatprep.subr.bf16.mxu0 %v7021_v25  ;;  %vm1974_vm7 = vcmask 1040384   ;;  %v2180_v25 = vld [vmem:[#allocation16 + $0x8] sm:$0xff] }
 0x547   : > { %7808 = vmatmul.mubr.msk.bf16.vlgmr.msra.gmra.mrb[12].mxu1 %vm1305_vm4, %v1496_v56  ;;  %v1976_v44 = vsel %vm1974_vm7, %v7036_v37, 0  ;;  %v1982_v46 = vsel %vm1974_vm7, %v7038_v38, 0  ;;  %v1755_v56 = vld [vmem:[#allocation10] sm:$0x1]  ;;  %v7055_v30 = vcombine.high %v2180_v25, %v2184_v26  ;;  %v7060_v37 = vcombine.low %v2187_v23, %v2191_v31 }
 0x548   : > { %2041 = vmatpush1.bf16.msra.mxu1 %v7014_v2  ;;  %2072 = vmatprep.mubr.bf16.mxu1 %v8603_v47  ;;  %v7043_v2 = vcombine.high %v1787_v16, %v1787_v16  ;;  %v2239_v16 = vld [vmem:[#allocation16 + $0x1e0] sm:$0xff] }
 0x549   : > { %2042 = vmatprep.subr.bf16.mxu1 %v7023_v28  ;;  %2002 = vmatpush1.bf16.msra.mxu0 %v7020_v6  ;;  %v1988_v6 = vsel %vm1974_vm7, %v7040_v3, 0  ;;  %v7053_v28 = vcombine.high %v2179_v22, %v2183_v24  ;;  %v7109_v3 = vcombine.high %v2235_v53, %v2239_v16 }
 0x54a   : > { %2003 = vmatprep.subr.bf16.mxu0 %v7029_v52  ;;  %v2188_v52 = vld [vmem:[#allocation16 + $0x48] sm:$0xff] }
 0x54b   : > { %v7063_v21 = vcombine.high %v2188_v52, %v2192_v49  ;;  %v7062_v38 = vcombine.low %v2188_v52, %v2192_v49  ;;  %v2252_v52 = vld [vmem:[#allocation16 + $0x248] sm:$0xff] }
 0x54c   : > { %2043 = vmatpush1.bf16.msra.mxu1 %v7022_v27  ;;  %v1994_v27 = vsel %vm1974_vm7, %v7042_v20, 0  ;;  %v2256_v49 = vld [vmem:[#allocation16 + $0x268] sm:$0xff] }
 0x54d   : > { %2044 = vmatprep.subr.bf16.mxu1 %v7031_v11  ;;  %2004 = vmatpush1.bf16.msra.mxu0 %v7028_v32  ;;  %v7052_v32 = vcombine.low %v2179_v22, %v2183_v24  ;;  %v7061_v11 = vcombine.high %v2187_v23, %v2191_v31  ;;  %v2243_v22 = vld [vmem:[#allocation16 + $0x200] sm:$0xff] }
 0x54e   : > { %7044 = vmatprep.subr.msk.bf16.mxu0 %vm1974_vm7, %v7037_v35  ;;  %v2196_v35 = vld [vmem:[#allocation16 + $0x88] sm:$0xff]  ;;  %v2247_v24 = vld [vmem:[#allocation16 + $0x220] sm:$0xff] }
 0x54f   : > { %v2251_v23 = vld [vmem:[#allocation16 + $0x240] sm:$0xff] }
 0x550   : > { %2045 = vmatpush1.bf16.msra.mxu1 %v7030_v33  ;;  %v7054_v33 = vcombine.low %v2180_v25, %v2184_v26  ;;  %v2244_v25 = vld [vmem:[#allocation16 + $0x208] sm:$0xff]  ;;  %v2255_v31 = vld [vmem:[#allocation16 + $0x260] sm:$0xff] }
 0x551   : > { %7046 = vmatprep.subr.msk.bf16.mxu1 %vm1974_vm7, %v7039_v36  ;;  %2006 = vmatpush1.bf16.msra.mxu0 %v1976_v44  ;;  %v2200_v36 = vld [vmem:[#allocation16 + $0xa8] sm:$0xff] }
 0x552   : > { %2081 = vmatprep.subr.bf16.mxu0 %v7017_v45  ;;  %v7071_v40 = vcombine.high %v2196_v35, %v2200_v36  ;;  %v2208_v44 = vld [vmem:[#allocation16 + $0xe8] sm:$0xff]  ;;  %v7068_v45 = vcombine.low %v2195_v34, %v2199_v29  ;;  %v2259_v34 = vld [vmem:[#allocation16 + $0x280] sm:$0xff] }
 0x553   : > { %v2248_v26 = vld [vmem:[#allocation16 + $0x228] sm:$0xff]  ;;  %v2263_v29 = vld [vmem:[#allocation16 + $0x2a0] sm:$0xff] }
 0x554   : > { %2047 = vmatpush1.bf16.msra.mxu1 %v1982_v46  ;;  %v7070_v46 = vcombine.low %v2196_v35, %v2200_v36  ;;  %v2260_v35 = vld [vmem:[#allocation16 + $0x288] sm:$0xff] }
 0x555   : > { %2122 = vmatprep.subr.bf16.mxu1 %v7019_v48  ;;  %v2264_v36 = vld [vmem:[#allocation16 + $0x2a8] sm:$0xff] }
 0x617   : > { %v7664_v57 = vpop.f32.mrb[8].mxu0 }
 0x618   : > { %v7665_v13 = vpop.f32.mrb[9].mxu0 }
 0x619   : > { %v7666_v58 = vadd.f32 %v7665_v13, %v7664_v57  ;;  %v7667_v59 = vpop.f32.mrb[10].mxu0  ;;  %v1757_v13 = vld [vmem:[#allocation11] sm:$0x1] }
 0x61a   : > { %v7668_v60 = vpop.f32.mrb[11].mxu0  ;;  %v1734_v61 = vpop.f32.mrb[12].mxu1  ;;  %v1774_v59 = vld [vmem:[#allocation13 + $0x70] sm:$0xff] }
 0x61b   : > { %v1695_v62 = vadd.f32 %v7666_v58, %v1537_v15  ;;  %v7809_v63 = vpop.f32.mrb[13].mxu1  ;;  %v1770_v58 = vld [vmem:[#allocation13 + $0x50] sm:$0xff]  ;;  %v1771_v60 = vld [vmem:[#allocation13 + $0x58] sm:$0xff] }
 0x61c   : > { %v1737_v0 = vpop.f32.mrb[14].mxu1 }
 0x61d   : > { %v1735_v1 = vadd.f32 %v1734_v61, %v1695_v62  ;;  %v7810_v4 = vpop.f32.mrb[15].mxu1  ;;  %v1775_v61 = vld [vmem:[#allocation13 + $0x78] sm:$0xff]  ;;  %v7025_v0 = vcombine.high %v1770_v58, %v1774_v59 }
 0x61e   : > { %v1778_v4 = vld [vmem:[#allocation13 + $0x90] sm:$0xff] }
 0x61f   : > { %v1741_v5 = vsel %vm1740_vm9, %v1735_v1, 0.0 }
 0x620   : > { %1742 = vadd.xlane.f32.xlu1 %v1741_v5  ;;  %v1782_v5 = vld [vmem:[#allocation13 + $0xb0] sm:$0xff] }
 0x621   : > { %v7032_v17 = vcombine.low %v1778_v4, %v1782_v5 }
 0x6ad   : > { %v1743_v7 = vpop.xlane.xlu1 %1742 }
 0x6ae   : > { %v1745_v8 = vmul.f32 0.02, %v1743_v7  ;;  %v1779_v7 = vld [vmem:[#allocation13 + $0x98] sm:$0xff] }
 0x6b0   : > { %v9467_v9 = vsub.f32 %v1735_v1, %v1745_v8  ;;  %v7027_v1 = vcombine.high %v1771_v60, %v1775_v61  ;;  %v1783_v8 = vld [vmem:[#allocation13 + $0xb8] sm:$0xff] }
 0x6b1   : > { %v7035_v14 = vcombine.high %v1779_v7, %v1783_v8  ;;  %v7034_v18 = vcombine.low %v1779_v7, %v1783_v8  ;;  %v2228_v7 = vld [vmem:[#allocation16 + $0x188] sm:$0xff] }
 0x6b2   : > { %v1747_v10 = vmul.f32 %v9467_v9, %v9467_v9  ;;  %v2232_v8 = vld [vmem:[#allocation16 + $0x1a8] sm:$0xff] }
 0x6b4   : > { %v1748_v12 = vsel %vm1740_vm9, %v1747_v10, 0.0  ;;  %v7026_v10 = vcombine.low %v1771_v60, %v1775_v61  ;;  %v2220_v60 = vld [vmem:[#allocation16 + $0x148] sm:$0xff] }
 0x6b5   : > { %1749 = vadd.xlane.f32.xlu0 %v1748_v12  ;;  %v7033_v12 = vcombine.high %v1778_v4, %v1782_v5  ;;  %v2224_v61 = vld [vmem:[#allocation16 + $0x168] sm:$0xff]  ;;  %v2227_v4 = vld [vmem:[#allocation16 + $0x180] sm:$0xff] }
 0x6b6   : > { %v2231_v5 = vld [vmem:[#allocation16 + $0x1a0] sm:$0xff] }
 0x742   : > { %v1750_v50 = vpop.xlane.xlu0 %1749 }
 0x743   : > { %v1751_v51 = vmul.f32 0.02, %v1750_v50  ;;  %v2211_v50 = vld [vmem:[#allocation16 + $0x100] sm:$0xff] }
 0x745   : > { %v1752_v54 = vadd.f32 1e-05, %v1751_v51  ;;  %v2215_v51 = vld [vmem:[#allocation16 + $0x120] sm:$0xff] }
 0x747   : > { %8163 = vrsqrt.f32 %v1752_v54  ;;  %v2212_v54 = vld [vmem:[#allocation16 + $0x108] sm:$0xff] }
 0x751   : > { %v8164_v55 = vpop.eup %8163 }
 0x752   : > { %v1754_v57 = vmul.f32 %v8164_v55, %v9467_v9  ;;  %v7024_v9 = vcombine.low %v1770_v58, %v1774_v59  ;;  %v2216_v55 = vld [vmem:[#allocation16 + $0x128] sm:$0xff]  ;;  %v2219_v58 = vld [vmem:[#allocation16 + $0x140] sm:$0xff] }
 0x753   : > { %v2223_v59 = vld [vmem:[#allocation16 + $0x160] sm:$0xff] }
 0x754   : > { %v1756_v15 = vmul.f32 %v1755_v56, %v1754_v57 }
 0x756   : > { %v1758_v62 = vadd.f32 %v1757_v13, %v1756_v15  ;;  %v7085_v13 = vcombine.high %v2211_v50, %v2215_v51  ;;  %v7087_v15 = vcombine.high %v2212_v54, %v2216_v55 }
 0x758   : > { %v1759_v63 = vpack.c.bf16 %v1758_v62, %v1758_v62  ;;  %v7084_v62 = vcombine.low %v2211_v50, %v2215_v51  ;;  %v2275_v50 = vld [vmem:[#allocation16 + $0x300] sm:$0xff] }
 0x759   : > { %v2279_v51 = vld [vmem:[#allocation16 + $0x320] sm:$0xff] }
 0x75a   : > { %7045 = vmatmul.mubr.msk.bf16.vlgmr.msra.gmra.mrb[12].mxu0 %vm1970_vm12, %v1759_v63  ;;  %7047 = vmatmul.mubr.msk.bf16.vlgmr.msra.gmra.mrb[16].mxu1 %vm1970_vm12, %v1759_v63 }
 0x75b   : > { %2082 = vmatpush1.bf16.msra.mxu0 %v7016_v42  ;;  %2123 = vmatpush1.bf16.msra.mxu1 %v7018_v43  ;;  %v2207_v42 = vld [vmem:[#allocation16 + $0xe0] sm:$0xff]  ;;  %v2204_v43 = vld [vmem:[#allocation16 + $0xc8] sm:$0xff] }
 0x75c   : > { %2083 = vmatprep.subr.bf16.mxu0 %v7025_v0  ;;  %2124 = vmatprep.subr.bf16.mxu1 %v7027_v1  ;;  %v7079_v48 = vcombine.high %v2204_v43, %v2208_v44  ;;  %v7076_v56 = vcombine.low %v2203_v41, %v2207_v42  ;;  %v7078_v57 = vcombine.low %v2204_v43, %v2208_v44  ;;  %v2268_v43 = vld [vmem:[#allocation16 + $0x2c8] sm:$0xff] }
 0x75d   : > { %2113 = vmatprep.mubr.bf16.mxu0 %v8603_v47  ;;  %2154 = vmatprep.mubr.bf16.mxu1 %v8603_v47  ;;  %v7077_v47 = vcombine.high %v2203_v41, %v2207_v42  ;;  %v7093_v0 = vcombine.high %v2219_v58, %v2223_v59  ;;  %v7095_v1 = vcombine.high %v2220_v60, %v2224_v61  ;;  %v2267_v41 = vld [vmem:[#allocation16 + $0x2c0] sm:$0xff]  ;;  %v2272_v44 = vld [vmem:[#allocation16 + $0x2e8] sm:$0xff] }
 0x75e   : > { %v2271_v42 = vld [vmem:[#allocation16 + $0x2e0] sm:$0xff] }
 0x75f   : > { %2084 = vmatpush1.bf16.msra.mxu0 %v7024_v9  ;;  %2125 = vmatpush1.bf16.msra.mxu1 %v7026_v10  ;;  %v7092_v9 = vcombine.low %v2219_v58, %v2223_v59  ;;  %v7094_v10 = vcombine.low %v2220_v60, %v2224_v61  ;;  %v2283_v58 = vld [vmem:[#allocation16 + $0x340] sm:$0xff]  ;;  %v2284_v60 = vld [vmem:[#allocation16 + $0x348] sm:$0xff] }
 0x760   : > { %2085 = vmatprep.subr.bf16.mxu0 %v7033_v12  ;;  %2126 = vmatprep.subr.bf16.mxu1 %v7035_v14  ;;  %v7101_v12 = vcombine.high %v2227_v4, %v2231_v5  ;;  %v7103_v14 = vcombine.high %v2228_v7, %v2232_v8  ;;  %v2287_v59 = vld [vmem:[#allocation16 + $0x360] sm:$0xff]  ;;  %v2288_v61 = vld [vmem:[#allocation16 + $0x368] sm:$0xff] }
 0x763   : > { %2086 = vmatpush1.bf16.msra.mxu0 %v7032_v17  ;;  %2127 = vmatpush1.bf16.msra.mxu1 %v7034_v18  ;;  %v2236_v17 = vld [vmem:[#allocation16 + $0x1c8] sm:$0xff] }
 0x764   : > { %7048 = vmatprep.subr.msk.bf16.mxu0 %vm1974_vm7, %v7041_v19  ;;  %7050 = vmatprep.subr.msk.bf16.mxu1 %vm1974_vm7, %v7043_v2  ;;  %v2240_v18 = vld [vmem:[#allocation16 + $0x1e8] sm:$0xff]  ;;  %v7100_v19 = vcombine.low %v2227_v4, %v2231_v5  ;;  %v7102_v2 = vcombine.low %v2228_v7, %v2232_v8  ;;  %v7156_v4 = vcombine.low %v2283_v58, %v2287_v59  ;;  %v2291_v7 = vld [vmem:[#allocation16 + $0x380] sm:$0xff] }
 0x765   : > { %v7111_v20 = vcombine.high %v2236_v17, %v2240_v18  ;;  %v7158_v5 = vcombine.low %v2284_v60, %v2288_v61  ;;  %v2295_v8 = vld [vmem:[#allocation16 + $0x3a0] sm:$0xff] }
 0x767   : > { %2088 = vmatpush1.bf16.msra.mxu0 %v1988_v6  ;;  %2129 = vmatpush1.bf16.msra.mxu1 %v1994_v27  ;;  %v7108_v6 = vcombine.low %v2235_v53, %v2239_v16  ;;  %v7110_v27 = vcombine.low %v2236_v17, %v2240_v18  ;;  %v2299_v17 = vld [vmem:[#allocation16 + $0x3c0] sm:$0xff] }
 0x768   : > { %5293 = vmatprep.subr.bf16.mxu0 %v7053_v28  ;;  %5457 = vmatprep.subr.bf16.mxu1 %v7055_v30  ;;  %v7117_v28 = vcombine.high %v2243_v22, %v2247_v24  ;;  %v7119_v30 = vcombine.high %v2244_v25, %v2248_v26  ;;  %v2303_v18 = vld [vmem:[#allocation16 + $0x3e0] sm:$0xff] }
 0x76a   : > { %7049 = vmatmul.mubr.msk.bf16.vlgmr.msra.gmra.mrb[16].mxu0 %vm1970_vm12, %v1759_v63  ;;  %7051 = vmatmul.mubr.msk.bf16.vlgmr.msra.gmra.mrb[20].mxu1 %vm1970_vm12, %v1759_v63  ;;  %v7086_v63 = vcombine.low %v2212_v54, %v2216_v55  ;;  %v2276_v54 = vld [vmem:[#allocation16 + $0x308] sm:$0xff] }
 0x76b   : > { %5294 = vmatpush1.bf16.msra.mxu0 %v7052_v32  ;;  %5458 = vmatpush1.bf16.msra.mxu1 %v7054_v33  ;;  %v7116_v32 = vcombine.low %v2243_v22, %v2247_v24  ;;  %v7118_v33 = vcombine.low %v2244_v25, %v2248_v26  ;;  %v2280_v55 = vld [vmem:[#allocation16 + $0x328] sm:$0xff]  ;;  %v2307_v25 = vld [vmem:[#allocation16 + $0x400] sm:$0xff] }
 0x76c   : > { %5295 = vmatprep.subr.bf16.mxu0 %v7061_v11  ;;  %5459 = vmatprep.subr.bf16.mxu1 %v7063_v21  ;;  %v7125_v11 = vcombine.high %v2251_v23, %v2255_v31  ;;  %v7127_v21 = vcombine.high %v2252_v52, %v2256_v49  ;;  %v2311_v26 = vld [vmem:[#allocation16 + $0x420] sm:$0xff] }
 0x76f   : > { %5296 = vmatpush1.bf16.msra.mxu0 %v7060_v37  ;;  %5460 = vmatpush1.bf16.msra.mxu1 %v7062_v38  ;;  %v7124_v37 = vcombine.low %v2251_v23, %v2255_v31  ;;  %v7126_v38 = vcombine.low %v2252_v52, %v2256_v49  ;;  %v1930_v52 = vlaneseq }
 0x770   : > { %5297 = vmatprep.subr.bf16.mxu0 %v7069_v39  ;;  %5461 = vmatprep.subr.bf16.mxu1 %v7071_v40  ;;  %v7133_v39 = vcombine.high %v2259_v34, %v2263_v29  ;;  %v7135_v40 = vcombine.high %v2260_v35, %v2264_v36 }
 0x771   : > { %v9484_v49 = vshrl.u32 %v1930_v52, 7  ;;  %v2347_v52 = vld [vmem:[#allocation16 + $0x540] sm:$0xff] }
 0x773   : > { %5298 = vmatpush1.bf16.msra.mxu0 %v7068_v45  ;;  %5462 = vmatpush1.bf16.msra.mxu1 %v7070_v46  ;;  %v7132_v45 = vcombine.low %v2259_v34, %v2263_v29  ;;  %v7134_v46 = vcombine.low %v2260_v35, %v2264_v36 }
 0x774   : > { %5299 = vmatprep.subr.bf16.mxu0 %v7077_v47  ;;  %5463 = vmatprep.subr.bf16.mxu1 %v7079_v48  ;;  %v7141_v47 = vcombine.high %v2267_v41, %v2271_v42  ;;  %v7143_v48 = vcombine.high %v2268_v43, %v2272_v44 }
 0x777   : > { %5300 = vmatpush1.bf16.msra.mxu0 %v7076_v56  ;;  %5464 = vmatpush1.bf16.msra.mxu1 %v7078_v57  ;;  %v7140_v56 = vcombine.low %v2267_v41, %v2271_v42  ;;  %v7142_v57 = vcombine.low %v2268_v43, %v2272_v44 }
 0x778   : > { %5301 = vmatprep.subr.bf16.mxu0 %v7085_v13  ;;  %5465 = vmatprep.subr.bf16.mxu1 %v7087_v15  ;;  %v7149_v13 = vcombine.high %v2275_v50, %v2279_v51  ;;  %v7151_v15 = vcombine.high %v2276_v54, %v2280_v55 }
 0x77b   : > { %5302 = vmatpush1.bf16.msra.mxu0 %v7084_v62  ;;  %5466 = vmatpush1.bf16.msra.mxu1 %v7086_v63  ;;  %v7148_v62 = vcombine.low %v2275_v50, %v2279_v51  ;;  %v7150_v63 = vcombine.low %v2276_v54, %v2280_v55  ;;  %v2315_v50 = vld [vmem:[#allocation16 + $0x440] sm:$0xff]  ;;  %v2316_v55 = vld [vmem:[#allocation16 + $0x448] sm:$0xff] }
 0x77c   : > { %5303 = vmatprep.subr.bf16.mxu0 %v7093_v0  ;;  %5467 = vmatprep.subr.bf16.mxu1 %v7095_v1  ;;  %v7157_v0 = vcombine.high %v2283_v58, %v2287_v59  ;;  %v7159_v1 = vcombine.high %v2284_v60, %v2288_v61  ;;  %v2319_v54 = vld [vmem:[#allocation16 + $0x460] sm:$0xff]  ;;  %v2324_v61 = vld [vmem:[#allocation16 + $0x488] sm:$0xff] }
 0x77d   : > { %v7189_v58 = vcombine.high %v2315_v50, %v2319_v54  ;;  %v2327_v60 = vld [vmem:[#allocation16 + $0x4a0] sm:$0xff] }
 0x77f   : > { %5304 = vmatpush1.bf16.msra.mxu0 %v7092_v9  ;;  %5468 = vmatpush1.bf16.msra.mxu1 %v7094_v10  ;;  %v2292_v9 = vld [vmem:[#allocation16 + $0x388] sm:$0xff]  ;;  %v7165_v10 = vcombine.high %v2291_v7, %v2295_v8 }
 0x780   : > { %5305 = vmatprep.subr.bf16.mxu0 %v7101_v12  ;;  %5469 = vmatprep.subr.bf16.mxu1 %v7103_v14  ;;  %v2296_v12 = vld [vmem:[#allocation16 + $0x3a8] sm:$0xff]  ;;  %v7164_v14 = vcombine.low %v2291_v7, %v2295_v8  ;;  %v2331_v7 = vld [vmem:[#allocation16 + $0x4c0] sm:$0xff] }
 0x781   : > { %v7166_v53 = vcombine.low %v2292_v9, %v2296_v12  ;;  %v7167_v16 = vcombine.high %v2292_v9, %v2296_v12  ;;  %v2335_v8 = vld [vmem:[#allocation16 + $0x4e0] sm:$0xff]  ;;  %v2332_v9 = vld [vmem:[#allocation16 + $0x4c8] sm:$0xff] }
 0x783   : > { %5306 = vmatpush1.bf16.msra.mxu0 %v7100_v19  ;;  %5470 = vmatpush1.bf16.msra.mxu1 %v7102_v2  ;;  %v2300_v19 = vld [vmem:[#allocation16 + $0x3c8] sm:$0xff]  ;;  %v7173_v2 = vcombine.high %v2299_v17, %v2303_v18 }
 0x784   : > { %5307 = vmatprep.subr.bf16.mxu0 %v7109_v3  ;;  %5471 = vmatprep.subr.bf16.mxu1 %v7111_v20  ;;  %v2304_v3 = vld [vmem:[#allocation16 + $0x3e8] sm:$0xff]  ;;  %v7172_v20 = vcombine.low %v2299_v17, %v2303_v18  ;;  %v2339_v17 = vld [vmem:[#allocation16 + $0x500] sm:$0xff] }
 0x785   : > { %v7174_v22 = vcombine.low %v2300_v19, %v2304_v3  ;;  %v7175_v24 = vcombine.high %v2300_v19, %v2304_v3  ;;  %v2340_v3 = vld [vmem:[#allocation16 + $0x508] sm:$0xff] }
 0x787   : > { %5308 = vmatpush1.bf16.msra.mxu0 %v7108_v6  ;;  %5472 = vmatpush1.bf16.msra.mxu1 %v7110_v27  ;;  %v2308_v6 = vld [vmem:[#allocation16 + $0x408] sm:$0xff]  ;;  %v7180_v27 = vcombine.low %v2307_v25, %v2311_v26 }
 0x788   : > { %5309 = vmatprep.subr.bf16.mxu0 %v7117_v28  ;;  %5473 = vmatprep.subr.bf16.mxu1 %v7119_v30  ;;  %v7181_v28 = vcombine.high %v2307_v25, %v2311_v26  ;;  %v2312_v30 = vld [vmem:[#allocation16 + $0x428] sm:$0xff] }
 0x789   : > { %v7182_v23 = vcombine.low %v2308_v6, %v2312_v30  ;;  %v7183_v31 = vcombine.high %v2308_v6, %v2312_v30  ;;  %v7204_v6 = vcombine.low %v2331_v7, %v2335_v8 }
 0x78b   : > { %5310 = vmatpush1.bf16.msra.mxu0 %v7116_v32  ;;  %5474 = vmatpush1.bf16.msra.mxu1 %v7118_v33  ;;  %v1932_v32 = vsub.s32 0, %v9484_v49  ;;  %v9487_v33 = vld [vmem:[#allocation14] sm:$0xff] }
 0x78c   : > { %5311 = vmatprep.subr.bf16.mxu0 %v7125_v11  ;;  %5475 = vmatprep.subr.bf16.mxu1 %v7127_v21  ;;  %v1936_v11 = vsub.s32 1, %v9484_v49  ;;  %v1944_v21 = vsub.s32 3, %v9484_v49 }
 0x78d   : > { %v1933_v34 = vrot.slane %v9487_v33, %v1932_v32 }
 0x78e   : > { %v1937_v29 = vrot.slane %v9487_v33, %v1936_v11  ;;  %v1945_v35 = vrot.slane %v9487_v33, %v1944_v21 }
 0x78f   : > { %5312 = vmatpush1.bf16.msra.mxu0 %v7124_v37  ;;  %5476 = vmatpush1.bf16.msra.mxu1 %v7126_v38 }
 0x790   : > { %5313 = vmatprep.subr.bf16.mxu0 %v7133_v39  ;;  %5477 = vmatprep.subr.bf16.mxu1 %v7135_v40 }
 0x793   : > { %5314 = vmatpush1.bf16.msra.mxu0 %v7132_v45  ;;  %5478 = vmatpush1.bf16.msra.mxu1 %v7134_v46 }
 0x794   : > { %5315 = vmatprep.subr.bf16.mxu0 %v7141_v47  ;;  %5479 = vmatprep.subr.bf16.mxu1 %v7143_v48 }
 0x797   : > { %5316 = vmatpush1.bf16.msra.mxu0 %v7140_v56  ;;  %5480 = vmatpush1.bf16.msra.mxu1 %v7142_v57  ;;  %v2320_v56 = vld [vmem:[#allocation16 + $0x468] sm:$0xff] }
 0x798   : > { %5317 = vmatprep.subr.bf16.mxu0 %v7149_v13  ;;  %5481 = vmatprep.subr.bf16.mxu1 %v7151_v15  ;;  %v2323_v15 = vld [vmem:[#allocation16 + $0x480] sm:$0xff]  ;;  %v7191_v59 = vcombine.high %v2316_v55, %v2320_v56 }
 0x799   : > { %v7196_v12 = vcombine.low %v2323_v15, %v2327_v60 }
 0x79b   : > { %5318 = vmatpush1.bf16.msra.mxu0 %v7148_v62  ;;  %5482 = vmatpush1.bf16.msra.mxu1 %v7150_v63  ;;  %v2328_v62 = vld [vmem:[#allocation16 + $0x4a8] sm:$0xff] }
 0x79c   : > { %5319 = vmatprep.subr.bf16.mxu0 %v7157_v0  ;;  %5483 = vmatprep.subr.bf16.mxu1 %v7159_v1  ;;  %v7188_v0 = vcombine.low %v2315_v50, %v2319_v54  ;;  %v7190_v1 = vcombine.low %v2316_v55, %v2320_v56  ;;  %v2363_v50 = vld [vmem:[#allocation16 + $0x5c0] sm:$0xff]  ;;  %v2364_v54 = vld [vmem:[#allocation16 + $0x5c8] sm:$0xff] }
 0x79d   : > { %v2368_v55 = vld [vmem:[#allocation16 + $0x5e8] sm:$0xff] }
 0x79f   : > { %5320 = vmatpush1.bf16.msra.mxu0 %v7156_v4  ;;  %5484 = vmatpush1.bf16.msra.mxu1 %v7158_v5  ;;  %v7197_v4 = vcombine.high %v2323_v15, %v2327_v60  ;;  %v7199_v5 = vcombine.high %v2324_v61, %v2328_v62  ;;  %v2371_v60 = vld [vmem:[#allocation16 + $0x600] sm:$0xff] }
 0x7a0   : > { %5321 = vmatprep.subr.bf16.mxu0 %v7165_v10  ;;  %5485 = vmatprep.subr.bf16.mxu1 %v7167_v16  ;;  %v2336_v10 = vld [vmem:[#allocation16 + $0x4e8] sm:$0xff] }
 0x7a1   : > { %v7207_v16 = vcombine.high %v2332_v9, %v2336_v10 }
 0x7a3   : > { %5322 = vmatpush1.bf16.msra.mxu0 %v7164_v14  ;;  %5486 = vmatpush1.bf16.msra.mxu1 %v7166_v53  ;;  %v7198_v14 = vcombine.low %v2324_v61, %v2328_v62  ;;  %v7205_v53 = vcombine.high %v2331_v7, %v2335_v8  ;;  %v2375_v61 = vld [vmem:[#allocation16 + $0x620] sm:$0xff]  ;;  %v2372_v62 = vld [vmem:[#allocation16 + $0x608] sm:$0xff] }
 0x7a4   : > { %5323 = vmatprep.subr.bf16.mxu0 %v7173_v2  ;;  %5487 = vmatprep.subr.bf16.mxu1 %v7175_v24  ;;  %v2343_v2 = vld [vmem:[#allocation16 + $0x520] sm:$0xff] }
 0x7a5   : > { %v2379_v8 = vld [vmem:[#allocation16 + $0x640] sm:$0xff] }
 0x7a7   : > { %5324 = vmatpush1.bf16.msra.mxu0 %v7172_v20  ;;  %5488 = vmatpush1.bf16.msra.mxu1 %v7174_v22  ;;  %v2344_v20 = vld [vmem:[#allocation16 + $0x528] sm:$0xff] }
 0x7a8   : > { %5334 = vmatprep.subr.bf16.mxu0 %v7181_v28  ;;  %5498 = vmatprep.subr.bf16.mxu1 %v7183_v31  ;;  %v7215_v31 = vcombine.high %v2340_v3, %v2344_v20 }
 0x82d   : > { %v2033_v36 = vpop.f32.mrb[12].mxu0  ;;  %v9500_v37 = vpop.f32.mrb[16].mxu1 }
 0x82e   : > { %v2034_v38 = vadd.f32 %v2033_v36, %v1933_v34  ;;  %v2035_v39 = vpop.f32.mrb[13].mxu0  ;;  %v2076_v40 = vpop.f32.mrb[17].mxu1  ;;  %v2351_v34 = vld [vmem:[#allocation16 + $0x560] sm:$0xff]  ;;  %v7212_v36 = vcombine.low %v2339_v17, %v2343_v2 }
 0x82f   : > { %v2036_v41 = vadd.f32 %v2035_v39, %v1937_v29  ;;  %v2077_v42 = vadd.f32 %v2076_v40, %v1945_v35  ;;  %v2037_v43 = vpop.f32.mrb[14].mxu0  ;;  %v2078_v44 = vpop.f32.mrb[18].mxu1  ;;  %v2348_v29 = vld [vmem:[#allocation16 + $0x548] sm:$0xff]  ;;  %v7221_v39 = vcombine.high %v2347_v52, %v2351_v34 }
 0x830   : > { %v2163_v45 = vmax.f32 %v2034_v38, 0.0  ;;  %v2038_v46 = vpop.f32.mrb[15].mxu0  ;;  %v2079_v47 = vpop.f32.mrb[19].mxu1  ;;  %v2352_v35 = vld [vmem:[#allocation16 + $0x568] sm:$0xff]  ;;  %v7214_v38 = vcombine.low %v2340_v3, %v2344_v20  ;;  %v2391_v3 = vld [vmem:[#allocation16 + $0x6a0] sm:$0xff] }
 0x831   : > { %v2164_v48 = vmax.f32 %v2036_v41, 0.0  ;;  %v2166_v51 = vmax.f32 %v2077_v42, 0.0  ;;  %v7223_v40 = vcombine.high %v2348_v29, %v2352_v35  ;;  %v2355_v41 = vld [vmem:[#allocation16 + $0x580] sm:$0xff]  ;;  %v2356_v43 = vld [vmem:[#allocation16 + $0x588] sm:$0xff]  ;;  %v7222_v46 = vcombine.low %v2348_v29, %v2352_v35 }
 0x832   : > { %v9504_v13 = vpack.c.bf16 %v2163_v45, %v2163_v45  ;;  %v2359_v42 = vld [vmem:[#allocation16 + $0x5a0] sm:$0xff]  ;;  %v2360_v44 = vld [vmem:[#allocation16 + $0x5a8] sm:$0xff]  ;;  %v7220_v45 = vcombine.low %v2347_v52, %v2351_v34 }
 0x833   : > { %v9502_v57 = vpack.c.bf16 %v2164_v48, %v2164_v48  ;;  %v9508_v63 = vpack.c.bf16 %v2166_v51, %v2166_v51  ;;  %v7229_v47 = vcombine.high %v2355_v41, %v2359_v42  ;;  %v7231_v48 = vcombine.high %v2356_v43, %v2360_v44  ;;  %v2367_v51 = vld [vmem:[#allocation16 + $0x5e0] sm:$0xff]  ;;  %v2388_v20 = vld [vmem:[#allocation16 + $0x688] sm:$0xff] }
 0x834   : > { %v7228_v56 = vcombine.low %v2355_v41, %v2359_v42  ;;  %v7230_v15 = vcombine.low %v2356_v43, %v2360_v44  ;;  %v2400_v52 = vld [vmem:[#allocation16 + $0x6e8] sm:$0xff] }
 0x835   : > { %5325 = vmatprep.mubr.bf16.mxu0 %v9502_v57  ;;  %5489 = vmatprep.mubr.bf16.mxu1 %v9502_v57  ;;  %v2408_v41 = vld [vmem:[#allocation16 + $0x728] sm:$0xff] }
 0x836   : > { %5326 = vmatmul.mubr.bf16.vlgmr.msra.gmra.mrb[20].mxu0 %v9504_v13  ;;  %5490 = vmatmul.mubr.bf16.vlgmr.msra.gmra.mrb[24].mxu1 %v9504_v13 }
 0x837   : > { %5335 = vmatpush1.bf16.msra.mxu0 %v7180_v27  ;;  %5499 = vmatpush1.bf16.msra.mxu1 %v7182_v23  ;;  %v7206_v27 = vcombine.low %v2332_v9, %v2336_v10  ;;  %v7213_v23 = vcombine.high %v2339_v17, %v2343_v2  ;;  %v2383_v9 = vld [vmem:[#allocation16 + $0x660] sm:$0xff]  ;;  %v2380_v10 = vld [vmem:[#allocation16 + $0x648] sm:$0xff] }
 0x838   : > { %5366 = vmatprep.mubr.bf16.mxu0 %v9508_v63  ;;  %5530 = vmatprep.mubr.bf16.mxu1 %v9508_v63  ;;  %v2387_v2 = vld [vmem:[#allocation16 + $0x680] sm:$0xff] }
 0x839   : > { %5336 = vmatprep.subr.bf16.mxu0 %v7189_v58  ;;  %5500 = vmatprep.subr.bf16.mxu1 %v7191_v59  ;;  %v7237_v58 = vcombine.high %v2363_v50, %v2367_v51  ;;  %v7239_v59 = vcombine.high %v2364_v54, %v2368_v55  ;;  %v7260_v34 = vcombine.low %v2387_v2, %v2391_v3 }
 0x83b   : > { %5337 = vmatpush1.bf16.msra.mxu0 %v7188_v0  ;;  %5501 = vmatpush1.bf16.msra.mxu1 %v7190_v1  ;;  %v2376_v0 = vld [vmem:[#allocation16 + $0x628] sm:$0xff]  ;;  %v7236_v1 = vcombine.low %v2363_v50, %v2367_v51 }
 0x83c   : > { %5338 = vmatprep.subr.bf16.mxu0 %v7197_v4  ;;  %5502 = vmatprep.subr.bf16.mxu1 %v7199_v5  ;;  %v7238_v4 = vcombine.low %v2364_v54, %v2368_v55  ;;  %v7245_v5 = vcombine.high %v2371_v60, %v2375_v61  ;;  %v7247_v7 = vcombine.high %v2372_v62, %v2376_v0  ;;  %v2416_v50 = vld [vmem:[#allocation16 + $0x768] sm:$0xff]  ;;  %v1940_v55 = vsub.s32 2, %v9484_v49 }
 0x83d   : > { %v9514_v18 = vpop.f32.mrb[16].mxu0  ;;  %v9516_v19 = vpop.f32.mrb[20].mxu1 }
 0x83e   : > { %v9518_v22 = vpop.f32.mrb[17].mxu0  ;;  %v9520_v24 = vpop.f32.mrb[21].mxu1 }
 0x83f   : > { %v2119_v25 = vpop.f32.mrb[18].mxu0  ;;  %v2160_v26 = vpop.f32.mrb[22].mxu1  ;;  %5339 = vmatpush1.bf16.msra.mxu0 %v7196_v12  ;;  %5503 = vmatpush1.bf16.msra.mxu1 %v7198_v14  ;;  %v2384_v12 = vld [vmem:[#allocation16 + $0x668] sm:$0xff]  ;;  %v7244_v14 = vcombine.low %v2371_v60, %v2375_v61  ;;  %v2423_v60 = vld [vmem:[#allocation16 + $0x7a0] sm:$0xff] }
 0x840   : > { %v2120_v28 = vpop.f32.mrb[19].mxu0  ;;  %v2161_v30 = vpop.f32.mrb[23].mxu1  ;;  %5340 = vmatprep.subr.bf16.mxu0 %v7205_v53  ;;  %5504 = vmatprep.subr.bf16.mxu1 %v7207_v16  ;;  %v7246_v53 = vcombine.low %v2372_v62, %v2376_v0  ;;  %v7253_v16 = vcombine.high %v2379_v8, %v2383_v9  ;;  %v7255_v17 = vcombine.high %v2380_v10, %v2384_v12  ;;  %v2392_v25 = vld [vmem:[#allocation16 + $0x6a8] sm:$0xff] }
 0x841   : > { %v7252_v26 = vcombine.low %v2379_v8, %v2383_v9  ;;  %v7263_v28 = vcombine.high %v2388_v20, %v2392_v25  ;;  %v2395_v30 = vld [vmem:[#allocation16 + $0x6c0] sm:$0xff]  ;;  %v7262_v29 = vcombine.low %v2388_v20, %v2392_v25  ;;  %v2420_v61 = vld [vmem:[#allocation16 + $0x788] sm:$0xff] }
 0x842   : > { %v2424_v62 = vld [vmem:[#allocation16 + $0x7a8] sm:$0xff]  ;;  %v2427_v8 = vld [vmem:[#allocation16 + $0x7c0] sm:$0xff] }
 0x843   : > { %5341 = vmatpush1.bf16.msra.mxu0 %v7204_v6  ;;  %5505 = vmatpush1.bf16.msra.mxu1 %v7206_v27  ;;  %v7254_v6 = vcombine.low %v2380_v10, %v2384_v12  ;;  %v7261_v27 = vcombine.high %v2387_v2, %v2391_v3  ;;  %v2431_v10 = vld [vmem:[#allocation16 + $0x7e0] sm:$0xff]  ;;  %v2428_v12 = vld [vmem:[#allocation16 + $0x7c8] sm:$0xff] }
 0x844   : > { %5342 = vmatprep.subr.bf16.mxu0 %v7213_v23  ;;  %5506 = vmatprep.subr.bf16.mxu1 %v7215_v31  ;;  %v2399_v23 = vld [vmem:[#allocation16 + $0x6e0] sm:$0xff]  ;;  %v2396_v31 = vld [vmem:[#allocation16 + $0x6c8] sm:$0xff]  ;;  %v7301_v2 = vcombine.high %v2427_v8, %v2431_v10 }
 0x845   : > { %v7269_v35 = vcombine.high %v2395_v30, %v2399_v23  ;;  %v7268_v42 = vcombine.low %v2395_v30, %v2399_v23  ;;  %v7270_v43 = vcombine.low %v2396_v31, %v2400_v52  ;;  %v2435_v20 = vld [vmem:[#allocation16 + $0x800] sm:$0xff] }
 0x847   : > { %5343 = vmatpush1.bf16.msra.mxu0 %v7212_v36  ;;  %5507 = vmatpush1.bf16.msra.mxu1 %v7214_v38  ;;  %v7271_v36 = vcombine.high %v2396_v31, %v2400_v52  ;;  %v2403_v38 = vld [vmem:[#allocation16 + $0x700] sm:$0xff] }
 0x848   : > { %5344 = vmatprep.subr.bf16.mxu0 %v7221_v39  ;;  %5508 = vmatprep.subr.bf16.mxu1 %v7223_v40  ;;  %v2407_v39 = vld [vmem:[#allocation16 + $0x720] sm:$0xff]  ;;  %v2404_v40 = vld [vmem:[#allocation16 + $0x708] sm:$0xff] }
 0x849   : > { %v7277_v44 = vcombine.high %v2403_v38, %v2407_v39  ;;  %v7276_v51 = vcombine.low %v2403_v38, %v2407_v39  ;;  %v7278_v54 = vcombine.low %v2404_v40, %v2408_v41 }
 0x84b   : > { %5345 = vmatpush1.bf16.msra.mxu0 %v7220_v45  ;;  %5509 = vmatpush1.bf16.msra.mxu1 %v7222_v46  ;;  %v7279_v45 = vcombine.high %v2404_v40, %v2408_v41  ;;  %v2411_v46 = vld [vmem:[#allocation16 + $0x740] sm:$0xff] }
 0x84c   : > { %5346 = vmatprep.subr.bf16.mxu0 %v7229_v47  ;;  %5510 = vmatprep.subr.bf16.mxu1 %v7231_v48  ;;  %v2415_v47 = vld [vmem:[#allocation16 + $0x760] sm:$0xff]  ;;  %v2412_v48 = vld [vmem:[#allocation16 + $0x748] sm:$0xff] }
 0x84d   : > { %v7284_v0 = vcombine.low %v2411_v46, %v2415_v47 }
 0x84f   : > { %5347 = vmatpush1.bf16.msra.mxu0 %v7228_v56  ;;  %5511 = vmatpush1.bf16.msra.mxu1 %v7230_v15  ;;  %v7285_v56 = vcombine.high %v2411_v46, %v2415_v47  ;;  %v7287_v15 = vcombine.high %v2412_v48, %v2416_v50  ;;  %v2456_v46 = vld [vmem:[#allocation16 + $0x8a8] sm:$0xff] }
 0x850   : > { %5348 = vmatprep.subr.bf16.mxu0 %v7237_v58  ;;  %5512 = vmatprep.subr.bf16.mxu1 %v7239_v59  ;;  %v2419_v58 = vld [vmem:[#allocation16 + $0x780] sm:$0xff]  ;;  %v1952_v59 = vsub.s32 5, %v9484_v49 }
 0x852   : > { %v1953_v9 = vrot.slane %v9487_v33, %v1952_v59 }
 0x853   : > { %5349 = vmatpush1.bf16.msra.mxu0 %v7236_v1  ;;  %5513 = vmatpush1.bf16.msra.mxu1 %v7238_v4  ;;  %v7286_v1 = vcombine.low %v2412_v48, %v2416_v50  ;;  %v1941_v4 = vrot.slane %v9487_v33, %v1940_v55 }
 0x854   : > { %5350 = vmatprep.subr.bf16.mxu0 %v7245_v5  ;;  %5514 = vmatprep.subr.bf16.mxu1 %v7247_v7  ;;  %v7293_v5 = vcombine.high %v2419_v58, %v2423_v60  ;;  %v7295_v7 = vcombine.high %v2420_v61, %v2424_v62  ;;  %v2118_v25 = vadd.f32 %v9518_v22, %v1953_v9 }
 0x857   : > { %5351 = vmatpush1.bf16.msra.mxu0 %v7244_v14  ;;  %5515 = vmatpush1.bf16.msra.mxu1 %v7246_v53  ;;  %v2432_v14 = vld [vmem:[#allocation16 + $0x7e8] sm:$0xff]  ;;  %v7292_v53 = vcombine.low %v2419_v58, %v2423_v60 }
 0x858   : > { %5352 = vmatprep.subr.bf16.mxu0 %v7253_v16  ;;  %5516 = vmatprep.subr.bf16.mxu1 %v7255_v17  ;;  %v7294_v16 = vcombine.low %v2420_v61, %v2424_v62  ;;  %v2075_v17 = vadd.f32 %v9500_v37, %v1941_v4  ;;  %v7303_v3 = vcombine.high %v2428_v12, %v2432_v14  ;;  %v2168_v37 = vmax.f32 %v2118_v25, 0.0  ;;  %v2464_v58 = vld [vmem:[#allocation16 + $0x8e8] sm:$0xff]  ;;  %v2471_v4 = vld [vmem:[#allocation16 + $0x920] sm:$0xff] }
 0x859   : > { %v7302_v30 = vcombine.low %v2428_v12, %v2432_v14  ;;  %v2475_v14 = vld [vmem:[#allocation16 + $0x940] sm:$0xff] }
 0x85a   : > { %v2165_v23 = vmax.f32 %v2075_v17, 0.0  ;;  %v9534_v40 = vpack.c.bf16 %v2168_v37, %v2168_v37  ;;  %v2480_v17 = vld [vmem:[#allocation16 + $0x968] sm:$0xff]  ;;  %v2491_v37 = vld [vmem:[#allocation16 + $0x9c0] sm:$0xff] }
 0x85b   : > { %5353 = vmatpush1.bf16.msra.mxu0 %v7252_v26  ;;  %5517 = vmatpush1.bf16.msra.mxu1 %v7254_v6  ;;  %v2439_v26 = vld [vmem:[#allocation16 + $0x820] sm:$0xff]  ;;  %v2436_v6 = vld [vmem:[#allocation16 + $0x808] sm:$0xff] }
 0x85c   : > { %5354 = vmatprep.subr.bf16.mxu0 %v7261_v27  ;;  %5518 = vmatprep.subr.bf16.mxu1 %v7263_v28  ;;  %v2440_v27 = vld [vmem:[#allocation16 + $0x828] sm:$0xff]  ;;  %v7300_v28 = vcombine.low %v2427_v8, %v2431_v10  ;;  %v7309_v31 = vcombine.high %v2435_v20, %v2439_v26  ;;  %v7308_v22 = vcombine.low %v2435_v20, %v2439_v26  ;;  %v2483_v26 = vld [vmem:[#allocation16 + $0x980] sm:$0xff] }
 0x85d   : > { %v7311_v52 = vcombine.high %v2436_v6, %v2440_v27  ;;  %v9532_v38 = vpack.c.bf16 %v2165_v23, %v2165_v23  ;;  %v7310_v39 = vcombine.low %v2436_v6, %v2440_v27  ;;  %v2487_v6 = vld [vmem:[#allocation16 + $0x9a0] sm:$0xff]  ;;  %v2484_v27 = vld [vmem:[#allocation16 + $0x988] sm:$0xff] }
 0x85f   : > { %5355 = vmatpush1.bf16.msra.mxu0 %v7260_v34  ;;  %5519 = vmatpush1.bf16.msra.mxu1 %v7262_v29  ;;  %v2443_v34 = vld [vmem:[#allocation16 + $0x840] sm:$0xff] }
 0x860   : > { %5356 = vmatprep.subr.bf16.mxu0 %v7269_v35  ;;  %5520 = vmatprep.subr.bf16.mxu1 %v7271_v36  ;;  %v2447_v29 = vld [vmem:[#allocation16 + $0x860] sm:$0xff]  ;;  %v2444_v35 = vld [vmem:[#allocation16 + $0x848] sm:$0xff] }
 0x861   : > { %v2448_v36 = vld [vmem:[#allocation16 + $0x868] sm:$0xff]  ;;  %v7317_v41 = vcombine.high %v2443_v34, %v2447_v29  ;;  %v7316_v47 = vcombine.low %v2443_v34, %v2447_v29  ;;  %v2495_v34 = vld [vmem:[#allocation16 + $0x9e0] sm:$0xff] }
 0x862   : > { %v7318_v48 = vcombine.low %v2444_v35, %v2448_v36  ;;  %v2492_v29 = vld [vmem:[#allocation16 + $0x9c8] sm:$0xff] }
 0x863   : > { %5357 = vmatpush1.bf16.msra.mxu0 %v7268_v42  ;;  %5521 = vmatpush1.bf16.msra.mxu1 %v7270_v43  ;;  %v7319_v42 = vcombine.high %v2444_v35, %v2448_v36  ;;  %v2451_v43 = vld [vmem:[#allocation16 + $0x880] sm:$0xff]  ;;  %v2496_v35 = vld [vmem:[#allocation16 + $0x9e8] sm:$0xff]  ;;  %v7356_v36 = vcombine.low %v2483_v26, %v2487_v6 }
 0x864   : > { %5358 = vmatprep.subr.bf16.mxu0 %v7277_v44  ;;  %5522 = vmatprep.subr.bf16.mxu1 %v7279_v45  ;;  %v2455_v44 = vld [vmem:[#allocation16 + $0x8a0] sm:$0xff]  ;;  %v2452_v45 = vld [vmem:[#allocation16 + $0x888] sm:$0xff] }
 0x865   : > { %v7325_v50 = vcombine.high %v2451_v43, %v2455_v44  ;;  %v7324_v60 = vcombine.low %v2451_v43, %v2455_v44  ;;  %v7326_v61 = vcombine.low %v2452_v45, %v2456_v46  ;;  %v2503_v43 = vld [vmem:[#allocation16 + $0xa20] sm:$0xff]  ;;  %v2500_v44 = vld [vmem:[#allocation16 + $0xa08] sm:$0xff] }
 0x867   : > { %5359 = vmatpush1.bf16.msra.mxu0 %v7276_v51  ;;  %5523 = vmatpush1.bf16.msra.mxu1 %v7278_v54  ;;  %v7327_v51 = vcombine.high %v2452_v45, %v2456_v46  ;;  %v2459_v54 = vld [vmem:[#allocation16 + $0x8c0] sm:$0xff]  ;;  %v2504_v45 = vld [vmem:[#allocation16 + $0xa28] sm:$0xff]  ;;  %v7364_v46 = vcombine.low %v2491_v37, %v2495_v34 }
 0x868   : > { %5360 = vmatprep.subr.bf16.mxu0 %v7285_v56  ;;  %5524 = vmatprep.subr.bf16.mxu1 %v7287_v15  ;;  %v2463_v56 = vld [vmem:[#allocation16 + $0x8e0] sm:$0xff]  ;;  %v2460_v15 = vld [vmem:[#allocation16 + $0x8c8] sm:$0xff] }
 0x869   : > { %v7333_v62 = vcombine.high %v2459_v54, %v2463_v56  ;;  %v7332_v8 = vcombine.low %v2459_v54, %v2463_v56  ;;  %v7334_v9 = vcombine.low %v2460_v15, %v2464_v58  ;;  %v2511_v54 = vld [vmem:[#allocation16 + $0xa60] sm:$0xff]  ;;  %v2508_v56 = vld [vmem:[#allocation16 + $0xa48] sm:$0xff] }
 0x86b   : > { %5361 = vmatpush1.bf16.msra.mxu0 %v7284_v0  ;;  %5525 = vmatpush1.bf16.msra.mxu1 %v7286_v1  ;;  %v7335_v0 = vcombine.high %v2460_v15, %v2464_v58  ;;  %v2467_v1 = vld [vmem:[#allocation16 + $0x900] sm:$0xff]  ;;  %v2512_v15 = vld [vmem:[#allocation16 + $0xa68] sm:$0xff] }
 0x86c   : > { %5362 = vmatprep.subr.bf16.mxu0 %v7293_v5  ;;  %5526 = vmatprep.subr.bf16.mxu1 %v7295_v7  ;;  %v2468_v5 = vld [vmem:[#allocation16 + $0x908] sm:$0xff]  ;;  %v7341_v10 = vcombine.high %v2467_v1, %v2471_v4 }
 0x86d   : > { %v2472_v7 = vld [vmem:[#allocation16 + $0x928] sm:$0xff] }
 0x86e   : > { %v7343_v12 = vcombine.high %v2468_v5, %v2472_v7 }
 0x86f   : > { %5363 = vmatpush1.bf16.msra.mxu0 %v7292_v53  ;;  %5527 = vmatpush1.bf16.msra.mxu1 %v7294_v16  ;;  %v2479_v53 = vld [vmem:[#allocation16 + $0x960] sm:$0xff]  ;;  %v2476_v16 = vld [vmem:[#allocation16 + $0x948] sm:$0xff] }
 0x870   : > { %5364 = vmatprep.subr.bf16.mxu0 %v7301_v2  ;;  %5528 = vmatprep.subr.bf16.mxu1 %v7303_v3  ;;  %v7340_v2 = vcombine.low %v2467_v1, %v2471_v4  ;;  %v7342_v3 = vcombine.low %v2468_v5, %v2472_v7  ;;  %v7349_v20 = vcombine.high %v2475_v14, %v2479_v53  ;;  %v2519_v1 = vld [vmem:[#allocation16 + $0xaa0] sm:$0xff]  ;;  %v2516_v4 = vld [vmem:[#allocation16 + $0xa88] sm:$0xff] }
 0x871   : > { %v7351_v25 = vcombine.high %v2476_v16, %v2480_v17  ;;  %v7350_v23 = vcombine.low %v2476_v16, %v2480_v17  ;;  %v2520_v5 = vld [vmem:[#allocation16 + $0xaa8] sm:$0xff] }
 0x872   : > { %v2528_v16 = vld [vmem:[#allocation16 + $0xae8] sm:$0xff] }
 0x873   : > { %5365 = vmatpush1.bf16.msra.mxu0 %v7300_v28  ;;  %5529 = vmatpush1.bf16.msra.mxu1 %v7302_v30  ;;  %v2488_v28 = vld [vmem:[#allocation16 + $0x9a8] sm:$0xff]  ;;  %v7348_v30 = vcombine.low %v2475_v14, %v2479_v53  ;;  %v2527_v14 = vld [vmem:[#allocation16 + $0xae0] sm:$0xff] }
 0x874   : > { %5375 = vmatprep.subr.bf16.mxu0 %v7309_v31  ;;  %5539 = vmatprep.subr.bf16.mxu1 %v7311_v52  ;;  %v7357_v31 = vcombine.high %v2483_v26, %v2487_v6  ;;  %v7359_v52 = vcombine.high %v2484_v27, %v2488_v28  ;;  %v2524_v53 = vld [vmem:[#allocation16 + $0xac8] sm:$0xff]  ;;  %v2535_v26 = vld [vmem:[#allocation16 + $0xb20] sm:$0xff] }
 0x875   : > { %v2532_v6 = vld [vmem:[#allocation16 + $0xb08] sm:$0xff] }
 0x876   : > { %5367 = vmatmul.mubr.bf16.vlgmr.msra.gmra.mrb[20].mxu0 %v9532_v38  ;;  %5531 = vmatmul.mubr.bf16.vlgmr.msra.gmra.mrb[24].mxu1 %v9532_v38 }
 0x877   : > { %5376 = vmatpush1.bf16.msra.mxu0 %v7308_v22  ;;  %5407 = vmatprep.mubr.bf16.mxu0 %v9534_v40  ;;  %v7358_v22 = vcombine.low %v2484_v27, %v2488_v28  ;;  %v2536_v27 = vld [vmem:[#allocation16 + $0xb28] sm:$0xff] }
 0x878   : > { %5540 = vmatpush1.bf16.msra.mxu1 %v7310_v39  ;;  %5571 = vmatprep.mubr.bf16.mxu1 %v9534_v40  ;;  %v7365_v39 = vcombine.high %v2491_v37, %v2495_v34  ;;  %v2543_v37 = vld [vmem:[#allocation16 + $0xb60] sm:$0xff]  ;;  %v2540_v34 = vld [vmem:[#allocation16 + $0xb48] sm:$0xff] }
 0x879   : > { %5377 = vmatprep.subr.bf16.mxu0 %v7317_v41  ;;  %5541 = vmatprep.subr.bf16.mxu1 %v7319_v42  ;;  %v7367_v41 = vcombine.high %v2492_v29, %v2496_v35  ;;  %v2499_v42 = vld [vmem:[#allocation16 + $0xa00] sm:$0xff] }
 0x87a   : > { %v7372_v58 = vcombine.low %v2499_v42, %v2503_v43 }
 0x87b   : > { %5378 = vmatpush1.bf16.msra.mxu0 %v7316_v47  ;;  %v7366_v47 = vcombine.low %v2492_v29, %v2496_v35  ;;  %v2544_v29 = vld [vmem:[#allocation16 + $0xb68] sm:$0xff] }
 0x87c   : > { %5542 = vmatpush1.bf16.msra.mxu1 %v7318_v48  ;;  %5379 = vmatprep.subr.bf16.mxu0 %v7325_v50  ;;  %v7373_v48 = vcombine.high %v2499_v42, %v2503_v43  ;;  %v7375_v50 = vcombine.high %v2500_v44, %v2504_v45  ;;  %v2547_v42 = vld [vmem:[#allocation16 + $0xb80] sm:$0xff] }
 0x87d   : > { %5543 = vmatprep.subr.bf16.mxu1 %v7327_v51  ;;  %v2507_v51 = vld [vmem:[#allocation16 + $0xa40] sm:$0xff] }
 0x87e   : > { %v7380_v7 = vcombine.low %v2507_v51, %v2511_v54  ;;  %v2551_v43 = vld [vmem:[#allocation16 + $0xba0] sm:$0xff] }
 0x87f   : > { %5380 = vmatpush1.bf16.msra.mxu0 %v7324_v60  ;;  %v7374_v60 = vcombine.low %v2500_v44, %v2504_v45  ;;  %v1960_v44 = vsub.s32 7, %v9484_v49  ;;  %v2548_v45 = vld [vmem:[#allocation16 + $0xb88] sm:$0xff] }
 0x880   : > { %5544 = vmatpush1.bf16.msra.mxu1 %v7326_v61  ;;  %5381 = vmatprep.subr.bf16.mxu0 %v7333_v62  ;;  %v7381_v61 = vcombine.high %v2507_v51, %v2511_v54  ;;  %v7383_v62 = vcombine.high %v2508_v56, %v2512_v15  ;;  %v7421_v51 = vcombine.high %v2547_v42, %v2551_v43 }
 0x881   : > { %5545 = vmatprep.subr.bf16.mxu1 %v7335_v0  ;;  %v2515_v0 = vld [vmem:[#allocation16 + $0xa80] sm:$0xff] }
 0x882   : > { %v7388_v17 = vcombine.low %v2515_v0, %v2519_v1 }
 0x883   : > { %5382 = vmatpush1.bf16.msra.mxu0 %v7332_v8  ;;  %v7382_v8 = vcombine.low %v2508_v56, %v2512_v15  ;;  %v2555_v56 = vld [vmem:[#allocation16 + $0xbc0] sm:$0xff] }
 0x884   : > { %5546 = vmatpush1.bf16.msra.mxu1 %v7334_v9  ;;  %5383 = vmatprep.subr.bf16.mxu0 %v7341_v10  ;;  %v7389_v9 = vcombine.high %v2515_v0, %v2519_v1  ;;  %v7391_v10 = vcombine.high %v2516_v4, %v2520_v5  ;;  %v2559_v15 = vld [vmem:[#allocation16 + $0xbe0] sm:$0xff] }
 0x885   : > { %5547 = vmatprep.subr.bf16.mxu1 %v7343_v12  ;;  %v2523_v12 = vld [vmem:[#allocation16 + $0xac0] sm:$0xff] }
 0x886   : > { %v7396_v28 = vcombine.low %v2523_v12, %v2527_v14 }
 0x887   : > { %5384 = vmatpush1.bf16.msra.mxu0 %v7340_v2  ;;  %v7390_v2 = vcombine.low %v2516_v4, %v2520_v5  ;;  %v7429_v4 = vcombine.high %v2555_v56, %v2559_v15 }
 0x888   : > { %5548 = vmatpush1.bf16.msra.mxu1 %v7342_v3  ;;  %5385 = vmatprep.subr.bf16.mxu0 %v7349_v20  ;;  %v7397_v3 = vcombine.high %v2523_v12, %v2527_v14  ;;  %v7399_v20 = vcombine.high %v2524_v53, %v2528_v16  ;;  %v2568_v12 = vld [vmem:[#allocation16 + $0xc28] sm:$0xff] }
 0x889   : > { %5549 = vmatprep.subr.bf16.mxu1 %v7351_v25  ;;  %v2531_v25 = vld [vmem:[#allocation16 + $0xb00] sm:$0xff] }
 0x88a   : > { %v7404_v35 = vcombine.low %v2531_v25, %v2535_v26 }
 0x88b   : > { %5386 = vmatpush1.bf16.msra.mxu0 %v7348_v30  ;;  %v7398_v30 = vcombine.low %v2524_v53, %v2528_v16 }
 0x88c   : > { %5550 = vmatpush1.bf16.msra.mxu1 %v7350_v23  ;;  %5387 = vmatprep.subr.bf16.mxu0 %v7357_v31  ;;  %v7405_v23 = vcombine.high %v2531_v25, %v2535_v26  ;;  %v7407_v31 = vcombine.high %v2532_v6, %v2536_v27  ;;  %v2572_v25 = vld [vmem:[#allocation16 + $0xc48] sm:$0xff] }
 0x88d   : > { %5551 = vmatprep.subr.bf16.mxu1 %v7359_v52  ;;  %v2539_v52 = vld [vmem:[#allocation16 + $0xb40] sm:$0xff]  ;;  %v2576_v26 = vld [vmem:[#allocation16 + $0xc68] sm:$0xff] }
 0x88f   : > { %5388 = vmatpush1.bf16.msra.mxu0 %v7356_v36  ;;  %v1948_v36 = vsub.s32 4, %v9484_v49 }
 0x890   : > { %5552 = vmatpush1.bf16.msra.mxu1 %v7358_v22  ;;  %5389 = vmatprep.subr.bf16.mxu0 %v7365_v39  ;;  %v7406_v22 = vcombine.low %v2532_v6, %v2536_v27  ;;  %v7413_v39 = vcombine.high %v2539_v52, %v2543_v37 }
 0x891   : > { %5553 = vmatprep.subr.bf16.mxu1 %v7367_v41  ;;  %v7415_v41 = vcombine.high %v2540_v34, %v2544_v29 }
 0x893   : > { %5390 = vmatpush1.bf16.msra.mxu0 %v7364_v46  ;;  %v2552_v46 = vld [vmem:[#allocation16 + $0xba8] sm:$0xff] }
 0x894   : > { %5554 = vmatpush1.bf16.msra.mxu1 %v7366_v47  ;;  %5391 = vmatprep.subr.bf16.mxu0 %v7373_v48  ;;  %v7412_v47 = vcombine.low %v2539_v52, %v2543_v37  ;;  %v1949_v48 = vrot.slane %v9487_v33, %v1948_v36  ;;  %v7423_v54 = vcombine.high %v2548_v45, %v2552_v46  ;;  %v2580_v52 = vld [vmem:[#allocation16 + $0xc88] sm:$0xff] }
 0x895   : > { %5555 = vmatprep.subr.bf16.mxu1 %v7375_v50  ;;  %v7414_v50 = vcombine.low %v2540_v34, %v2544_v29  ;;  %v7422_v1 = vcombine.low %v2548_v45, %v2552_v46  ;;  %v2584_v37 = vld [vmem:[#allocation16 + $0xca8] sm:$0xff]  ;;  %v7446_v29 = vcombine.low %v2572_v25, %v2576_v26 }
 0x896   : > { %v2116_v0 = vadd.f32 %v9514_v18, %v1949_v48  ;;  %v7454_v46 = vcombine.low %v2580_v52, %v2584_v37 }
 0x897   : > { %5392 = vmatpush1.bf16.msra.mxu0 %v7372_v58  ;;  %v1961_v58 = vrot.slane %v9487_v33, %v1960_v44  ;;  %v7428_v33 = vcombine.low %v2555_v56, %v2559_v15  ;;  %v2600_v56 = vld [vmem:[#allocation16 + $0xd28] sm:$0xff] }
 0x898   : > { %5556 = vmatpush1.bf16.msra.mxu1 %v7374_v60  ;;  %5393 = vmatprep.subr.bf16.mxu0 %v7381_v61  ;;  %v2556_v60 = vld [vmem:[#allocation16 + $0xbc8] sm:$0xff]  ;;  %v2167_v14 = vmax.f32 %v2116_v0, 0.0  ;;  %v2607_v0 = vld [vmem:[#allocation16 + $0xd60] sm:$0xff] }
 0x899   : > { %5557 = vmatprep.subr.bf16.mxu1 %v7383_v62  ;;  %v2560_v61 = vld [vmem:[#allocation16 + $0xbe8] sm:$0xff]  ;;  %v7420_v62 = vcombine.low %v2547_v42, %v2551_v43 }
 0x89a   : > { %v7431_v5 = vcombine.high %v2556_v60, %v2560_v61  ;;  %v7430_v53 = vcombine.low %v2556_v60, %v2560_v61  ;;  %v9550_v6 = vpack.c.bf16 %v2167_v14, %v2167_v14  ;;  %v2588_v42 = vld [vmem:[#allocation16 + $0xcc8] sm:$0xff] }
 0x89b   : > { %5394 = vmatpush1.bf16.msra.mxu0 %v7380_v7  ;;  %v2563_v7 = vld [vmem:[#allocation16 + $0xc00] sm:$0xff]  ;;  %v2592_v43 = vld [vmem:[#allocation16 + $0xce8] sm:$0xff] }
 0x89c   : > { %5558 = vmatpush1.bf16.msra.mxu1 %v7382_v8  ;;  %5395 = vmatprep.subr.bf16.mxu0 %v7389_v9  ;;  %v2567_v8 = vld [vmem:[#allocation16 + $0xc20] sm:$0xff]  ;;  %v2159_v9 = vadd.f32 %v9520_v24, %v1961_v58  ;;  %v7463_v48 = vcombine.high %v2588_v42, %v2592_v43  ;;  %v7462_v58 = vcombine.low %v2588_v42, %v2592_v43  ;;  %v2616_v14 = vld [vmem:[#allocation16 + $0xda8] sm:$0xff] }
 0x89d   : > { %5559 = vmatprep.subr.bf16.mxu1 %v7391_v10  ;;  %v2564_v10 = vld [vmem:[#allocation16 + $0xc08] sm:$0xff]  ;;  %v7437_v16 = vcombine.high %v2563_v7, %v2567_v8 }
 0x89e   : > { %v7439_v18 = vcombine.high %v2564_v10, %v2568_v12  ;;  %v7438_v24 = vcombine.low %v2564_v10, %v2568_v12  ;;  %v2611_v10 = vld [vmem:[#allocation16 + $0xd80] sm:$0xff]  ;;  %v2636_v42 = vld [vmem:[#allocation16 + $0xe48] sm:$0xff] }
 0x89f   : > { %5396 = vmatpush1.bf16.msra.mxu0 %v7388_v17  ;;  %v2170_v17 = vmax.f32 %v2159_v9, 0.0  ;;  %v2615_v12 = vld [vmem:[#allocation16 + $0xda0] sm:$0xff]  ;;  %v2640_v43 = vld [vmem:[#allocation16 + $0xe68] sm:$0xff] }
 0x8a0   : > { %5560 = vmatpush1.bf16.msra.mxu1 %v7390_v2  ;;  %5397 = vmatprep.subr.bf16.mxu0 %v7397_v3  ;;  %v2571_v2 = vld [vmem:[#allocation16 + $0xc40] sm:$0xff] }
 0x8a1   : > { %5561 = vmatprep.subr.bf16.mxu1 %v7399_v20  ;;  %v2575_v3 = vld [vmem:[#allocation16 + $0xc60] sm:$0xff]  ;;  %v7436_v20 = vcombine.low %v2563_v7, %v2567_v8 }
 0x8a2   : > { %v7445_v27 = vcombine.high %v2571_v2, %v2575_v3  ;;  %v7444_v34 = vcombine.low %v2571_v2, %v2575_v3  ;;  %v2619_v2 = vld [vmem:[#allocation16 + $0xdc0] sm:$0xff] }
 0x8a3   : > { %5398 = vmatpush1.bf16.msra.mxu0 %v7396_v28  ;;  %v2579_v28 = vld [vmem:[#allocation16 + $0xc80] sm:$0xff] }
 0x8a4   : > { %5562 = vmatpush1.bf16.msra.mxu1 %v7398_v30  ;;  %5399 = vmatprep.subr.bf16.mxu0 %v7405_v23  ;;  %v2583_v30 = vld [vmem:[#allocation16 + $0xca0] sm:$0xff]  ;;  %v9552_v23 = vpack.c.bf16 %v2170_v17, %v2170_v17 }
 0x8a5   : > { %5563 = vmatprep.subr.bf16.mxu1 %v7407_v31  ;;  %v7447_v31 = vcombine.high %v2572_v25, %v2576_v26  ;;  %v7452_v45 = vcombine.low %v2579_v28, %v2583_v30  ;;  %v2623_v3 = vld [vmem:[#allocation16 + $0xde0] sm:$0xff]  ;;  %v2624_v25 = vld [vmem:[#allocation16 + $0xde8] sm:$0xff]  ;;  %v7484_v26 = vcombine.low %v2611_v10, %v2615_v12 }
 0x8a7   : > { %5400 = vmatpush1.bf16.msra.mxu0 %v7404_v35  ;;  %v7453_v35 = vcombine.high %v2579_v28, %v2583_v30  ;;  %v2627_v30 = vld [vmem:[#allocation16 + $0xe00] sm:$0xff] }
 0x8a8   : > { %5564 = vmatpush1.bf16.msra.mxu1 %v7406_v22  ;;  %5401 = vmatprep.subr.bf16.mxu0 %v7413_v39  ;;  %v7455_v22 = vcombine.high %v2580_v52, %v2584_v37  ;;  %v2587_v39 = vld [vmem:[#allocation16 + $0xcc0] sm:$0xff]  ;;  %v2628_v52 = vld [vmem:[#allocation16 + $0xe08] sm:$0xff] }
 0x8a9   : > { %5565 = vmatprep.subr.bf16.mxu1 %v7415_v41  ;;  %v2591_v41 = vld [vmem:[#allocation16 + $0xce0] sm:$0xff]  ;;  %v2632_v37 = vld [vmem:[#allocation16 + $0xe28] sm:$0xff] }
 0x8aa   : > { %v7460_v15 = vcombine.low %v2587_v39, %v2591_v41 }
 0x8ab   : > { %5402 = vmatpush1.bf16.msra.mxu0 %v7412_v47  ;;  %v7461_v47 = vcombine.high %v2587_v39, %v2591_v41  ;;  %v2635_v39 = vld [vmem:[#allocation16 + $0xe40] sm:$0xff] }
 0x8ac   : > { %5566 = vmatpush1.bf16.msra.mxu1 %v7414_v50  ;;  %5403 = vmatprep.subr.bf16.mxu0 %v7421_v51  ;;  %v2595_v50 = vld [vmem:[#allocation16 + $0xd00] sm:$0xff] }
 0x8ad   : > { %5567 = vmatprep.subr.bf16.mxu1 %v7423_v54  ;;  %v2599_v51 = vld [vmem:[#allocation16 + $0xd20] sm:$0xff]  ;;  %v2596_v54 = vld [vmem:[#allocation16 + $0xd08] sm:$0xff] }
 0x8ae   : > { %v7469_v60 = vcombine.high %v2595_v50, %v2599_v51  ;;  %v7471_v61 = vcombine.high %v2596_v54, %v2600_v56  ;;  %v7470_v7 = vcombine.low %v2596_v54, %v2600_v56  ;;  %v2639_v41 = vld [vmem:[#allocation16 + $0xe60] sm:$0xff]  ;;  %v2644_v54 = vld [vmem:[#allocation16 + $0xe88] sm:$0xff] }
 0x8af   : > { %5404 = vmatpush1.bf16.msra.mxu0 %v7420_v62  ;;  %v2603_v62 = vld [vmem:[#allocation16 + $0xd40] sm:$0xff]  ;;  %v2648_v56 = vld [vmem:[#allocation16 + $0xea8] sm:$0xff] }
 0x8b0   : > { %5568 = vmatpush1.bf16.msra.mxu1 %v7422_v1  ;;  %5405 = vmatprep.subr.bf16.mxu0 %v7429_v4  ;;  %v2604_v1 = vld [vmem:[#allocation16 + $0xd48] sm:$0xff]  ;;  %v7477_v8 = vcombine.high %v2603_v62, %v2607_v0 }
 0x8b1   : > { %5569 = vmatprep.subr.bf16.mxu1 %v7431_v5  ;;  %v2608_v4 = vld [vmem:[#allocation16 + $0xd68] sm:$0xff]  ;;  %v7468_v5 = vcombine.low %v2595_v50, %v2599_v51  ;;  %v2643_v50 = vld [vmem:[#allocation16 + $0xe80] sm:$0xff] }
 0x8b2   : > { %v7479_v9 = vcombine.high %v2604_v1, %v2608_v4  ;;  %v2647_v51 = vld [vmem:[#allocation16 + $0xea0] sm:$0xff] }
 0x8b3   : > { %5406 = vmatpush1.bf16.msra.mxu0 %v7428_v33  ;;  %v2612_v33 = vld [vmem:[#allocation16 + $0xd88] sm:$0xff] }
 0x8b4   : > { %5570 = vmatpush1.bf16.msra.mxu1 %v7430_v53  ;;  %5416 = vmatprep.subr.bf16.mxu0 %v7437_v16  ;;  %v7476_v53 = vcombine.low %v2603_v62, %v2607_v0  ;;  %v7478_v16 = vcombine.low %v2604_v1, %v2608_v4  ;;  %v7487_v17 = vcombine.high %v2612_v33, %v2616_v14  ;;  %v2651_v62 = vld [vmem:[#allocation16 + $0xec0] sm:$0xff]  ;;  %v2652_v1 = vld [vmem:[#allocation16 + $0xec8] sm:$0xff] }
 0x8b5   : > { %5580 = vmatprep.subr.bf16.mxu1 %v7439_v18  ;;  %v7485_v18 = vcombine.high %v2611_v10, %v2615_v12  ;;  %v2655_v0 = vld [vmem:[#allocation16 + $0xee0] sm:$0xff]  ;;  %v2656_v4 = vld [vmem:[#allocation16 + $0xee8] sm:$0xff] }
 0x8b6   : > { %5408 = vmatmul.mubr.bf16.vlgmr.msra.gmra.mrb[20].mxu0 %v9550_v6  ;;  %v2659_v10 = vld [vmem:[#allocation16 + $0xf00] sm:$0xff] }
 0x8b7   : > { %5572 = vmatmul.mubr.bf16.vlgmr.msra.gmra.mrb[24].mxu1 %v9550_v6  ;;  %5417 = vmatpush1.bf16.msra.mxu0 %v7436_v20  ;;  %v2620_v20 = vld [vmem:[#allocation16 + $0xdc8] sm:$0xff]  ;;  %v2663_v12 = vld [vmem:[#allocation16 + $0xf20] sm:$0xff] }
 0x8b8   : > { %5448 = vmatprep.mubr.bf16.mxu0 %v9552_v23  ;;  %5581 = vmatpush1.bf16.msra.mxu1 %v7438_v24  ;;  %v7486_v24 = vcombine.low %v2612_v33, %v2616_v14  ;;  %v7495_v28 = vcombine.high %v2620_v20, %v2624_v25  ;;  %v2660_v33 = vld [vmem:[#allocation16 + $0xf08] sm:$0xff] }
 0x8b9   : > { %5612 = vmatprep.mubr.bf16.mxu1 %v9552_v23  ;;  %5418 = vmatprep.subr.bf16.mxu0 %v7445_v27  ;;  %v7493_v27 = vcombine.high %v2619_v2, %v2623_v3  ;;  %v2664_v14 = vld [vmem:[#allocation16 + $0xf28] sm:$0xff] }
 0x8ba   : > { %5582 = vmatprep.subr.bf16.mxu1 %v7447_v31  ;;  %v2631_v31 = vld [vmem:[#allocation16 + $0xe20] sm:$0xff] }
 0x8bb   : > { %5419 = vmatpush1.bf16.msra.mxu0 %v7444_v34  ;;  %v7492_v34 = vcombine.low %v2619_v2, %v2623_v3  ;;  %v2667_v2 = vld [vmem:[#allocation16 + $0xf40] sm:$0xff] }
 0x8bc   : > { %5583 = vmatpush1.bf16.msra.mxu1 %v7446_v29  ;;  %5420 = vmatprep.subr.bf16.mxu0 %v7453_v35  ;;  %v7494_v29 = vcombine.low %v2620_v20, %v2624_v25  ;;  %v7501_v35 = vcombine.high %v2627_v30, %v2631_v31  ;;  %v2671_v3 = vld [vmem:[#allocation16 + $0xf60] sm:$0xff]  ;;  %v2668_v20 = vld [vmem:[#allocation16 + $0xf48] sm:$0xff] }
 0x8bd   : > { %5584 = vmatprep.subr.bf16.mxu1 %v7455_v22  ;;  %v7503_v22 = vcombine.high %v2628_v52, %v2632_v37  ;;  %v2672_v25 = vld [vmem:[#allocation16 + $0xf68] sm:$0xff] }
 0x8bf   : > { %5421 = vmatpush1.bf16.msra.mxu0 %v7452_v45  ;;  %v7500_v45 = vcombine.low %v2627_v30, %v2631_v31  ;;  %v7543_v30 = vcombine.high %v2668_v20, %v2672_v25  ;;  %v2675_v31 = vld [vmem:[#allocation16 + $0xf80] sm:$0xff] }
 0x8c0   : > { %5585 = vmatpush1.bf16.msra.mxu1 %v7454_v46  ;;  %5422 = vmatprep.subr.bf16.mxu0 %v7461_v47  ;;  %v7502_v46 = vcombine.low %v2628_v52, %v2632_v37  ;;  %v7509_v47 = vcombine.high %v2635_v39, %v2639_v41  ;;  %v2679_v52 = vld [vmem:[#allocation16 + $0xfa0] sm:$0xff]  ;;  %v2676_v37 = vld [vmem:[#allocation16 + $0xf88] sm:$0xff] }
 0x8c1   : > { %5586 = vmatprep.subr.bf16.mxu1 %v7463_v48  ;;  %v7511_v48 = vcombine.high %v2636_v42, %v2640_v43 }
 0x8c3   : > { %5423 = vmatpush1.bf16.msra.mxu0 %v7460_v15  ;;  %v7508_v15 = vcombine.low %v2635_v39, %v2639_v41  ;;  %v7542_v39 = vcombine.low %v2668_v20, %v2672_v25  ;;  %v7549_v41 = vcombine.high %v2675_v31, %v2679_v52 }
 0x8c4   : > { %5587 = vmatpush1.bf16.msra.mxu1 %v7462_v58  ;;  %5424 = vmatprep.subr.bf16.mxu0 %v7469_v60  ;;  %v7510_v58 = vcombine.low %v2636_v42, %v2640_v43  ;;  %v7517_v60 = vcombine.high %v2643_v50, %v2647_v51  ;;  %v2683_v43 = vld [vmem:[#allocation16 + $0xfc0] sm:$0xff] }
 0x8c5   : > { %5588 = vmatprep.subr.bf16.mxu1 %v7471_v61  ;;  %v7519_v61 = vcombine.high %v2644_v54, %v2648_v56 }
 0x8c7   : > { %5425 = vmatpush1.bf16.msra.mxu0 %v7468_v5  ;;  %v7516_v5 = vcombine.low %v2643_v50, %v2647_v51 }
 0x8c8   : > { %5589 = vmatpush1.bf16.msra.mxu1 %v7470_v7  ;;  %5426 = vmatprep.subr.bf16.mxu0 %v7477_v8  ;;  %v7518_v7 = vcombine.low %v2644_v54, %v2648_v56  ;;  %v7525_v8 = vcombine.high %v2651_v62, %v2655_v0 }
 0x8c9   : > { %5590 = vmatprep.subr.bf16.mxu1 %v7479_v9  ;;  %v7527_v9 = vcombine.high %v2652_v1, %v2656_v4 }
 0x8cb   : > { %5427 = vmatpush1.bf16.msra.mxu0 %v7476_v53  ;;  %v7524_v53 = vcombine.low %v2651_v62, %v2655_v0 }
 0x8cc   : > { %5591 = vmatpush1.bf16.msra.mxu1 %v7478_v16  ;;  %5428 = vmatprep.subr.bf16.mxu0 %v7485_v18  ;;  %v7526_v16 = vcombine.low %v2652_v1, %v2656_v4  ;;  %v7533_v18 = vcombine.high %v2659_v10, %v2663_v12 }
 0x8cd   : > { %5592 = vmatprep.subr.bf16.mxu1 %v7487_v17  ;;  %v7535_v17 = vcombine.high %v2660_v33, %v2664_v14 }
 0x8cf   : > { %5429 = vmatpush1.bf16.msra.mxu0 %v7484_v26  ;;  %v7532_v26 = vcombine.low %v2659_v10, %v2663_v12  ;;  %v2194_v10 = vld [vmem:[#allocation16 + $0x78] sm:$0xff] }
 0x8d0   : > { %5593 = vmatpush1.bf16.msra.mxu1 %v7486_v24  ;;  %5430 = vmatprep.subr.bf16.mxu0 %v7493_v27  ;;  %v1956_v24 = vsub.s32 6, %v9484_v49  ;;  %v7534_v27 = vcombine.low %v2660_v33, %v2664_v14 }
 0x8d1   : > { %5594 = vmatprep.subr.bf16.mxu1 %v7495_v28  ;;  %v7541_v28 = vcombine.high %v2667_v2, %v2671_v3 }
 0x8d3   : > { %5431 = vmatpush1.bf16.msra.mxu0 %v7492_v34  ;;  %v2680_v34 = vld [vmem:[#allocation16 + $0xfa8] sm:$0xff] }
 0x8d4   : > { %5595 = vmatpush1.bf16.msra.mxu1 %v7494_v29  ;;  %5432 = vmatprep.subr.bf16.mxu0 %v7501_v35  ;;  %v7540_v29 = vcombine.low %v2667_v2, %v2671_v3  ;;  %v8173_v35 = vld [vmem:[#allocation14] sm:$0xff]  ;;  %v7551_v42 = vcombine.high %v2676_v37, %v2680_v34  ;;  %v7550_v51 = vcombine.low %v2676_v37, %v2680_v34 }
 0x8d5   : > { %5596 = vmatprep.subr.bf16.mxu1 %v7503_v22  ;;  %v1957_v22 = vrot.slane %v8173_v35, %v1956_v24  ;;  %v2202_v2 = vld [vmem:[#allocation16 + $0xb8] sm:$0xff]  ;;  %v2213_v35 = vld [vmem:[#allocation16 + $0x110] sm:$0xff] }
 0x8d7   : > { %5433 = vmatpush1.bf16.msra.mxu0 %v7500_v45  ;;  %v2687_v45 = vld [vmem:[#allocation16 + $0xfe0] sm:$0xff]  ;;  %v2157_v50 = vadd.f32 %v9516_v19, %v1957_v22  ;;  %v2189_v19 = vld [vmem:[#allocation16 + $0x50] sm:$0xff] }
 0x8d8   : > { %5597 = vmatpush1.bf16.msra.mxu1 %v7502_v46  ;;  %5434 = vmatprep.subr.bf16.mxu0 %v7509_v47  ;;  %v2684_v46 = vld [vmem:[#allocation16 + $0xfc8] sm:$0xff]  ;;  %v7557_v54 = vcombine.high %v2683_v43, %v2687_v45  ;;  %v7556_v62 = vcombine.low %v2683_v43, %v2687_v45  ;;  %v2217_v22 = vld [vmem:[#allocation16 + $0x130] sm:$0xff] }
 0x8d9   : > { %5598 = vmatprep.subr.bf16.mxu1 %v7511_v48  ;;  %v2688_v47 = vld [vmem:[#allocation16 + $0xfe8] sm:$0xff]  ;;  %v7548_v48 = vcombine.low %v2675_v31, %v2679_v52  ;;  %v2169_v0 = vmax.f32 %v2157_v50, 0.0  ;;  %v2210_v31 = vld [vmem:[#allocation16 + $0xf8] sm:$0xff]  ;;  %v7089_v43 = vcombine.high %v2213_v35, %v2217_v22 }
 0x8da   : > { %v7559_v56 = vcombine.high %v2684_v46, %v2688_v47  ;;  %v7558_v1 = vcombine.low %v2684_v46, %v2688_v47  ;;  %v2221_v46 = vld [vmem:[#allocation16 + $0x150] sm:$0xff]  ;;  %v2226_v50 = vld [vmem:[#allocation16 + $0x178] sm:$0xff] }
 0x8db   : > { %5435 = vmatpush1.bf16.msra.mxu0 %v7508_v15  ;;  %v2181_v15 = vld [vmem:[#allocation16 + $0x10] sm:$0xff]  ;;  %v9562_v12 = vpack.c.bf16 %v2169_v0, %v2169_v0 }
 0x8dc   : > { %5599 = vmatpush1.bf16.msra.mxu1 %v7510_v58  ;;  %5436 = vmatprep.subr.bf16.mxu0 %v7517_v60  ;;  %v2185_v58 = vld [vmem:[#allocation16 + $0x30] sm:$0xff]  ;;  %v2182_v60 = vld [vmem:[#allocation16 + $0x18] sm:$0xff] }
 0x8dd   : > { %5600 = vmatprep.subr.bf16.mxu1 %v7519_v61  ;;  %v2186_v61 = vld [vmem:[#allocation16 + $0x38] sm:$0xff]  ;;  %v7057_v4 = vcombine.high %v2181_v15, %v2185_v58  ;;  %v2225_v47 = vld [vmem:[#allocation16 + $0x170] sm:$0xff] }
 0x8de   : > { %v7058_v33 = vcombine.low %v2182_v60, %v2186_v61  ;;  %v7096_v0 = vcombine.low %v2221_v46, %v2225_v47 }
 0x8df   : > { %5437 = vmatpush1.bf16.msra.mxu0 %v7516_v5  ;;  %v7059_v5 = vcombine.high %v2182_v60, %v2186_v61  ;;  %v2233_v60 = vld [vmem:[#allocation16 + $0x1b0] sm:$0xff]  ;;  %v2230_v61 = vld [vmem:[#allocation16 + $0x198] sm:$0xff] }
 0x8e0   : > { %5601 = vmatpush1.bf16.msra.mxu1 %v7518_v7  ;;  %5438 = vmatprep.subr.bf16.mxu0 %v7525_v8  ;;  %v2193_v7 = vld [vmem:[#allocation16 + $0x70] sm:$0xff]  ;;  %v7056_v8 = vcombine.low %v2181_v15, %v2185_v58 }
 0x8e1   : > { %5602 = vmatprep.subr.bf16.mxu1 %v7527_v9  ;;  %v2190_v9 = vld [vmem:[#allocation16 + $0x58] sm:$0xff]  ;;  %v7065_v14 = vcombine.high %v2189_v19, %v2193_v7  ;;  %v7064_v3 = vcombine.low %v2189_v19, %v2193_v7  ;;  %v2229_v58 = vld [vmem:[#allocation16 + $0x190] sm:$0xff] }
 0x8e2   : > { %v7066_v20 = vcombine.low %v2190_v9, %v2194_v10  ;;  %v2237_v19 = vld [vmem:[#allocation16 + $0x1d0] sm:$0xff] }
 0x8e3   : > { %5439 = vmatpush1.bf16.msra.mxu0 %v7524_v53  ;;  %v2197_v53 = vld [vmem:[#allocation16 + $0x90] sm:$0xff] }
 0x8e4   : > { %5603 = vmatpush1.bf16.msra.mxu1 %v7526_v16  ;;  %5440 = vmatprep.subr.bf16.mxu0 %v7533_v18  ;;  %v2201_v16 = vld [vmem:[#allocation16 + $0xb0] sm:$0xff]  ;;  %v7067_v18 = vcombine.high %v2190_v9, %v2194_v10  ;;  %v2242_v9 = vld [vmem:[#allocation16 + $0x1f8] sm:$0xff]  ;;  %v7104_v10 = vcombine.low %v2229_v58, %v2233_v60 }
 0x8e5   : > { %5604 = vmatprep.subr.bf16.mxu1 %v7535_v17  ;;  %v2198_v17 = vld [vmem:[#allocation16 + $0x98] sm:$0xff]  ;;  %v7073_v25 = vcombine.high %v2197_v53, %v2201_v16  ;;  %v7072_v52 = vcombine.low %v2197_v53, %v2201_v16  ;;  %v2241_v7 = vld [vmem:[#allocation16 + $0x1f0] sm:$0xff] }
 0x8e6   : > { %v7074_v37 = vcombine.low %v2198_v17, %v2202_v2  ;;  %v2245_v16 = vld [vmem:[#allocation16 + $0x210] sm:$0xff] }
 0x8e7   : > { %5441 = vmatpush1.bf16.msra.mxu0 %v7532_v26  ;;  %v7075_v26 = vcombine.high %v2198_v17, %v2202_v2  ;;  %v2246_v17 = vld [vmem:[#allocation16 + $0x218] sm:$0xff] }
 0x8e8   : > { %5605 = vmatpush1.bf16.msra.mxu1 %v7534_v27  ;;  %5442 = vmatprep.subr.bf16.mxu0 %v7541_v28  ;;  %v2205_v27 = vld [vmem:[#allocation16 + $0xd0] sm:$0xff]  ;;  %v2250_v2 = vld [vmem:[#allocation16 + $0x238] sm:$0xff] }
 0x8e9   : > { %5606 = vmatprep.subr.bf16.mxu1 %v7543_v30  ;;  %v2209_v28 = vld [vmem:[#allocation16 + $0xf0] sm:$0xff]  ;;  %v2206_v30 = vld [vmem:[#allocation16 + $0xd8] sm:$0xff] }
 0x8ea   : > { %v7081_v34 = vcombine.high %v2205_v27, %v2209_v28 }
 0x8eb   : > { %5443 = vmatpush1.bf16.msra.mxu0 %v7540_v29  ;;  %v7083_v29 = vcombine.high %v2206_v30, %v2210_v31 }
 0x8ec   : > { %5607 = vmatpush1.bf16.msra.mxu1 %v7542_v39  ;;  %5444 = vmatprep.subr.bf16.mxu0 %v7549_v41  ;;  %v2214_v39 = vld [vmem:[#allocation16 + $0x118] sm:$0xff] }
 0x8ed   : > { %5608 = vmatprep.subr.bf16.mxu1 %v7551_v42  ;;  %v2218_v41 = vld [vmem:[#allocation16 + $0x138] sm:$0xff]  ;;  %v7082_v42 = vcombine.low %v2206_v30, %v2210_v31 }
 0x8ee   : > { %v7091_v45 = vcombine.high %v2214_v39, %v2218_v41  ;;  %v2254_v30 = vld [vmem:[#allocation16 + $0x258] sm:$0xff] }
 0x8ef   : > { %5445 = vmatpush1.bf16.msra.mxu0 %v7548_v48  ;;  %v2222_v48 = vld [vmem:[#allocation16 + $0x158] sm:$0xff] }
 0x8f0   : > { %5609 = vmatpush1.bf16.msra.mxu1 %v7550_v51  ;;  %5446 = vmatprep.subr.bf16.mxu0 %v7557_v54  ;;  %v7088_v51 = vcombine.low %v2213_v35, %v2217_v22  ;;  %v7090_v54 = vcombine.low %v2214_v39, %v2218_v41  ;;  %v7099_v15 = vcombine.high %v2222_v48, %v2226_v50  ;;  %v2258_v31 = vld [vmem:[#allocation16 + $0x278] sm:$0xff]  ;;  %v2261_v35 = vld [vmem:[#allocation16 + $0x290] sm:$0xff] }
 0x8f1   : > { %5610 = vmatprep.subr.bf16.mxu1 %v7559_v56  ;;  %v7097_v56 = vcombine.high %v2221_v46, %v2225_v47  ;;  %v2265_v22 = vld [vmem:[#allocation16 + $0x2b0] sm:$0xff]  ;;  %v2262_v39 = vld [vmem:[#allocation16 + $0x298] sm:$0xff] }
 0x8f2   : > { %v2266_v41 = vld [vmem:[#allocation16 + $0x2b8] sm:$0xff]  ;;  %v2269_v46 = vld [vmem:[#allocation16 + $0x2d0] sm:$0xff] }
 0x8f3   : > { %5447 = vmatpush1.bf16.msra.mxu0 %v7556_v62  ;;  %v2234_v62 = vld [vmem:[#allocation16 + $0x1b8] sm:$0xff]  ;;  %v2273_v47 = vld [vmem:[#allocation16 + $0x2f0] sm:$0xff] }
 0x8f4   : > { %5611 = vmatpush1.bf16.msra.mxu1 %v7558_v1  ;;  %5621 = vmatprep.subr.bf16.mxu0 %v7057_v4  ;;  %v7098_v1 = vcombine.low %v2222_v48, %v2226_v50  ;;  %v7105_v4 = vcombine.high %v2229_v58, %v2233_v60  ;;  %v2270_v48 = vld [vmem:[#allocation16 + $0x2d8] sm:$0xff]  ;;  %v2277_v58 = vld [vmem:[#allocation16 + $0x310] sm:$0xff] }
 0x8f5   : > { %5785 = vmatprep.subr.bf16.mxu1 %v7059_v5  ;;  %v7107_v5 = vcombine.high %v2230_v61, %v2234_v62  ;;  %v2274_v50 = vld [vmem:[#allocation16 + $0x2f8] sm:$0xff]  ;;  %v2281_v60 = vld [vmem:[#allocation16 + $0x330] sm:$0xff] }
 0x8f6   : > { %5449 = vmatmul.mubr.bf16.vlgmr.msra.gmra.mrb[20].mxu0 %v9562_v12 }
 0x8f7   : > { %5613 = vmatmul.mubr.bf16.vlgmr.msra.gmra.mrb[24].mxu1 %v9562_v12  ;;  %5622 = vmatpush1.bf16.msra.mxu0 %v7056_v8  ;;  %v2238_v8 = vld [vmem:[#allocation16 + $0x1d8] sm:$0xff] }
 0x8f8   : > { %5653 = vmatprep.mubr.bf16.mxu0 %v9502_v57  ;;  %5786 = vmatpush1.bf16.msra.mxu1 %v7058_v33  ;;  %v7106_v33 = vcombine.low %v2230_v61, %v2234_v62  ;;  %v7115_v53 = vcombine.high %v2238_v8, %v2242_v9  ;;  %v2278_v61 = vld [vmem:[#allocation16 + $0x318] sm:$0xff] }
 0x8f9   : > { %5817 = vmatprep.mubr.bf16.mxu1 %v9502_v57  ;;  %5623 = vmatprep.subr.bf16.mxu0 %v7065_v14  ;;  %v7080_v57 = vcombine.low %v2205_v27, %v2209_v28  ;;  %v7113_v14 = vcombine.high %v2237_v19, %v2241_v7  ;;  %v2253_v27 = vld [vmem:[#allocation16 + $0x250] sm:$0xff]  ;;  %v2282_v62 = vld [vmem:[#allocation16 + $0x338] sm:$0xff] }
 0x8fa   : > { %5787 = vmatprep.subr.bf16.mxu1 %v7067_v18  ;;  %v2249_v18 = vld [vmem:[#allocation16 + $0x230] sm:$0xff] }
 0x8fb   : > { %5624 = vmatpush1.bf16.msra.mxu0 %v7064_v3  ;;  %v7112_v3 = vcombine.low %v2237_v19, %v2241_v7  ;;  %v2257_v28 = vld [vmem:[#allocation16 + $0x270] sm:$0xff] }
 0x8fc   : > { %5788 = vmatpush1.bf16.msra.mxu1 %v7066_v20  ;;  %5625 = vmatprep.subr.bf16.mxu0 %v7073_v25  ;;  %v7114_v20 = vcombine.low %v2238_v8, %v2242_v9  ;;  %v7121_v25 = vcombine.high %v2245_v16, %v2249_v18  ;;  %v2285_v19 = vld [vmem:[#allocation16 + $0x350] sm:$0xff]  ;;  %v2286_v8 = vld [vmem:[#allocation16 + $0x358] sm:$0xff] }
 0x8fd   : > { %5789 = vmatprep.subr.bf16.mxu1 %v7075_v26  ;;  %v7123_v26 = vcombine.high %v2246_v17, %v2250_v2  ;;  %v2289_v7 = vld [vmem:[#allocation16 + $0x370] sm:$0xff]  ;;  %v2290_v9 = vld [vmem:[#allocation16 + $0x378] sm:$0xff] }
 0x8ff   : > { %5626 = vmatpush1.bf16.msra.mxu0 %v7072_v52  ;;  %v7120_v52 = vcombine.low %v2245_v16, %v2249_v18  ;;  %v2293_v16 = vld [vmem:[#allocation16 + $0x390] sm:$0xff] }
 0x900   : > { %5790 = vmatpush1.bf16.msra.mxu1 %v7074_v37  ;;  %5627 = vmatprep.subr.bf16.mxu0 %v7081_v34  ;;  %v7122_v37 = vcombine.low %v2246_v17, %v2250_v2  ;;  %v7129_v34 = vcombine.high %v2253_v27, %v2257_v28  ;;  %v2297_v18 = vld [vmem:[#allocation16 + $0x3b0] sm:$0xff]  ;;  %v2294_v17 = vld [vmem:[#allocation16 + $0x398] sm:$0xff] }
 0x901   : > { %5791 = vmatprep.subr.bf16.mxu1 %v7083_v29  ;;  %v7131_v29 = vcombine.high %v2254_v30, %v2258_v31  ;;  %v2298_v2 = vld [vmem:[#allocation16 + $0x3b8] sm:$0xff] }
 0x903   : > { %5628 = vmatpush1.bf16.msra.mxu0 %v7080_v57  ;;  %v7128_v57 = vcombine.low %v2253_v27, %v2257_v28  ;;  %v2301_v27 = vld [vmem:[#allocation16 + $0x3d0] sm:$0xff] }
 0x904   : > { %5792 = vmatpush1.bf16.msra.mxu1 %v7082_v42  ;;  %5629 = vmatprep.subr.bf16.mxu0 %v7089_v43  ;;  %v7130_v42 = vcombine.low %v2254_v30, %v2258_v31  ;;  %v7137_v43 = vcombine.high %v2261_v35, %v2265_v22  ;;  %v2305_v28 = vld [vmem:[#allocation16 + $0x3f0] sm:$0xff]  ;;  %v2302_v30 = vld [vmem:[#allocation16 + $0x3d8] sm:$0xff] }
 0x905   : > { %5793 = vmatprep.subr.bf16.mxu1 %v7091_v45  ;;  %v7139_v45 = vcombine.high %v2262_v39, %v2266_v41  ;;  %v2306_v31 = vld [vmem:[#allocation16 + $0x3f8] sm:$0xff] }
 0x907   : > { %5630 = vmatpush1.bf16.msra.mxu0 %v7088_v51  ;;  %v7136_v51 = vcombine.low %v2261_v35, %v2265_v22  ;;  %v2309_v35 = vld [vmem:[#allocation16 + $0x410] sm:$0xff] }
 0x908   : > { %5794 = vmatpush1.bf16.msra.mxu1 %v7090_v54  ;;  %5631 = vmatprep.subr.bf16.mxu0 %v7097_v56  ;;  %v7138_v54 = vcombine.low %v2262_v39, %v2266_v41  ;;  %v7145_v56 = vcombine.high %v2269_v46, %v2273_v47  ;;  %v2313_v22 = vld [vmem:[#allocation16 + $0x430] sm:$0xff]  ;;  %v2310_v39 = vld [vmem:[#allocation16 + $0x418] sm:$0xff] }
 0x909   : > { %5795 = vmatprep.subr.bf16.mxu1 %v7099_v15  ;;  %v7147_v15 = vcombine.high %v2270_v48, %v2274_v50  ;;  %v2314_v41 = vld [vmem:[#allocation16 + $0x438] sm:$0xff] }
 0x90b   : > { %5632 = vmatpush1.bf16.msra.mxu0 %v7096_v0  ;;  %v7144_v0 = vcombine.low %v2269_v46, %v2273_v47  ;;  %v2317_v46 = vld [vmem:[#allocation16 + $0x450] sm:$0xff] }
 0x90c   : > { %5796 = vmatpush1.bf16.msra.mxu1 %v7098_v1  ;;  %5633 = vmatprep.subr.bf16.mxu0 %v7105_v4  ;;  %v7146_v1 = vcombine.low %v2270_v48, %v2274_v50  ;;  %v7153_v4 = vcombine.high %v2277_v58, %v2281_v60  ;;  %v2321_v47 = vld [vmem:[#allocation16 + $0x470] sm:$0xff]  ;;  %v7184_v48 = vcombine.low %v2309_v35, %v2313_v22  ;;  %v2318_v50 = vld [vmem:[#allocation16 + $0x458] sm:$0xff] }
 0x90d   : > { %5797 = vmatprep.subr.bf16.mxu1 %v7107_v5  ;;  %v7155_v5 = vcombine.high %v2278_v61, %v2282_v62 }
 0x90f   : > { %5634 = vmatpush1.bf16.msra.mxu0 %v7104_v10  ;;  %v7152_v10 = vcombine.low %v2277_v58, %v2281_v60  ;;  %v2329_v58 = vld [vmem:[#allocation16 + $0x4b0] sm:$0xff] }
 0x910   : > { %5798 = vmatpush1.bf16.msra.mxu1 %v7106_v33  ;;  %5635 = vmatprep.subr.bf16.mxu0 %v7113_v14  ;;  %v7154_v33 = vcombine.low %v2278_v61, %v2282_v62  ;;  %v7161_v14 = vcombine.high %v2285_v19, %v2289_v7  ;;  %v2326_v61 = vld [vmem:[#allocation16 + $0x498] sm:$0xff] }
 0x911   : > { %5799 = vmatprep.subr.bf16.mxu1 %v7115_v53  ;;  %v7163_v53 = vcombine.high %v2286_v8, %v2290_v9  ;;  %v2330_v62 = vld [vmem:[#allocation16 + $0x4b8] sm:$0xff] }
 0x913   : > { %5636 = vmatpush1.bf16.msra.mxu0 %v7112_v3  ;;  %v7160_v3 = vcombine.low %v2285_v19, %v2289_v7  ;;  %v2333_v19 = vld [vmem:[#allocation16 + $0x4d0] sm:$0xff] }
 0x914   : > { %5800 = vmatpush1.bf16.msra.mxu1 %v7114_v20  ;;  %5637 = vmatprep.subr.bf16.mxu0 %v7121_v25  ;;  %v7162_v20 = vcombine.low %v2286_v8, %v2290_v9  ;;  %v7169_v25 = vcombine.high %v2293_v16, %v2297_v18  ;;  %v2337_v7 = vld [vmem:[#allocation16 + $0x4f0] sm:$0xff]  ;;  %v2334_v8 = vld [vmem:[#allocation16 + $0x4d8] sm:$0xff] }
 0x915   : > { %5801 = vmatprep.subr.bf16.mxu1 %v7123_v26  ;;  %v7171_v26 = vcombine.high %v2294_v17, %v2298_v2  ;;  %v2338_v9 = vld [vmem:[#allocation16 + $0x4f8] sm:$0xff] }
 0x917   : > { %5638 = vmatpush1.bf16.msra.mxu0 %v7120_v52  ;;  %v7168_v52 = vcombine.low %v2293_v16, %v2297_v18  ;;  %v2345_v16 = vld [vmem:[#allocation16 + $0x530] sm:$0xff]  ;;  %v2342_v18 = vld [vmem:[#allocation16 + $0x518] sm:$0xff] }
 0x918   : > { %5802 = vmatpush1.bf16.msra.mxu1 %v7122_v37  ;;  %5639 = vmatprep.subr.bf16.mxu0 %v7129_v34  ;;  %v7170_v37 = vcombine.low %v2294_v17, %v2298_v2  ;;  %v7177_v34 = vcombine.high %v2301_v27, %v2305_v28  ;;  %v2346_v17 = vld [vmem:[#allocation16 + $0x538] sm:$0xff]  ;;  %v7210_v2 = vcombine.low %v2334_v8, %v2338_v9 }
 0x919   : > { %5803 = vmatprep.subr.bf16.mxu1 %v7131_v29  ;;  %v7179_v29 = vcombine.high %v2302_v30, %v2306_v31 }
 0x91b   : > { %5640 = vmatpush1.bf16.msra.mxu0 %v7128_v57  ;;  %v7176_v57 = vcombine.low %v2301_v27, %v2305_v28  ;;  %v2350_v27 = vld [vmem:[#allocation16 + $0x558] sm:$0xff] }
 0x91c   : > { %5804 = vmatpush1.bf16.msra.mxu1 %v7130_v42  ;;  %5641 = vmatprep.subr.bf16.mxu0 %v7137_v43  ;;  %v7178_v42 = vcombine.low %v2302_v30, %v2306_v31  ;;  %v7185_v43 = vcombine.high %v2309_v35, %v2313_v22  ;;  %v2354_v28 = vld [vmem:[#allocation16 + $0x578] sm:$0xff]  ;;  %v7218_v31 = vcombine.low %v2342_v18, %v2346_v17 }
 0x91d   : > { %5805 = vmatprep.subr.bf16.mxu1 %v7139_v45  ;;  %v7187_v45 = vcombine.high %v2310_v39, %v2314_v41  ;;  %v2358_v35 = vld [vmem:[#allocation16 + $0x598] sm:$0xff] }
 0x91e   : > { %v2362_v22 = vld [vmem:[#allocation16 + $0x5b8] sm:$0xff] }
 0x91f   : > { %5642 = vmatpush1.bf16.msra.mxu0 %v7136_v51  ;;  %v2322_v51 = vld [vmem:[#allocation16 + $0x478] sm:$0xff] }
 0x920   : > { %5806 = vmatpush1.bf16.msra.mxu1 %v7138_v54  ;;  %5643 = vmatprep.subr.bf16.mxu0 %v7145_v56  ;;  %v7186_v54 = vcombine.low %v2310_v39, %v2314_v41  ;;  %v7193_v56 = vcombine.high %v2317_v46, %v2321_v47  ;;  %v7195_v60 = vcombine.high %v2318_v50, %v2322_v51 }
 0x921   : > { %5807 = vmatprep.subr.bf16.mxu1 %v7147_v15  ;;  %v2325_v15 = vld [vmem:[#allocation16 + $0x490] sm:$0xff]  ;;  %v7226_v41 = vcombine.low %v2350_v27, %v2354_v28 }
 0x923   : > { %5644 = vmatpush1.bf16.msra.mxu0 %v7144_v0  ;;  %v7192_v0 = vcombine.low %v2317_v46, %v2321_v47  ;;  %v2366_v46 = vld [vmem:[#allocation16 + $0x5d8] sm:$0xff] }
 0x924   : > { %5808 = vmatpush1.bf16.msra.mxu1 %v7146_v1  ;;  %5645 = vmatprep.subr.bf16.mxu0 %v7153_v4  ;;  %v7194_v1 = vcombine.low %v2318_v50, %v2322_v51  ;;  %v7201_v4 = vcombine.high %v2325_v15, %v2329_v58  ;;  %v2370_v47 = vld [vmem:[#allocation16 + $0x5f8] sm:$0xff]  ;;  %v7234_v50 = vcombine.low %v2358_v35, %v2362_v22 }
 0x925   : > { %5809 = vmatprep.subr.bf16.mxu1 %v7155_v5  ;;  %v7203_v5 = vcombine.high %v2326_v61, %v2330_v62 }
 0x927   : > { %5646 = vmatpush1.bf16.msra.mxu0 %v7152_v10  ;;  %v7200_v10 = vcombine.low %v2325_v15, %v2329_v58  ;;  %v2377_v15 = vld [vmem:[#allocation16 + $0x630] sm:$0xff]  ;;  %v2374_v58 = vld [vmem:[#allocation16 + $0x618] sm:$0xff] }
 0x928   : > { %5810 = vmatpush1.bf16.msra.mxu1 %v7154_v33  ;;  %5647 = vmatprep.subr.bf16.mxu0 %v7161_v14  ;;  %v7209_v33 = vcombine.high %v2333_v19, %v2337_v7  ;;  %v7211_v14 = vcombine.high %v2334_v8, %v2338_v9 }
 0x929   : > { %5811 = vmatprep.subr.bf16.mxu1 %v7163_v53  ;;  %v2341_v53 = vld [vmem:[#allocation16 + $0x510] sm:$0xff] }
 0x92a   : > { %v7216_v30 = vcombine.low %v2341_v53, %v2345_v16 }
 0x92b   : > { %5648 = vmatpush1.bf16.msra.mxu0 %v7160_v3  ;;  %v7217_v3 = vcombine.high %v2341_v53, %v2345_v16  ;;  %v2390_v53 = vld [vmem:[#allocation16 + $0x698] sm:$0xff] }
 0x92c   : > { %5812 = vmatpush1.bf16.msra.mxu1 %v7162_v20  ;;  %5649 = vmatprep.subr.bf16.mxu0 %v7169_v25  ;;  %v7219_v20 = vcombine.high %v2342_v18, %v2346_v17  ;;  %v2349_v25 = vld [vmem:[#allocation16 + $0x550] sm:$0xff]  ;;  %v2394_v16 = vld [vmem:[#allocation16 + $0x6b8] sm:$0xff] }
 0x92d   : > { %5813 = vmatprep.subr.bf16.mxu1 %v7171_v26  ;;  %v2353_v26 = vld [vmem:[#allocation16 + $0x570] sm:$0xff] }
 0x92e   : > { %v7224_v39 = vcombine.low %v2349_v25, %v2353_v26 }
 0x92f   : > { %5650 = vmatpush1.bf16.msra.mxu0 %v7168_v52  ;;  %v7225_v52 = vcombine.high %v2349_v25, %v2353_v26  ;;  %v2398_v25 = vld [vmem:[#allocation16 + $0x6d8] sm:$0xff] }
 0x930   : > { %5814 = vmatpush1.bf16.msra.mxu1 %v7170_v37  ;;  %5651 = vmatprep.subr.bf16.mxu0 %v7177_v34  ;;  %v7227_v37 = vcombine.high %v2350_v27, %v2354_v28  ;;  %v2357_v34 = vld [vmem:[#allocation16 + $0x590] sm:$0xff]  ;;  %v2402_v26 = vld [vmem:[#allocation16 + $0x6f8] sm:$0xff]  ;;  %v7266_v28 = vcombine.low %v2390_v53, %v2394_v16 }
 0x931   : > { %5815 = vmatprep.subr.bf16.mxu1 %v7179_v29  ;;  %v2361_v29 = vld [vmem:[#allocation16 + $0x5b0] sm:$0xff] }
 0x933   : > { %5652 = vmatpush1.bf16.msra.mxu0 %v7176_v57  ;;  %v7233_v57 = vcombine.high %v2357_v34, %v2361_v29 }
 0x934   : > { %5816 = vmatpush1.bf16.msra.mxu1 %v7178_v42  ;;  %5662 = vmatprep.subr.bf16.mxu0 %v7185_v43  ;;  %v7235_v42 = vcombine.high %v2358_v35, %v2362_v22  ;;  %v2365_v43 = vld [vmem:[#allocation16 + $0x5d0] sm:$0xff]  ;;  %v7274_v22 = vcombine.low %v2398_v25, %v2402_v26 }
 0x935   : > { %5826 = vmatprep.subr.bf16.mxu1 %v7187_v45  ;;  %v2369_v45 = vld [vmem:[#allocation16 + $0x5f0] sm:$0xff] }
 0x936   : > { %5654 = vmatmul.mubr.bf16.vlgmr.msra.gmra.mrb[24].mxu0 %v9504_v13  ;;  %v7241_v51 = vcombine.high %v2365_v43, %v2369_v45 }
 0x937   : > { %5818 = vmatmul.mubr.bf16.vlgmr.msra.gmra.mrb[28].mxu1 %v9504_v13  ;;  %5663 = vmatpush1.bf16.msra.mxu0 %v7184_v48  ;;  %v7202_v13 = vcombine.low %v2326_v61, %v2330_v62  ;;  %v7232_v48 = vcombine.low %v2357_v34, %v2361_v29  ;;  %v7240_v61 = vcombine.low %v2365_v43, %v2369_v45  ;;  %v2406_v34 = vld [vmem:[#allocation16 + $0x718] sm:$0xff] }
 0x938   : > { %5694 = vmatprep.mubr.bf16.mxu0 %v9508_v63  ;;  %5827 = vmatpush1.bf16.msra.mxu1 %v7186_v54  ;;  %v7243_v54 = vcombine.high %v2366_v46, %v2370_v47  ;;  %v7242_v62 = vcombine.low %v2366_v46, %v2370_v47  ;;  %v2410_v29 = vld [vmem:[#allocation16 + $0x738] sm:$0xff] }
 0x939   : > { %5858 = vmatprep.mubr.bf16.mxu1 %v9508_v63  ;;  %5664 = vmatprep.subr.bf16.mxu0 %v7193_v56  ;;  %v7208_v63 = vcombine.low %v2333_v19, %v2337_v7  ;;  %v2373_v56 = vld [vmem:[#allocation16 + $0x610] sm:$0xff]  ;;  %v2382_v19 = vld [vmem:[#allocation16 + $0x658] sm:$0xff]  ;;  %v7282_v47 = vcombine.low %v2406_v34, %v2410_v29 }
 0x93a   : > { %5828 = vmatprep.subr.bf16.mxu1 %v7195_v60  ;;  %v2378_v60 = vld [vmem:[#allocation16 + $0x638] sm:$0xff]  ;;  %v7248_v8 = vcombine.low %v2373_v56, %v2377_v15 }
 0x93b   : > { %5665 = vmatpush1.bf16.msra.mxu0 %v7192_v0  ;;  %v7249_v0 = vcombine.high %v2373_v56, %v2377_v15  ;;  %v2386_v7 = vld [vmem:[#allocation16 + $0x678] sm:$0xff]  ;;  %v7250_v9 = vcombine.low %v2374_v58, %v2378_v60 }
 0x93c   : > { %5829 = vmatpush1.bf16.msra.mxu1 %v7194_v1  ;;  %5666 = vmatprep.subr.bf16.mxu0 %v7201_v4  ;;  %v7251_v1 = vcombine.high %v2374_v58, %v2378_v60  ;;  %v2381_v4 = vld [vmem:[#allocation16 + $0x650] sm:$0xff]  ;;  %v7258_v17 = vcombine.low %v2382_v19, %v2386_v7  ;;  %v2414_v43 = vld [vmem:[#allocation16 + $0x758] sm:$0xff] }
 0x93d   : > { %5830 = vmatprep.subr.bf16.mxu1 %v7203_v5  ;;  %v2385_v5 = vld [vmem:[#allocation16 + $0x670] sm:$0xff]  ;;  %v2418_v45 = vld [vmem:[#allocation16 + $0x778] sm:$0xff] }
 0x93e   : > { %v7256_v18 = vcombine.low %v2381_v4, %v2385_v5  ;;  %v2422_v56 = vld [vmem:[#allocation16 + $0x798] sm:$0xff]  ;;  %v7290_v60 = vcombine.low %v2414_v43, %v2418_v45 }
 0x93f   : > { %5667 = vmatpush1.bf16.msra.mxu0 %v7200_v10  ;;  %v7257_v10 = vcombine.high %v2381_v4, %v2385_v5  ;;  %v2426_v15 = vld [vmem:[#allocation16 + $0x7b8] sm:$0xff] }
 0x940   : > { %5831 = vmatpush1.bf16.msra.mxu1 %v7202_v13  ;;  %5668 = vmatprep.subr.bf16.mxu0 %v7209_v33  ;;  %v7259_v13 = vcombine.high %v2382_v19, %v2386_v7  ;;  %v2389_v33 = vld [vmem:[#allocation16 + $0x690] sm:$0xff]  ;;  %v2430_v4 = vld [vmem:[#allocation16 + $0x7d8] sm:$0xff]  ;;  %v7298_v7 = vcombine.low %v2422_v56, %v2426_v15 }
 0x941   : > { %5832 = vmatprep.subr.bf16.mxu1 %v7211_v14  ;;  %v2393_v14 = vld [vmem:[#allocation16 + $0x6b0] sm:$0xff]  ;;  %v2434_v5 = vld [vmem:[#allocation16 + $0x7f8] sm:$0xff] }
 0x942   : > { %v7264_v27 = vcombine.low %v2389_v33, %v2393_v14 }
 0x943   : > { %5669 = vmatpush1.bf16.msra.mxu0 %v7208_v63  ;;  %v7265_v63 = vcombine.high %v2389_v33, %v2393_v14  ;;  %v2438_v33 = vld [vmem:[#allocation16 + $0x818] sm:$0xff] }
 0x944   : > { %5833 = vmatpush1.bf16.msra.mxu1 %v7210_v2  ;;  %5670 = vmatprep.subr.bf16.mxu0 %v7217_v3  ;;  %v7267_v2 = vcombine.high %v2390_v53, %v2394_v16  ;;  %v2397_v3 = vld [vmem:[#allocation16 + $0x6d0] sm:$0xff]  ;;  %v2442_v14 = vld [vmem:[#allocation16 + $0x838] sm:$0xff]  ;;  %v7306_v16 = vcombine.low %v2430_v4, %v2434_v5 }
 0x945   : > { %5834 = vmatprep.subr.bf16.mxu1 %v7219_v20  ;;  %v2401_v20 = vld [vmem:[#allocation16 + $0x6f0] sm:$0xff] }
 0x946   : > { %v7272_v35 = vcombine.low %v2397_v3, %v2401_v20 }
 0x947   : > { %5671 = vmatpush1.bf16.msra.mxu0 %v7216_v30  ;;  %v7273_v30 = vcombine.high %v2397_v3, %v2401_v20  ;;  %v2446_v20 = vld [vmem:[#allocation16 + $0x858] sm:$0xff] }
 0x948   : > { %5835 = vmatpush1.bf16.msra.mxu1 %v7218_v31  ;;  %5672 = vmatprep.subr.bf16.mxu0 %v7225_v52  ;;  %v7275_v31 = vcombine.high %v2398_v25, %v2402_v26  ;;  %v2405_v52 = vld [vmem:[#allocation16 + $0x710] sm:$0xff]  ;;  %v2450_v25 = vld [vmem:[#allocation16 + $0x878] sm:$0xff]  ;;  %v7314_v26 = vcombine.low %v2438_v33, %v2442_v14 }
 0x949   : > { %5836 = vmatprep.subr.bf16.mxu1 %v7227_v37  ;;  %v2409_v37 = vld [vmem:[#allocation16 + $0x730] sm:$0xff] }
 0x94a   : > { %v7280_v46 = vcombine.low %v2405_v52, %v2409_v37 }
 0x94b   : > { %5673 = vmatpush1.bf16.msra.mxu0 %v7224_v39  ;;  %v7281_v39 = vcombine.high %v2405_v52, %v2409_v37  ;;  %v2454_v52 = vld [vmem:[#allocation16 + $0x898] sm:$0xff] }
 0x94c   : > { %5837 = vmatpush1.bf16.msra.mxu1 %v7226_v41  ;;  %5674 = vmatprep.subr.bf16.mxu0 %v7233_v57  ;;  %v7283_v41 = vcombine.high %v2406_v34, %v2410_v29  ;;  %v2413_v57 = vld [vmem:[#allocation16 + $0x750] sm:$0xff]  ;;  %v2458_v37 = vld [vmem:[#allocation16 + $0x8b8] sm:$0xff]  ;;  %v7322_v29 = vcombine.low %v2446_v20, %v2450_v25 }
 0x94d   : > { %5838 = vmatprep.subr.bf16.mxu1 %v7235_v42  ;;  %v2417_v42 = vld [vmem:[#allocation16 + $0x770] sm:$0xff] }
 0x94e   : > { %v7288_v58 = vcombine.low %v2413_v57, %v2417_v42 }
 0x94f   : > { %5675 = vmatpush1.bf16.msra.mxu0 %v7232_v48  ;;  %v7289_v48 = vcombine.high %v2413_v57, %v2417_v42  ;;  %v2462_v57 = vld [vmem:[#allocation16 + $0x8d8] sm:$0xff] }
 0x950   : > { %5839 = vmatpush1.bf16.msra.mxu1 %v7234_v50  ;;  %5676 = vmatprep.subr.bf16.mxu0 %v7241_v51  ;;  %v7291_v50 = vcombine.high %v2414_v43, %v2418_v45  ;;  %v2421_v51 = vld [vmem:[#allocation16 + $0x790] sm:$0xff]  ;;  %v2466_v42 = vld [vmem:[#allocation16 + $0x8f8] sm:$0xff] }
 0x951   : > { %5840 = vmatprep.subr.bf16.mxu1 %v7243_v54  ;;  %v2425_v54 = vld [vmem:[#allocation16 + $0x7b0] sm:$0xff] }
 0x952   : > { %v7296_v19 = vcombine.low %v2421_v51, %v2425_v54 }
 0x953   : > { %5677 = vmatpush1.bf16.msra.mxu0 %v7240_v61  ;;  %v7297_v61 = vcombine.high %v2421_v51, %v2425_v54  ;;  %v2474_v51 = vld [vmem:[#allocation16 + $0x938] sm:$0xff]  ;;  %v7338_v54 = vcombine.low %v2462_v57, %v2466_v42 }
 0x954   : > { %5841 = vmatpush1.bf16.msra.mxu1 %v7242_v62  ;;  %5678 = vmatprep.subr.bf16.mxu0 %v7249_v0  ;;  %v7299_v62 = vcombine.high %v2422_v56, %v2426_v15  ;;  %v2429_v0 = vld [vmem:[#allocation16 + $0x7d0] sm:$0xff] }
 0x955   : > { %5842 = vmatprep.subr.bf16.mxu1 %v7251_v1  ;;  %v2433_v1 = vld [vmem:[#allocation16 + $0x7f0] sm:$0xff] }
 0x956   : > { %v7304_v53 = vcombine.low %v2429_v0, %v2433_v1 }
 0x957   : > { %5679 = vmatpush1.bf16.msra.mxu0 %v7248_v8  ;;  %v7305_v8 = vcombine.high %v2429_v0, %v2433_v1 }
 0x958   : > { %5843 = vmatpush1.bf16.msra.mxu1 %v7250_v9  ;;  %5680 = vmatprep.subr.bf16.mxu0 %v7257_v10  ;;  %v7307_v9 = vcombine.high %v2430_v4, %v2434_v5  ;;  %v2437_v10 = vld [vmem:[#allocation16 + $0x810] sm:$0xff] }
 0x959   : > { %5844 = vmatprep.subr.bf16.mxu1 %v7259_v13  ;;  %v2441_v13 = vld [vmem:[#allocation16 + $0x830] sm:$0xff] }
 0x95a   : > { %v7312_v3 = vcombine.low %v2437_v10, %v2441_v13 }
 0x95b   : > { %5681 = vmatpush1.bf16.msra.mxu0 %v7256_v18  ;;  %v7313_v18 = vcombine.high %v2437_v10, %v2441_v13 }
 0x95c   : > { %5845 = vmatpush1.bf16.msra.mxu1 %v7258_v17  ;;  %5682 = vmatprep.subr.bf16.mxu0 %v7265_v63  ;;  %v7315_v17 = vcombine.high %v2438_v33, %v2442_v14  ;;  %v2445_v63 = vld [vmem:[#allocation16 + $0x850] sm:$0xff] }
 0x95d   : > { %5846 = vmatprep.subr.bf16.mxu1 %v7267_v2  ;;  %v2449_v2 = vld [vmem:[#allocation16 + $0x870] sm:$0xff] }
 0x95e   : > { %v7320_v34 = vcombine.low %v2445_v63, %v2449_v2 }
 0x95f   : > { %5683 = vmatpush1.bf16.msra.mxu0 %v7264_v27  ;;  %v7321_v27 = vcombine.high %v2445_v63, %v2449_v2 }
 0x960   : > { %5847 = vmatpush1.bf16.msra.mxu1 %v7266_v28  ;;  %5684 = vmatprep.subr.bf16.mxu0 %v7273_v30  ;;  %v2453_v28 = vld [vmem:[#allocation16 + $0x890] sm:$0xff] }
 0x961   : > { %5848 = vmatprep.subr.bf16.mxu1 %v7275_v31  ;;  %v2457_v30 = vld [vmem:[#allocation16 + $0x8b0] sm:$0xff]  ;;  %v7323_v31 = vcombine.high %v2446_v20, %v2450_v25 }
 0x962   : > { %v7328_v43 = vcombine.low %v2453_v28, %v2457_v30  ;;  %v2501_v25 = vld [vmem:[#allocation16 + $0xa10] sm:$0xff] }
 0x963   : > { %5685 = vmatpush1.bf16.msra.mxu0 %v7272_v35  ;;  %v7329_v35 = vcombine.high %v2453_v28, %v2457_v30  ;;  %v2506_v28 = vld [vmem:[#allocation16 + $0xa38] sm:$0xff] }
 0x964   : > { %5849 = vmatpush1.bf16.msra.mxu1 %v7274_v22  ;;  %5686 = vmatprep.subr.bf16.mxu0 %v7281_v39  ;;  %v7331_v22 = vcombine.high %v2454_v52, %v2458_v37  ;;  %v2461_v39 = vld [vmem:[#allocation16 + $0x8d0] sm:$0xff] }
 0x965   : > { %5850 = vmatprep.subr.bf16.mxu1 %v7283_v41  ;;  %v2465_v41 = vld [vmem:[#allocation16 + $0x8f0] sm:$0xff] }
 0x966   : > { %v7337_v45 = vcombine.high %v2461_v39, %v2465_v41 }
 0x967   : > { %5687 = vmatpush1.bf16.msra.mxu0 %v7280_v46  ;;  %v7339_v46 = vcombine.high %v2462_v57, %v2466_v42 }
 0x968   : > { %5851 = vmatpush1.bf16.msra.mxu1 %v7282_v47  ;;  %5688 = vmatprep.subr.bf16.mxu0 %v7289_v48  ;;  %v2469_v47 = vld [vmem:[#allocation16 + $0x910] sm:$0xff] }
 0x969   : > { %5852 = vmatprep.subr.bf16.mxu1 %v7291_v50  ;;  %v2473_v48 = vld [vmem:[#allocation16 + $0x930] sm:$0xff]  ;;  %v2470_v50 = vld [vmem:[#allocation16 + $0x918] sm:$0xff] }
 0x96a   : > { %v7345_v56 = vcombine.high %v2469_v47, %v2473_v48  ;;  %v7347_v15 = vcombine.high %v2470_v50, %v2474_v51  ;;  %v7344_v0 = vcombine.low %v2469_v47, %v2473_v48  ;;  %v7346_v1 = vcombine.low %v2470_v50, %v2474_v51 }
 0x96b   : > { %5689 = vmatpush1.bf16.msra.mxu0 %v7288_v58  ;;  %v2477_v58 = vld [vmem:[#allocation16 + $0x950] sm:$0xff] }
 0x96c   : > { %5853 = vmatpush1.bf16.msra.mxu1 %v7290_v60  ;;  %5690 = vmatprep.subr.bf16.mxu0 %v7297_v61  ;;  %v2481_v60 = vld [vmem:[#allocation16 + $0x970] sm:$0xff]  ;;  %v2478_v61 = vld [vmem:[#allocation16 + $0x958] sm:$0xff] }
 0x96d   : > { %5854 = vmatprep.subr.bf16.mxu1 %v7299_v62  ;;  %v2482_v62 = vld [vmem:[#allocation16 + $0x978] sm:$0xff]  ;;  %v7353_v4 = vcombine.high %v2477_v58, %v2481_v60  ;;  %v7352_v10 = vcombine.low %v2477_v58, %v2481_v60 }
 0x96e   : > { %v7355_v5 = vcombine.high %v2478_v61, %v2482_v62  ;;  %v7354_v13 = vcombine.low %v2478_v61, %v2482_v62 }
 0x96f   : > { %5691 = vmatpush1.bf16.msra.mxu0 %v7296_v19  ;;  %v2485_v19 = vld [vmem:[#allocation16 + $0x990] sm:$0xff] }
 0x970   : > { %5855 = vmatpush1.bf16.msra.mxu1 %v7298_v7  ;;  %5692 = vmatprep.subr.bf16.mxu0 %v7305_v8  ;;  %v2489_v7 = vld [vmem:[#allocation16 + $0x9b0] sm:$0xff]  ;;  %v2486_v8 = vld [vmem:[#allocation16 + $0x998] sm:$0xff] }
 0x971   : > { %5856 = vmatprep.subr.bf16.mxu1 %v7307_v9  ;;  %v2490_v9 = vld [vmem:[#allocation16 + $0x9b8] sm:$0xff]  ;;  %v7361_v33 = vcombine.high %v2485_v19, %v2489_v7  ;;  %v7360_v63 = vcombine.low %v2485_v19, %v2489_v7 }
 0x972   : > { %v7363_v14 = vcombine.high %v2486_v8, %v2490_v9  ;;  %v7362_v2 = vcombine.low %v2486_v8, %v2490_v9 }
 0x973   : > { %5693 = vmatpush1.bf16.msra.mxu0 %v7304_v53  ;;  %v2493_v53 = vld [vmem:[#allocation16 + $0x9d0] sm:$0xff] }
 0x974   : > { %5857 = vmatpush1.bf16.msra.mxu1 %v7306_v16  ;;  %5703 = vmatprep.subr.bf16.mxu0 %v7313_v18  ;;  %v2497_v16 = vld [vmem:[#allocation16 + $0x9f0] sm:$0xff]  ;;  %v2494_v18 = vld [vmem:[#allocation16 + $0x9d8] sm:$0xff] }
 0x975   : > { %5867 = vmatprep.subr.bf16.mxu1 %v7315_v17  ;;  %v2498_v17 = vld [vmem:[#allocation16 + $0x9f8] sm:$0xff]  ;;  %v7368_v30 = vcombine.low %v2493_v53, %v2497_v16 }
 0x976   : > { %5695 = vmatmul.mubr.bf16.vlgmr.msra.gmra.mrb[24].mxu0 %v9532_v38  ;;  %v7371_v20 = vcombine.high %v2494_v18, %v2498_v17 }
 0x977   : > { %5859 = vmatmul.mubr.bf16.vlgmr.msra.gmra.mrb[28].mxu1 %v9532_v38  ;;  %5704 = vmatpush1.bf16.msra.mxu0 %v7312_v3  ;;  %v7330_v38 = vcombine.low %v2454_v52, %v2458_v37  ;;  %v7369_v3 = vcombine.high %v2493_v53, %v2497_v16 }
 0x978   : > { %5735 = vmatprep.mubr.bf16.mxu0 %v9534_v40  ;;  %5868 = vmatpush1.bf16.msra.mxu1 %v7314_v26  ;;  %v2505_v26 = vld [vmem:[#allocation16 + $0xa30] sm:$0xff] }
 0x979   : > { %5899 = vmatprep.mubr.bf16.mxu1 %v9534_v40  ;;  %5705 = vmatprep.subr.bf16.mxu0 %v7321_v27  ;;  %v7336_v40 = vcombine.low %v2461_v39, %v2465_v41  ;;  %v2502_v27 = vld [vmem:[#allocation16 + $0xa18] sm:$0xff]  ;;  %v7377_v52 = vcombine.high %v2501_v25, %v2505_v26  ;;  %v7376_v39 = vcombine.low %v2501_v25, %v2505_v26 }
 0x97a   : > { %5869 = vmatprep.subr.bf16.mxu1 %v7323_v31  ;;  %v7370_v31 = vcombine.low %v2494_v18, %v2498_v17  ;;  %v7379_v37 = vcombine.high %v2502_v27, %v2506_v28  ;;  %v7378_v41 = vcombine.low %v2502_v27, %v2506_v28 }
 0x97b   : > { %5706 = vmatpush1.bf16.msra.mxu0 %v7320_v34  ;;  %v2509_v34 = vld [vmem:[#allocation16 + $0xa50] sm:$0xff] }
 0x97c   : > { %5870 = vmatpush1.bf16.msra.mxu1 %v7322_v29  ;;  %5707 = vmatprep.subr.bf16.mxu0 %v7329_v35  ;;  %v2513_v29 = vld [vmem:[#allocation16 + $0xa70] sm:$0xff]  ;;  %v2510_v35 = vld [vmem:[#allocation16 + $0xa58] sm:$0xff] }
 0x97d   : > { %5871 = vmatprep.subr.bf16.mxu1 %v7331_v22  ;;  %v2514_v22 = vld [vmem:[#allocation16 + $0xa78] sm:$0xff]  ;;  %v7385_v57 = vcombine.high %v2509_v34, %v2513_v29  ;;  %v7384_v47 = vcombine.low %v2509_v34, %v2513_v29 }
 0x97e   : > { %v7387_v42 = vcombine.high %v2510_v35, %v2514_v22  ;;  %v7386_v48 = vcombine.low %v2510_v35, %v2514_v22 }
 0x97f   : > { %5708 = vmatpush1.bf16.msra.mxu0 %v7328_v43  ;;  %v2517_v43 = vld [vmem:[#allocation16 + $0xa90] sm:$0xff] }
 0x980   : > { %5872 = vmatpush1.bf16.msra.mxu1 %v7330_v38  ;;  %5709 = vmatprep.subr.bf16.mxu0 %v7337_v45  ;;  %v2521_v38 = vld [vmem:[#allocation16 + $0xab0] sm:$0xff]  ;;  %v2518_v45 = vld [vmem:[#allocation16 + $0xa98] sm:$0xff] }
 0x981   : > { %5873 = vmatprep.subr.bf16.mxu1 %v7339_v46  ;;  %v2522_v46 = vld [vmem:[#allocation16 + $0xab8] sm:$0xff]  ;;  %v7393_v50 = vcombine.high %v2517_v43, %v2521_v38  ;;  %v7392_v58 = vcombine.low %v2517_v43, %v2521_v38 }
 0x982   : > { %v7395_v51 = vcombine.high %v2518_v45, %v2522_v46  ;;  %v7394_v60 = vcombine.low %v2518_v45, %v2522_v46 }
 0x983   : > { %5710 = vmatpush1.bf16.msra.mxu0 %v7336_v40  ;;  %v2525_v40 = vld [vmem:[#allocation16 + $0xad0] sm:$0xff] }
 0x984   : > { %5874 = vmatpush1.bf16.msra.mxu1 %v7338_v54  ;;  %5711 = vmatprep.subr.bf16.mxu0 %v7345_v56  ;;  %v2529_v54 = vld [vmem:[#allocation16 + $0xaf0] sm:$0xff]  ;;  %v2526_v56 = vld [vmem:[#allocation16 + $0xad8] sm:$0xff] }
 0x985   : > { %5875 = vmatprep.subr.bf16.mxu1 %v7347_v15  ;;  %v2530_v15 = vld [vmem:[#allocation16 + $0xaf8] sm:$0xff]  ;;  %v7401_v61 = vcombine.high %v2525_v40, %v2529_v54  ;;  %v7400_v19 = vcombine.low %v2525_v40, %v2529_v54 }
 0x986   : > { %v7403_v62 = vcombine.high %v2526_v56, %v2530_v15  ;;  %v7402_v7 = vcombine.low %v2526_v56, %v2530_v15  ;;  %v2578_v40 = vld [vmem:[#allocation16 + $0xc78] sm:$0xff]  ;;  %v2581_v15 = vld [vmem:[#allocation16 + $0xc90] sm:$0xff] }
 0x987   : > { %5712 = vmatpush1.bf16.msra.mxu0 %v7344_v0  ;;  %v2533_v0 = vld [vmem:[#allocation16 + $0xb10] sm:$0xff] }
 0x988   : > { %5876 = vmatpush1.bf16.msra.mxu1 %v7346_v1  ;;  %5713 = vmatprep.subr.bf16.mxu0 %v7353_v4  ;;  %v2537_v1 = vld [vmem:[#allocation16 + $0xb30] sm:$0xff]  ;;  %v2534_v4 = vld [vmem:[#allocation16 + $0xb18] sm:$0xff] }
 0x989   : > { %5877 = vmatprep.subr.bf16.mxu1 %v7355_v5  ;;  %v2538_v5 = vld [vmem:[#allocation16 + $0xb38] sm:$0xff]  ;;  %v7409_v8 = vcombine.high %v2533_v0, %v2537_v1  ;;  %v7408_v53 = vcombine.low %v2533_v0, %v2537_v1 }
 0x98a   : > { %v7411_v9 = vcombine.high %v2534_v4, %v2538_v5  ;;  %v7410_v16 = vcombine.low %v2534_v4, %v2538_v5 }
 0x98b   : > { %5714 = vmatpush1.bf16.msra.mxu0 %v7352_v10  ;;  %v2541_v10 = vld [vmem:[#allocation16 + $0xb50] sm:$0xff] }
 0x98c   : > { %5878 = vmatpush1.bf16.msra.mxu1 %v7354_v13  ;;  %5715 = vmatprep.subr.bf16.mxu0 %v7361_v33  ;;  %v2545_v13 = vld [vmem:[#allocation16 + $0xb70] sm:$0xff]  ;;  %v2542_v33 = vld [vmem:[#allocation16 + $0xb58] sm:$0xff] }
 0x98d   : > { %5879 = vmatprep.subr.bf16.mxu1 %v7363_v14  ;;  %v2546_v14 = vld [vmem:[#allocation16 + $0xb78] sm:$0xff]  ;;  %v7417_v18 = vcombine.high %v2541_v10, %v2545_v13  ;;  %v7416_v25 = vcombine.low %v2541_v10, %v2545_v13 }
 0x98e   : > { %v7419_v17 = vcombine.high %v2542_v33, %v2546_v14  ;;  %v7418_v26 = vcombine.low %v2542_v33, %v2546_v14  ;;  %v2597_v14 = vld [vmem:[#allocation16 + $0xd10] sm:$0xff] }
 0x98f   : > { %5716 = vmatpush1.bf16.msra.mxu0 %v7360_v63  ;;  %v2549_v63 = vld [vmem:[#allocation16 + $0xb90] sm:$0xff] }
 0x990   : > { %5880 = vmatpush1.bf16.msra.mxu1 %v7362_v2  ;;  %5717 = vmatprep.subr.bf16.mxu0 %v7369_v3  ;;  %v2553_v2 = vld [vmem:[#allocation16 + $0xbb0] sm:$0xff]  ;;  %v2550_v3 = vld [vmem:[#allocation16 + $0xb98] sm:$0xff] }
 0x991   : > { %5881 = vmatprep.subr.bf16.mxu1 %v7371_v20  ;;  %v2554_v20 = vld [vmem:[#allocation16 + $0xbb8] sm:$0xff]  ;;  %v7425_v27 = vcombine.high %v2549_v63, %v2553_v2  ;;  %v7424_v34 = vcombine.low %v2549_v63, %v2553_v2 }
 0x992   : > { %v7427_v28 = vcombine.high %v2550_v3, %v2554_v20  ;;  %v7426_v29 = vcombine.low %v2550_v3, %v2554_v20  ;;  %v2605_v3 = vld [vmem:[#allocation16 + $0xd50] sm:$0xff] }
 0x993   : > { %5718 = vmatpush1.bf16.msra.mxu0 %v7368_v30  ;;  %v2557_v30 = vld [vmem:[#allocation16 + $0xbd0] sm:$0xff] }
 0x994   : > { %5882 = vmatpush1.bf16.msra.mxu1 %v7370_v31  ;;  %5719 = vmatprep.subr.bf16.mxu0 %v7377_v52  ;;  %v2561_v31 = vld [vmem:[#allocation16 + $0xbf0] sm:$0xff]  ;;  %v2558_v52 = vld [vmem:[#allocation16 + $0xbd8] sm:$0xff] }
 0x995   : > { %5883 = vmatprep.subr.bf16.mxu1 %v7379_v37  ;;  %v2562_v37 = vld [vmem:[#allocation16 + $0xbf8] sm:$0xff]  ;;  %v7433_v35 = vcombine.high %v2557_v30, %v2561_v31  ;;  %v7432_v43 = vcombine.low %v2557_v30, %v2561_v31  ;;  %v2609_v20 = vld [vmem:[#allocation16 + $0xd70] sm:$0xff] }
 0x996   : > { %v7435_v22 = vcombine.high %v2558_v52, %v2562_v37  ;;  %v7434_v38 = vcombine.low %v2558_v52, %v2562_v37  ;;  %v7481_v30 = vcombine.high %v2605_v3, %v2609_v20  ;;  %v2613_v52 = vld [vmem:[#allocation16 + $0xd90] sm:$0xff] }
 0x997   : > { %5720 = vmatpush1.bf16.msra.mxu0 %v7376_v39  ;;  %v2565_v39 = vld [vmem:[#allocation16 + $0xc10] sm:$0xff] }
 0x998   : > { %5884 = vmatpush1.bf16.msra.mxu1 %v7378_v41  ;;  %5721 = vmatprep.subr.bf16.mxu0 %v7385_v57  ;;  %v2569_v41 = vld [vmem:[#allocation16 + $0xc30] sm:$0xff]  ;;  %v2566_v57 = vld [vmem:[#allocation16 + $0xc18] sm:$0xff] }
 0x999   : > { %5885 = vmatprep.subr.bf16.mxu1 %v7387_v42  ;;  %v2570_v42 = vld [vmem:[#allocation16 + $0xc38] sm:$0xff]  ;;  %v7441_v45 = vcombine.high %v2565_v39, %v2569_v41  ;;  %v2617_v37 = vld [vmem:[#allocation16 + $0xdb0] sm:$0xff] }
 0x99a   : > { %v7443_v46 = vcombine.high %v2566_v57, %v2570_v42  ;;  %v7442_v54 = vcombine.low %v2566_v57, %v2570_v42  ;;  %v2621_v42 = vld [vmem:[#allocation16 + $0xdd0] sm:$0xff] }
 0x99b   : > { %5722 = vmatpush1.bf16.msra.mxu0 %v7384_v47  ;;  %v2573_v47 = vld [vmem:[#allocation16 + $0xc50] sm:$0xff] }
 0x99c   : > { %5886 = vmatpush1.bf16.msra.mxu1 %v7386_v48  ;;  %5723 = vmatprep.subr.bf16.mxu0 %v7393_v50  ;;  %v2577_v48 = vld [vmem:[#allocation16 + $0xc70] sm:$0xff]  ;;  %v7440_v50 = vcombine.low %v2565_v39, %v2569_v41  ;;  %v7489_v39 = vcombine.high %v2613_v52, %v2617_v37 }
 0x99d   : > { %5887 = vmatprep.subr.bf16.mxu1 %v7395_v51  ;;  %v2574_v51 = vld [vmem:[#allocation16 + $0xc58] sm:$0xff]  ;;  %v7449_v56 = vcombine.high %v2573_v47, %v2577_v48  ;;  %v7448_v0 = vcombine.low %v2573_v47, %v2577_v48 }
 0x99e   : > { %v7450_v1 = vcombine.low %v2574_v51, %v2578_v40  ;;  %v2626_v47 = vld [vmem:[#allocation16 + $0xdf8] sm:$0xff] }
 0x99f   : > { %5724 = vmatpush1.bf16.msra.mxu0 %v7392_v58  ;;  %v2585_v58 = vld [vmem:[#allocation16 + $0xcb0] sm:$0xff] }
 0x9a0   : > { %5888 = vmatpush1.bf16.msra.mxu1 %v7394_v60  ;;  %5725 = vmatprep.subr.bf16.mxu0 %v7401_v61  ;;  %v7451_v60 = vcombine.high %v2574_v51, %v2578_v40  ;;  %v2582_v61 = vld [vmem:[#allocation16 + $0xc98] sm:$0xff]  ;;  %v7457_v4 = vcombine.high %v2581_v15, %v2585_v58  ;;  %v7456_v10 = vcombine.low %v2581_v15, %v2585_v58 }
 0x9a1   : > { %5889 = vmatprep.subr.bf16.mxu1 %v7403_v62  ;;  %v2586_v62 = vld [vmem:[#allocation16 + $0xcb8] sm:$0xff]  ;;  %v7488_v51 = vcombine.low %v2613_v52, %v2617_v37 }
 0x9a2   : > { %v7459_v5 = vcombine.high %v2582_v61, %v2586_v62 }
 0x9a3   : > { %5726 = vmatpush1.bf16.msra.mxu0 %v7400_v19  ;;  %v2589_v19 = vld [vmem:[#allocation16 + $0xcd0] sm:$0xff] }
 0x9a4   : > { %5890 = vmatpush1.bf16.msra.mxu1 %v7402_v7  ;;  %5727 = vmatprep.subr.bf16.mxu0 %v7409_v8  ;;  %v2593_v7 = vld [vmem:[#allocation16 + $0xcf0] sm:$0xff]  ;;  %v2590_v8 = vld [vmem:[#allocation16 + $0xcd8] sm:$0xff] }
 0x9a5   : > { %5891 = vmatprep.subr.bf16.mxu1 %v7411_v9  ;;  %v2594_v9 = vld [vmem:[#allocation16 + $0xcf8] sm:$0xff]  ;;  %v7465_v13 = vcombine.high %v2589_v19, %v2593_v7 }
 0x9a6   : > { %v7467_v33 = vcombine.high %v2590_v8, %v2594_v9 }
 0x9a7   : > { %5728 = vmatpush1.bf16.msra.mxu0 %v7408_v53  ;;  %v2601_v53 = vld [vmem:[#allocation16 + $0xd30] sm:$0xff] }
 0x9a8   : > { %5892 = vmatpush1.bf16.msra.mxu1 %v7410_v16  ;;  %5729 = vmatprep.subr.bf16.mxu0 %v7417_v18  ;;  %v2598_v16 = vld [vmem:[#allocation16 + $0xd18] sm:$0xff]  ;;  %v7473_v63 = vcombine.high %v2597_v14, %v2601_v53 }
 0x9a9   : > { %5893 = vmatprep.subr.bf16.mxu1 %v7419_v17  ;;  %v2602_v18 = vld [vmem:[#allocation16 + $0xd38] sm:$0xff]  ;;  %v7466_v17 = vcombine.low %v2590_v8, %v2594_v9  ;;  %v2637_v8 = vld [vmem:[#allocation16 + $0xe50] sm:$0xff] }
 0x9aa   : > { %v7475_v2 = vcombine.high %v2598_v16, %v2602_v18  ;;  %v2641_v9 = vld [vmem:[#allocation16 + $0xe70] sm:$0xff] }
 0x9ab   : > { %5730 = vmatpush1.bf16.msra.mxu0 %v7416_v25  ;;  %v2606_v25 = vld [vmem:[#allocation16 + $0xd58] sm:$0xff] }
 0x9ac   : > { %5894 = vmatpush1.bf16.msra.mxu1 %v7418_v26  ;;  %5731 = vmatprep.subr.bf16.mxu0 %v7425_v27  ;;  %v2610_v26 = vld [vmem:[#allocation16 + $0xd78] sm:$0xff]  ;;  %v7472_v27 = vcombine.low %v2597_v14, %v2601_v53  ;;  %v7513_v14 = vcombine.high %v2637_v8, %v2641_v9 }
 0x9ad   : > { %5895 = vmatprep.subr.bf16.mxu1 %v7427_v28  ;;  %v7474_v28 = vcombine.low %v2598_v16, %v2602_v18  ;;  %v7483_v31 = vcombine.high %v2606_v25, %v2610_v26  ;;  %v2645_v16 = vld [vmem:[#allocation16 + $0xe90] sm:$0xff] }
 0x9ae   : > { %v2649_v18 = vld [vmem:[#allocation16 + $0xeb0] sm:$0xff] }
 0x9af   : > { %5732 = vmatpush1.bf16.msra.mxu0 %v7424_v34  ;;  %v2614_v34 = vld [vmem:[#allocation16 + $0xd98] sm:$0xff] }
 0x9b0   : > { %5896 = vmatpush1.bf16.msra.mxu1 %v7426_v29  ;;  %5733 = vmatprep.subr.bf16.mxu0 %v7433_v35  ;;  %v2618_v29 = vld [vmem:[#allocation16 + $0xdb8] sm:$0xff]  ;;  %v7480_v35 = vcombine.low %v2605_v3, %v2609_v20  ;;  %v7521_v3 = vcombine.high %v2645_v16, %v2649_v18 }
 0x9b1   : > { %5897 = vmatprep.subr.bf16.mxu1 %v7435_v22  ;;  %v7482_v22 = vcombine.low %v2606_v25, %v2610_v26  ;;  %v7491_v57 = vcombine.high %v2614_v34, %v2618_v29  ;;  %v2653_v25 = vld [vmem:[#allocation16 + $0xed0] sm:$0xff] }
 0x9b2   : > { %v2657_v26 = vld [vmem:[#allocation16 + $0xef0] sm:$0xff] }
 0x9b3   : > { %5734 = vmatpush1.bf16.msra.mxu0 %v7432_v43  ;;  %v2625_v43 = vld [vmem:[#allocation16 + $0xdf0] sm:$0xff]  ;;  %v7529_v52 = vcombine.high %v2653_v25, %v2657_v26 }
 0x9b4   : > { %5898 = vmatpush1.bf16.msra.mxu1 %v7434_v38  ;;  %5744 = vmatprep.subr.bf16.mxu0 %v7441_v45  ;;  %v7497_v15 = vcombine.high %v2621_v42, %v2625_v43 }
 0x9b5   : > { %5908 = vmatprep.subr.bf16.mxu1 %v7443_v46  ;;  %v2622_v46 = vld [vmem:[#allocation16 + $0xdd8] sm:$0xff] }
 0x9b6   : > { %5736 = vmatmul.mubr.bf16.vlgmr.msra.gmra.mrb[24].mxu0 %v9550_v6 }
 0x9b7   : > { %5900 = vmatmul.mubr.bf16.vlgmr.msra.gmra.mrb[28].mxu1 %v9550_v6  ;;  %5745 = vmatpush1.bf16.msra.mxu0 %v7440_v50  ;;  %v7458_v6 = vcombine.low %v2582_v61, %v2586_v62  ;;  %v2629_v61 = vld [vmem:[#allocation16 + $0xe10] sm:$0xff] }
 0x9b8   : > { %5776 = vmatprep.mubr.bf16.mxu0 %v9552_v23  ;;  %5909 = vmatpush1.bf16.msra.mxu1 %v7442_v54  ;;  %v2633_v62 = vld [vmem:[#allocation16 + $0xe30] sm:$0xff] }
 0x9b9   : > { %5940 = vmatprep.mubr.bf16.mxu1 %v9552_v23  ;;  %5746 = vmatprep.subr.bf16.mxu0 %v7449_v56  ;;  %v7464_v23 = vcombine.low %v2589_v19, %v2593_v7  ;;  %v7490_v56 = vcombine.low %v2614_v34, %v2618_v29  ;;  %v7505_v19 = vcombine.high %v2629_v61, %v2633_v62  ;;  %v2661_v34 = vld [vmem:[#allocation16 + $0xf10] sm:$0xff] }
 0x9ba   : > { %5910 = vmatprep.subr.bf16.mxu1 %v7451_v60  ;;  %v7499_v60 = vcombine.high %v2622_v46, %v2626_v47  ;;  %v2665_v29 = vld [vmem:[#allocation16 + $0xf30] sm:$0xff] }
 0x9bb   : > { %5747 = vmatpush1.bf16.msra.mxu0 %v7448_v0  ;;  %v2630_v0 = vld [vmem:[#allocation16 + $0xe18] sm:$0xff] }
 0x9bc   : > { %5911 = vmatpush1.bf16.msra.mxu1 %v7450_v1  ;;  %5748 = vmatprep.subr.bf16.mxu0 %v7457_v4  ;;  %v2634_v1 = vld [vmem:[#allocation16 + $0xe38] sm:$0xff]  ;;  %v7496_v4 = vcombine.low %v2621_v42, %v2625_v43  ;;  %v7537_v42 = vcombine.high %v2661_v34, %v2665_v29 }
 0x9bd   : > { %5912 = vmatprep.subr.bf16.mxu1 %v7459_v5  ;;  %v7498_v5 = vcombine.low %v2622_v46, %v2626_v47  ;;  %v7507_v7 = vcombine.high %v2630_v0, %v2634_v1  ;;  %v2669_v46 = vld [vmem:[#allocation16 + $0xf50] sm:$0xff] }
 0x9be   : > { %v2673_v47 = vld [vmem:[#allocation16 + $0xf70] sm:$0xff] }
 0x9bf   : > { %5749 = vmatpush1.bf16.msra.mxu0 %v7456_v10  ;;  %v2638_v10 = vld [vmem:[#allocation16 + $0xe58] sm:$0xff] }
 0x9c0   : > { %5913 = vmatpush1.bf16.msra.mxu1 %v7458_v6  ;;  %5750 = vmatprep.subr.bf16.mxu0 %v7465_v13  ;;  %v2642_v6 = vld [vmem:[#allocation16 + $0xe78] sm:$0xff]  ;;  %v7504_v13 = vcombine.low %v2629_v61, %v2633_v62 }
 0x9c1   : > { %5914 = vmatprep.subr.bf16.mxu1 %v7467_v33  ;;  %v7506_v33 = vcombine.low %v2630_v0, %v2634_v1  ;;  %v7515_v53 = vcombine.high %v2638_v10, %v2642_v6  ;;  %v2678_v61 = vld [vmem:[#allocation16 + $0xf98] sm:$0xff]  ;;  %v9588_v0 = vld [vmem:[#allocation17] sm:$0xff]  ;;  %v7544_v1 = vcombine.low %v2669_v46, %v2673_v47 }
 0x9c2   : > { %v2682_v62 = vld [vmem:[#allocation16 + $0xfb8] sm:$0xff] }
 0x9c3   : > { %5751 = vmatpush1.bf16.msra.mxu0 %v7464_v23  ;;  %v2646_v23 = vld [vmem:[#allocation16 + $0xe98] sm:$0xff] }
 0x9c4   : > { %5915 = vmatpush1.bf16.msra.mxu1 %v7466_v17  ;;  %5752 = vmatprep.subr.bf16.mxu0 %v7473_v63  ;;  %v2650_v17 = vld [vmem:[#allocation16 + $0xeb8] sm:$0xff]  ;;  %v7512_v63 = vcombine.low %v2637_v8, %v2641_v9  ;;  %v2689_v8 = vld [vmem:[#allocation16 + $0xff0] sm:$0xff]  ;;  %v5260_v9 = vrot.slane %v9588_v0, %v1936_v11 }
 0x9c5   : > { %5916 = vmatprep.subr.bf16.mxu1 %v7475_v2  ;;  %v7514_v2 = vcombine.low %v2638_v10, %v2642_v6  ;;  %v7523_v20 = vcombine.high %v2646_v23, %v2650_v17  ;;  %v2686_v10 = vld [vmem:[#allocation16 + $0xfd8] sm:$0xff] }
 0x9c6   : > { %v2690_v6 = vld [vmem:[#allocation16 + $0xff8] sm:$0xff] }
 0x9c7   : > { %5753 = vmatpush1.bf16.msra.mxu0 %v7472_v27  ;;  %v2654_v27 = vld [vmem:[#allocation16 + $0xed8] sm:$0xff] }
 0x9c8   : > { %5917 = vmatpush1.bf16.msra.mxu1 %v7474_v28  ;;  %5754 = vmatprep.subr.bf16.mxu0 %v7481_v30  ;;  %v2658_v28 = vld [vmem:[#allocation16 + $0xef8] sm:$0xff]  ;;  %v7520_v30 = vcombine.low %v2645_v16, %v2649_v18  ;;  %v7563_v16 = vcombine.high %v2686_v10, %v2690_v6 }
 0x9c9   : > { %v9580_v41 = vpop.f32.mrb[20].mxu0  ;;  %5918 = vmatprep.subr.bf16.mxu1 %v7483_v31  ;;  %v7522_v31 = vcombine.low %v2646_v23, %v2650_v17  ;;  %v7531_v37 = vcombine.high %v2654_v27, %v2658_v28  ;;  %v7562_v17 = vcombine.low %v2686_v10, %v2690_v6  ;;  %v8135_v10 = vld [vmem:[%s9939_s3 + $0x148] sm:$0xff]  }
 0x9ca   : > { %v9582_v38 = vpop.f32.mrb[24].mxu1  ;;  %v9584_v45 = vpop.f32.mrb[21].mxu0 }
 0x9cb   : > { %v9586_v48 = vpop.f32.mrb[25].mxu1  ;;  %v5454_v50 = vpop.f32.mrb[22].mxu0  ;;  %5755 = vmatpush1.bf16.msra.mxu0 %v7480_v35  ;;  %v2662_v35 = vld [vmem:[#allocation16 + $0xf18] sm:$0xff]  ;;  %v7812_v18 = vadd.f32 %v9584_v45, %v5260_v9  ;;  %v8101_v45 = vld [vmem:[%s9939_s3] sm:$0xff]  }
 0x9cc   : > { %v5618_v40 = vpop.f32.mrb[26].mxu1  ;;  %5919 = vmatpush1.bf16.msra.mxu1 %v7482_v22  ;;  %v5455_v54 = vpop.f32.mrb[23].mxu0  ;;  %5756 = vmatprep.subr.bf16.mxu0 %v7489_v39  ;;  %v2666_v22 = vld [vmem:[#allocation16 + $0xf38] sm:$0xff]  ;;  %v7528_v39 = vcombine.low %v2653_v25, %v2657_v26  ;;  %v8134_v9 = vld [vmem:[%s9939_s3 + $0x180] sm:$0xff]  }
 0x9cd   : > { %v5619_v58 = vpop.f32.mrb[27].mxu1  ;;  %5920 = vmatprep.subr.bf16.mxu1 %v7491_v57  ;;  %v7530_v57 = vcombine.low %v2654_v27, %v2658_v28  ;;  %v7539_v43 = vcombine.high %v2662_v35, %v2666_v22  ;;  %v2670_v50 = vld [vmem:[#allocation16 + $0xf58] sm:$0xff]  ;;  %v7536_v40 = vcombine.low %v2661_v34, %v2665_v29  ;;  %v7538_v54 = vcombine.low %v2662_v35, %v2666_v22  ;;  %v8111_v34 = vld [vmem:[%s9939_s3 + $0x58] sm:$0xff]  }
 0x9ce   : > { %v2677_v58 = vld [vmem:[#allocation16 + $0xf90] sm:$0xff]  ;;  %v8112_v29 = vld [vmem:[%s9939_s3 + $0xd8] sm:$0xff]  }
 0x9cf   : > { %5757 = vmatpush1.bf16.msra.mxu0 %v7488_v51  ;;  %v2674_v51 = vld [vmem:[#allocation16 + $0xf78] sm:$0xff]  ;;  %v8113_v35 = vld [vmem:[%s9939_s3 + $0x18] sm:$0xff]  }
 0x9d0   : > { %5921 = vmatpush1.bf16.msra.mxu1 %v7490_v56  ;;  %5758 = vmatprep.subr.bf16.mxu0 %v7497_v15  ;;  %v7545_v56 = vcombine.high %v2669_v46, %v2673_v47  ;;  %v7547_v15 = vcombine.high %v2670_v50, %v2674_v51  ;;  %v8104_v26 = vld [vmem:[%s9939_s3 + $0xc8] sm:$0xff]   ;;  %v8114_v22 = vld [vmem:[%s9939_s3 + $0x98] sm:$0xff]  }
 0x9d1   : > { %5922 = vmatprep.subr.bf16.mxu1 %v7499_v60  ;;  %v2681_v60 = vld [vmem:[#allocation16 + $0xfb0] sm:$0xff] }
 0x9d2   : > { %v8105_v28 = vld [vmem:[%s9939_s3 + $0x8] sm:$0xff]  }
 0x9d3   : > { %5759 = vmatpush1.bf16.msra.mxu0 %v7496_v4  ;;  %v7546_v4 = vcombine.low %v2670_v50, %v2674_v51  ;;  %v8119_v46 = vld [vmem:[%s9939_s3 + $0x68] sm:$0xff]   ;;  %v5256_v51 = vrot.slane %v9588_v0, %v1932_v32  ;;  %v8125_v32 = vld [vmem:[%s9939_s3 + $0x30] sm:$0xff]  }
 0x9d4   : > { %5923 = vmatpush1.bf16.msra.mxu1 %v7498_v5  ;;  %5760 = vmatprep.subr.bf16.mxu0 %v7505_v19  ;;  %v7553_v5 = vcombine.high %v2677_v58, %v2681_v60  ;;  %v7555_v19 = vcombine.high %v2678_v61, %v2682_v62  ;;  %v8120_v47 = vld [vmem:[%s9939_s3 + $0xe8] sm:$0xff]  }
 0x9d5   : > { %5924 = vmatprep.subr.bf16.mxu1 %v7507_v7  ;;  %v2685_v7 = vld [vmem:[#allocation16 + $0xfd0] sm:$0xff] }
 0x9d6   : > { %v7560_v11 = vcombine.low %v2685_v7, %v2689_v8  ;;  %v8121_v50 = vld [vmem:[%s9939_s3 + $0x28] sm:$0xff]  }
 0x9d7   : > { %5761 = vmatpush1.bf16.msra.mxu0 %v7504_v13  ;;  %v5268_v13 = vrot.slane %v9588_v0, %v1944_v21  ;;  %v8099_v21 = vld [vmem:[%s9939_s3 + $0x40] sm:$0xff]  }
 0x9d8   : > { %5925 = vmatpush1.bf16.msra.mxu1 %v7506_v33  ;;  %5762 = vmatprep.subr.bf16.mxu0 %v7513_v14  ;;  %v7552_v33 = vcombine.low %v2677_v58, %v2681_v60  ;;  %v7554_v14 = vcombine.low %v2678_v61, %v2682_v62  ;;  %v7811_v58 = vadd.f32 %v9580_v41, %v5256_v51  ;;  %v8126_v60 = vld [vmem:[%s9939_s3 + $0xb0] sm:$0xff]   ;;  %v8128_v62 = vld [vmem:[%s9939_s3 + $0xf8] sm:$0xff]  }
 0x9d9   : > { %5926 = vmatprep.subr.bf16.mxu1 %v7515_v53  ;;  %v7561_v53 = vcombine.high %v2685_v7, %v2689_v8  ;;  %v7814_v23 = vadd.f32 %v9586_v48, %v5268_v13  ;;  %v8102_v48 = vld [vmem:[%s9939_s3 + $0x80] sm:$0xff]   ;;  %v8129_v41 = vld [vmem:[%s9939_s3 + $0x38] sm:$0xff]   ;;  %v8136_v13 = vld [vmem:[%s9939_s3 + $0x1c8] sm:$0xff]  }
 0x9da   : > { %v8133_v7 = vld [vmem:[%s9939_s3 + $0x100] sm:$0xff]  }
 0x9db   : > { %5763 = vmatpush1.bf16.msra.mxu0 %v7512_v63  ;;  %v8100_v63 = vld [vmem:[%s9939_s3 + $0xc0] sm:$0xff]  }
 0x9dc   : > { %5927 = vmatpush1.bf16.msra.mxu1 %v7514_v2  ;;  %5764 = vmatprep.subr.bf16.mxu0 %v7521_v3  ;;  %v5950_v2 = vmax.f32 %v7812_v18, 0.0  ;;  %v5952_v3 = vmax.f32 %v7814_v23, 0.0  ;;  %v8141_v18 = vld [vmem:[%s9939_s3 + $0x110] sm:$0xff]  }
 0x9dd   : > { %5928 = vmatprep.subr.bf16.mxu1 %v7523_v20  ;;  %v8103_v20 = vld [vmem:[%s9939_s3 + $0x48] sm:$0xff]   ;;  %v8142_v23 = vld [vmem:[%s9939_s3 + $0x190] sm:$0xff]  }
 0x9de   : > { %v5958_v25 = vpack.c.bf16 %v5950_v2, %v5950_v2  ;;  %v5960_v27 = vpack.c.bf16 %v5952_v3, %v5952_v3  ;;  %v8147_v2 = vld [vmem:[%s9939_s3 + $0x160] sm:$0xff]  }
 0x9df   : > { %5765 = vmatpush1.bf16.msra.mxu0 %v7520_v30  ;;  %v8106_v30 = vld [vmem:[%s9939_s3 + $0x88] sm:$0xff]   ;;  %v8148_v3 = vld [vmem:[%s9939_s3 + $0x1e0] sm:$0xff]  }
 0x9e0   : > { %5929 = vmatpush1.bf16.msra.mxu1 %v7522_v31  ;;  %5766 = vmatprep.subr.bf16.mxu0 %v7529_v52  ;;  %v8107_v31 = vld [vmem:[%s9939_s3 + $0x50] sm:$0xff]  }
 0x9e1   : > { %5930 = vmatprep.subr.bf16.mxu1 %v7531_v37  ;;  %v8109_v52 = vld [vmem:[%s9939_s3 + $0x10] sm:$0xff]  }
 0x9e2   : > { %v8110_v37 = vld [vmem:[%s9939_s3 + $0x90] sm:$0xff]  }
 0x9e3   : > { %5767 = vmatpush1.bf16.msra.mxu0 %v7528_v39  ;;  %v8115_v39 = vld [vmem:[%s9939_s3 + $0x60] sm:$0xff]  }
 0x9e4   : > { %5931 = vmatpush1.bf16.msra.mxu1 %v7530_v57  ;;  %5768 = vmatprep.subr.bf16.mxu0 %v7537_v42  ;;  %v8116_v57 = vld [vmem:[%s9939_s3 + $0xe0] sm:$0xff]  }
 0x9e5   : > { %5932 = vmatprep.subr.bf16.mxu1 %v7539_v43  ;;  %v8117_v42 = vld [vmem:[%s9939_s3 + $0x20] sm:$0xff]  }
 0x9e6   : > { %v8118_v43 = vld [vmem:[%s9939_s3 + $0xa0] sm:$0xff]  }
 0x9e7   : > { %5769 = vmatpush1.bf16.msra.mxu0 %v7536_v40  ;;  %v8122_v40 = vld [vmem:[%s9939_s3 + $0xa8] sm:$0xff]  }
 0x9e8   : > { %5933 = vmatpush1.bf16.msra.mxu1 %v7538_v54  ;;  %5770 = vmatprep.subr.bf16.mxu0 %v7545_v56  ;;  %v8123_v54 = vld [vmem:[%s9939_s3 + $0x70] sm:$0xff]   ;;  %v5264_v56 = vrot.slane %v9588_v0, %v1940_v55  ;;  %v8127_v55 = vld [vmem:[%s9939_s3 + $0x78] sm:$0xff]  }
 0x9e9   : > { %5934 = vmatprep.subr.bf16.mxu1 %v7547_v15  ;;  %v8124_v15 = vld [vmem:[%s9939_s3 + $0xf0] sm:$0xff]  }
 0x9ea   : > { %v7813_v61 = vadd.f32 %v9582_v38, %v5264_v56  ;;  %v8131_v38 = vld [vmem:[%s9939_s3 + $0x140] sm:$0xff]  }
 0x9eb   : > { %5771 = vmatpush1.bf16.msra.mxu0 %v7544_v1  ;;  %v5949_v1 = vmax.f32 %v7811_v58, 0.0 }
 0x9ec   : > { %5935 = vmatpush1.bf16.msra.mxu1 %v7546_v4  ;;  %5772 = vmatprep.subr.bf16.mxu0 %v7553_v5  ;;  %v8130_v4 = vld [vmem:[%s9939_s3 + $0xb8] sm:$0xff]   ;;  %v5951_v5 = vmax.f32 %v7813_v61, 0.0 }
 0x9ed   : > { %5936 = vmatprep.subr.bf16.mxu1 %v7555_v19  ;;  %v8132_v19 = vld [vmem:[%s9939_s3 + $0x1c0] sm:$0xff]   ;;  %v5957_v8 = vpack.c.bf16 %v5949_v1, %v5949_v1  ;;  %v6093_v1 = vld [vmem:[#allocation19] sm:$0x1] }
 0x9ee   : > { %v5959_v6 = vpack.c.bf16 %v5951_v5, %v5951_v5 }
 0x9ef   : > { %5773 = vmatpush1.bf16.msra.mxu0 %v7552_v33  ;;  %v8137_v33 = vld [vmem:[%s9939_s3 + $0x108] sm:$0xff]  }
 0x9f0   : > { %5937 = vmatpush1.bf16.msra.mxu1 %v7554_v14  ;;  %5774 = vmatprep.subr.bf16.mxu0 %v7561_v53  ;;  %v8138_v14 = vld [vmem:[%s9939_s3 + $0x188] sm:$0xff]   ;;  %v8139_v53 = vld [vmem:[%s9939_s3 + $0x150] sm:$0xff]  }
 0x9f1   : > { %5938 = vmatprep.subr.bf16.mxu1 %v7563_v16  ;;  %v8140_v16 = vld [vmem:[%s9939_s3 + $0x1d0] sm:$0xff]  }
 0x9f3   : > { %5775 = vmatpush1.bf16.msra.mxu0 %v7560_v11  ;;  %v8143_v11 = vld [vmem:[%s9939_s3 + $0x158] sm:$0xff]  }
 0x9f4   : > { %5939 = vmatpush1.bf16.msra.mxu1 %v7562_v17  ;;  %7675 = vmatprep.subr.bf16.mxu0 %v8099_v21  ;;  %v8144_v17 = vld [vmem:[%s9939_s3 + $0x1d8] sm:$0xff]  }
 0x9f5   : > { %7697 = vmatprep.subr.bf16.mxu1 %v8100_v63  ;;  %v8145_v21 = vld [vmem:[%s9939_s3 + $0x118] sm:$0xff]  }
 0x9f6   : > { %5777 = vmatmul.mubr.bf16.vlgmr.msra.gmra.mrb[24].mxu0 %v9562_v12  ;;  %v8146_v63 = vld [vmem:[%s9939_s3 + $0x198] sm:$0xff]  }
 0x9f7   : > { %5941 = vmatmul.mubr.bf16.vlgmr.msra.gmra.mrb[28].mxu1 %v9562_v12  ;;  %7676 = vmatpush3.bf16.msra.mxu0 %v8101_v45  ;;  %v8108_v12 = vld [vmem:[%s9939_s3 + $0xd0] sm:$0xff]   ;;  %v8149_v45 = vld [vmem:[%s9939_s3 + $0x120] sm:$0xff]  }
 0x9f8   : > { %6510 = vmatprep.mubr.bf16.mxu0 %v5958_v25  ;;  %7698 = vmatpush3.bf16.msra.mxu1 %v8102_v48  ;;  %v8150_v48 = vld [vmem:[%s9939_s3 + $0x1a0] sm:$0xff]   ;;  %v8152_v25 = vld [vmem:[%s9939_s3 + $0x1e8] sm:$0xff]  }
 0x9f9   : > { %6550 = vmatprep.mubr.bf16.mxu1 %v5960_v27  ;;  %7677 = vmatprep.subr.bf16.mxu0 %v8103_v20  ;;  %v8151_v20 = vld [vmem:[%s9939_s3 + $0x168] sm:$0xff]  }
 0x9fa   : > { %7699 = vmatprep.subr.bf16.mxu1 %v8104_v26  ;;  %v8153_v26 = vld [vmem:[%s9939_s3 + $0x128] sm:$0xff]  }
 0x9fb   : > { %7678 = vmatpush3.bf16.msra.mxu0 %v8105_v28  ;;  %v8154_v27 = vld [vmem:[%s9939_s3 + $0x1a8] sm:$0xff]   ;;  %v8155_v28 = vld [vmem:[%s9939_s3 + $0x170] sm:$0xff]  }
 0x9fc   : > { %7700 = vmatpush3.bf16.msra.mxu1 %v8106_v30  ;;  %7679 = vmatprep.subr.bf16.mxu0 %v8107_v31  ;;  %v8156_v30 = vld [vmem:[%s9939_s3 + $0x1f0] sm:$0xff]  }
 0x9fd   : > { %7701 = vmatprep.subr.bf16.mxu1 %v8108_v12  ;;  %v8157_v31 = vld [vmem:[%s9939_s3 + $0x130] sm:$0xff]  }
 0x9fe   : > { %v8158_v12 = vld [vmem:[%s9939_s3 + $0x1b0] sm:$0xff]  }
 0x9ff   : > { %7680 = vmatpush3.bf16.msra.mxu0 %v8109_v52  ;;  %v8159_v52 = vld [vmem:[%s9939_s3 + $0x178] sm:$0xff]  }
 0xa00   : > { %7702 = vmatpush3.bf16.msra.mxu1 %v8110_v37  ;;  %7681 = vmatprep.subr.bf16.mxu0 %v8111_v34  ;;  %v8160_v37 = vld [vmem:[%s9939_s3 + $0x1f8] sm:$0xff]  }
 0xa01   : > { %7703 = vmatprep.subr.bf16.mxu1 %v8112_v29  ;;  %v8161_v34 = vld [vmem:[%s9939_s3 + $0x138] sm:$0xff]  }
 0xa02   : > { %v8162_v29 = vld [vmem:[%s9939_s3 + $0x1b8] sm:$0xff]  }
 0xa03   : > { %7682 = vmatpush3.bf16.msra.mxu0 %v8113_v35  ;;  %v5272_v35 = vrot.slane %v9588_v0, %v1948_v36 }
 0xa04   : > { %7704 = vmatpush3.bf16.msra.mxu1 %v8114_v22  ;;  %7683 = vmatprep.subr.bf16.mxu0 %v8115_v39  ;;  %v5280_v22 = vrot.slane %v9588_v0, %v1956_v24  ;;  %v5276_v39 = vrot.slane %v9588_v0, %v1952_v59 }
 0xa05   : > { %7705 = vmatprep.subr.bf16.mxu1 %v8116_v57  ;;  %v5284_v57 = vrot.slane %v9588_v0, %v1960_v44 }
 0xa07   : > { %7684 = vmatpush3.bf16.msra.mxu0 %v8117_v42 }
 0xa08   : > { %7706 = vmatpush3.bf16.msra.mxu1 %v8118_v43  ;;  %7685 = vmatprep.subr.bf16.mxu0 %v8119_v46 }
 0xa09   : > { %7707 = vmatprep.subr.bf16.mxu1 %v8120_v47 }
 0xa0b   : > { %7686 = vmatpush3.bf16.msra.mxu0 %v8121_v50 }
 0xa0c   : > { %7708 = vmatpush3.bf16.msra.mxu1 %v8122_v40  ;;  %7687 = vmatprep.subr.bf16.mxu0 %v8123_v54 }
 0xa0d   : > { %7709 = vmatprep.subr.bf16.mxu1 %v8124_v15 }
 0xa0f   : > { %7688 = vmatpush3.bf16.msra.mxu0 %v8125_v32 }
 0xa10   : > { %7710 = vmatpush3.bf16.msra.mxu1 %v8126_v60  ;;  %7689 = vmatprep.subr.bf16.mxu0 %v8127_v55 }
 0xa11   : > { %7711 = vmatprep.subr.bf16.mxu1 %v8128_v62 }
 0xa13   : > { %7690 = vmatpush3.bf16.msra.mxu0 %v8129_v41 }
 0xa14   : > { %7712 = vmatpush3.bf16.msra.mxu1 %v8130_v4  ;;  %7719 = vmatprep.subr.bf16.mxu0 %v8131_v38 }
 0xa15   : > { %7741 = vmatprep.subr.bf16.mxu1 %v8132_v19 }
 0xa16   : > { %6511 = vmatmul.mubr.bf16.vlgmr.msra.gmra.mrb[28].mxu0 %v5957_v8 }
 0xa17   : > { %6551 = vmatmul.mubr.bf16.vlgmr.msra.gmra.mrb[32].mxu1 %v5959_v6  ;;  %7720 = vmatpush3.bf16.msra.mxu0 %v8133_v7 }
 0xa18   : > { %7742 = vmatpush3.bf16.msra.mxu1 %v8134_v9  ;;  %7721 = vmatprep.subr.bf16.mxu0 %v8135_v10 }
 0xa19   : > { %7743 = vmatprep.subr.bf16.mxu1 %v8136_v13 }
 0xa1b   : > { %7722 = vmatpush3.bf16.msra.mxu0 %v8137_v33 }
 0xa1c   : > { %7744 = vmatpush3.bf16.msra.mxu1 %v8138_v14  ;;  %7723 = vmatprep.subr.bf16.mxu0 %v8139_v53 }
 0xa1d   : > { %7745 = vmatprep.subr.bf16.mxu1 %v8140_v16 }
 0xa1f   : > { %7724 = vmatpush3.bf16.msra.mxu0 %v8141_v18 }
 0xa20   : > { %7746 = vmatpush3.bf16.msra.mxu1 %v8142_v23  ;;  %7725 = vmatprep.subr.bf16.mxu0 %v8143_v11 }
 0xa21   : > { %7747 = vmatprep.subr.bf16.mxu1 %v8144_v17 }
 0xa23   : > { %7726 = vmatpush3.bf16.msra.mxu0 %v8145_v21 }
 0xa24   : > { %7748 = vmatpush3.bf16.msra.mxu1 %v8146_v63  ;;  %7727 = vmatprep.subr.bf16.mxu0 %v8147_v2 }
 0xa25   : > { %7749 = vmatprep.subr.bf16.mxu1 %v8148_v3 }
 0xa27   : > { %7728 = vmatpush3.bf16.msra.mxu0 %v8149_v45  ;;  %v8604_v45 = vmov 1966171168  }
 0xa28   : > { %7750 = vmatpush3.bf16.msra.mxu1 %v8150_v48  ;;  %7729 = vmatprep.subr.bf16.mxu0 %v8151_v20  ;;  %v6647_v48 = vunpack.c.l.s4 %v8604_v45 }
 0xa29   : > { %7751 = vmatprep.subr.bf16.mxu1 %v8152_v25 }
 0xa2a   : > { %v6648_v20 = vunpack.c.0.s8 %v6647_v48 }
 0xa2b   : > { %7730 = vmatpush3.bf16.msra.mxu0 %v8153_v26 }
 0xa2c   : > { %7752 = vmatpush3.bf16.msra.mxu1 %v8154_v27  ;;  %7731 = vmatprep.subr.bf16.mxu0 %v8155_v28  ;;  %v6651_v28 = vsub.s32 %v6648_v20, %v9484_v49 }
 0xa2d   : > { %7753 = vmatprep.subr.bf16.mxu1 %v8156_v30 }
 0xa2f   : > { %7732 = vmatpush3.bf16.msra.mxu0 %v8157_v31 }
 0xa30   : > { %7754 = vmatpush3.bf16.msra.mxu1 %v8158_v12  ;;  %7733 = vmatprep.subr.bf16.mxu0 %v8159_v52 }
 0xa31   : > { %7755 = vmatprep.subr.bf16.mxu1 %v8160_v37 }
 0xa33   : > { %7734 = vmatpush3.bf16.msra.mxu0 %v8161_v34 }
 0xa34   : > { %7756 = vmatpush3.bf16.msra.mxu1 %v8162_v29 }
 0xac9   : > { %v5778_v42 = vpop.f32.mrb[24].mxu0 }
 0xaca   : > { %v7815_v43 = vadd.f32 %v5778_v42, %v5272_v35  ;;  %v5942_v46 = vpop.f32.mrb[28].mxu1  ;;  %v5780_v47 = vpop.f32.mrb[25].mxu0  ;;  %v6638_v35 = vld [vmem:[%s9940_s4] sm:$0x1]  ;;  %s8607_s4 = smov [#allocation20]  }
 0xacb   : > { %v7817_v50 = vadd.f32 %v5942_v46, %v5280_v22  ;;  %v7816_v51 = vadd.f32 %v5780_v47, %v5276_v39  ;;  %v5944_v40 = vpop.f32.mrb[29].mxu1  ;;  %v5782_v36 = vpop.f32.mrb[26].mxu0  ;;  %v6665_v22 = vmul.f32 -0.5, %v6638_v35 }
 0xacc   : > { %v5953_v54 = vmax.f32 %v7815_v43, 0.0  ;;  %v7818_v56 = vadd.f32 %v5944_v40, %v5284_v57  ;;  %v5946_v15 = vpop.f32.mrb[30].mxu1  ;;  %v5783_v24 = vpop.f32.mrb[27].mxu0 }
 0xacd   : > { %v5955_v32 = vmax.f32 %v7817_v50, 0.0  ;;  %v5954_v58 = vmax.f32 %v7816_v51, 0.0  ;;  %v5947_v60 = vpop.f32.mrb[31].mxu1  ;;  %v6666_v39 = vmul.f32 %v6665_v22, %v6638_v35 }
 0xace   : > { %v5956_v59 = vmax.f32 %v7818_v56, 0.0  ;;  %v5961_v61 = vpack.c.bf16 %v5953_v54, %v5953_v54 }
 0xacf   : > { %v5962_v55 = vpack.c.bf16 %v5954_v58, %v5954_v58  ;;  %v5963_v44 = vpack.c.bf16 %v5955_v32, %v5955_v32 }
 0xad0   : > { %v5964_v62 = vpack.c.bf16 %v5956_v59, %v5956_v59 }
 0xad1   : > { %6590 = vmatprep.mubr.bf16.mxu0 %v5962_v55 }
 0xad2   : > { %6630 = vmatprep.mubr.bf16.mxu1 %v5964_v62  ;;  %6591 = vmatmul.mubr.bf16.vlgmr.msra.gmra.mrb[32].mxu0 %v5961_v61 }
 0xad3   : > { %6631 = vmatmul.mubr.bf16.vlgmr.msra.gmra.mrb[36].mxu1 %v5963_v44 }
 0xae9   : > { %v7691_v0 = vpop.f32.mrb[28].mxu0 }
 0xaea   : > { %v7713_v41 = vpop.f32.mrb[32].mxu1  ;;  %v7692_v4 = vpop.f32.mrb[29].mxu0 }
 0xaeb   : > { %v7693_v38 = vadd.f32 %v7692_v4, %v7691_v0  ;;  %v7714_v5 = vpop.f32.mrb[33].mxu1  ;;  %v7694_v19 = vpop.f32.mrb[30].mxu0 }
 0xaec   : > { %v7715_v7 = vadd.f32 %v7714_v5, %v7713_v41  ;;  %v7716_v8 = vpop.f32.mrb[34].mxu1  ;;  %v7695_v9 = vpop.f32.mrb[31].mxu0 }
 0xaed   : > { %v6513_v10 = vadd.f32 %v7693_v38, %v6093_v1  ;;  %v7717_v6 = vpop.f32.mrb[35].mxu1 }
 0xaef   : > { %v6553_v13 = vadd.f32 %v7715_v7, %v6513_v10 }
 0xba5   : > { %v7735_v33 = vpop.f32.mrb[32].mxu0 }
 0xba6   : > { %v7757_v14 = vpop.f32.mrb[36].mxu1  ;;  %v7736_v53 = vpop.f32.mrb[33].mxu0 }
 0xba7   : > { %v7737_v16 = vadd.f32 %v7736_v53, %v7735_v33  ;;  %v7758_v18 = vpop.f32.mrb[37].mxu1  ;;  %v7738_v23 = vpop.f32.mrb[34].mxu0 }
 0xba8   : > { %v7759_v11 = vadd.f32 %v7758_v18, %v7757_v14  ;;  %v7760_v17 = vpop.f32.mrb[38].mxu1  ;;  %v7739_v21 = vpop.f32.mrb[35].mxu0 }
 0xba9   : > { %v6593_v63 = vadd.f32 %v7737_v16, %v6553_v13  ;;  %v7761_v2 = vpop.f32.mrb[39].mxu1 }
 0xbab   : > { %v6633_v3 = vadd.f32 %v7759_v11, %v6593_v63 }
 0xbad   : > { %8165 = vtanh.f32 %v6633_v3 }
 0xbb7   : > { %v8166_v25 = vpop.eup %8165 }
 0xbb8   : > { %v6640_v26 = vadd.f32 1.0, %v8166_v25 }
 0xbba   : > { %v6641_v27 = vmul.f32 6.0, %v6640_v26 }
 0xbbc   : > { %v6642_v30 = vadd.f32 -10.0, %v6641_v27 }
 0xbbe   : > { %v6674_v31 = vrot.slane %v6642_v30, %v6651_v28  ;;  %v6643_v12 = vmul.f32 1.442695, %v6642_v30 }
 0xbc0   : > { %v6681_v52 = vrot.slane %v6674_v31, %v6651_v28  ;;  %8167 = vpow2.f32 %v6643_v12 }
 0xbc2   : > { %6682 = vrot.lane.b32.xlu1 %v6681_v52, %s8605_s1 }
 0xbca   : > { %v8168_v37 = vpop.eup %8167 }
 0xbcb   : > { %v6652_v34 = vrot.slane %v8168_v37, %v6651_v28 }
 0xbcd   : > { %v6659_v29 = vrot.slane %v6652_v34, %v6651_v28 }
 0xbcf   : > { %6660 = vrot.lane.b32.xlu0 %v6659_v29, %s8605_s1  ;;  %s8484_s1 = scalar_lea.vmem %s9824_s28, 16 }
 0xbd0   : > { %p8485_p3 = scmp.ne.s32.totalorder %s9824_s28, %s8484_s1 }
 0xbd2   : > { %p8486_p0 = pnand %p8485_p3, %p9942_p2 }
 0xbd4   : > { %p8487_p10 = pneg %p8486_p0 }
 0xc34   : > { %v6683_v57 = vpop.permute.xlu1 %6682 }
 0xc35   : > { %v6685_v42 = vsub.f32 %v6666_v39, %v6683_v57 }
 0xc37   : > { %v6687_v49 = vsel %vm6686_vm13, %v6685_v42, 0.0 }
 0xc38   : > { %6688 = vadd.xlane.f32.xlu1 %v6687_v49 }
 0xc41   : > { %v6661_v43 = vpop.permute.xlu0 %6660 }
 0xc42   : > { %v6663_v46 = vmul.f32 %v6661_v43, %v6638_v35 }
 0xc44   : > { %v6664_v47 = vadd.f32 %v6663_v46, %v6633_v3 }
 0xc46   : > { %8169 = vtanh.f32 %v6664_v47 }
 0xc49   : > { %6706 = vrot.lane.b32.xlu1 %v6642_v30, %s8606_s2 }
 0xc50   : > { %v8170_v50 = vpop.eup %8169 }
 0xc51   : > { %v6692_v51 = vmul.f32 %v8170_v50, %v8170_v50 }
 0xc53   : > { %v6693_v40 = vsub.f32 1.0, %v6692_v51 }
 0xc55   : > { %v6694_v36 = vmax.f32 %v6693_v40, 0.0 }
 0xc57   : > { %v6695_v54 = vadd.f32 1e-06, %v6694_v36 }
 0xc59   : > { %8171 = vlog2.f32 %v6695_v54 }
 0xc63   : > { %v8172_v56 = vpop.eup %8171 }
 0xc64   : > { %v6697_v15 = vmul.f32 0.6931472, %v8172_v56 }
 0xc66   : > { %v6698_v24 = vsel %vm6686_vm13, %v6697_v15, 0.0 }
 0xc67   : > { %6699 = vadd.xlane.f32.xlu0 %v6698_v24 }
 0xc7d   : > { %6703 = vrot.lane.b32.xlu0 %v8170_v50, %s8606_s2  ;;  %s8488_s2 = sshll.u32 %s8607_s4, 4  ;;  %s8489_s2 = int_to_ptr.vmem [resolvable:$false] %s8488_s2 }
 0xc7e   : > { %s8490_s3 = scalar_lea.vmem %s8489_s2, 32  ;;  %p8491_p11 = scmp.lt.s32.totalorder %s9824_s28, %s8489_s2 }
 0xc7f   : > { %p8492_p12 = scmp.lt.s32.totalorder %s8490_s3, %s8484_s1 }
 0xc81   : > { %p8493_p8 = por %p8492_p12, %p8491_p11 }
 0xc83   : > { %p8494_p5 = pnand %p8493_p8, %p8487_p10 }
 0xcc5   : > { %v6689_v32 = vpop.xlane.xlu1 %6688 }
 0xcc6   : > { %v7628_v60 = vadd.f32 -2.7568157, %v6689_v32 }
 0xcc9   : > { %v6707_v55 = vpop.permute.xlu1 %6706 }
 0xcf4   : > { %v6700_v58 = vpop.xlane.xlu0 %6699 }
 0xcf5   : > { %v6701_v61 = vsub.f32 %v7628_v60, %v6700_v58 }
 0xcf8   : > { %v6704_v59 = vpop.permute.xlu0 %6703 }
 0xcf9   : > { %v6710_v62 = vsel %vm6709_vm14, %v8166_v25, %v6704_v59 }
 0xcfa   : > { %v6712_v44 = vsel %vm6711_vm15, %v6710_v62, %v6707_v55 }
 0xcfb   : > { %v6714_v0 = vsel %vm6713_vm0, %v6712_v44, %v6701_v61 }
 0xcfc   : > { %v6716_v41 = vsel %vm6715_vm1, %v6714_v0, 0.0 }
 0xcfd   : > { %6717 = vst [vmem:[%s676_s18] sm:$0x1] %v6716_v41 }
 0xcfe   : > { %8497 = shalt.err (!%p8494_p5)
}
 0xcff   : > { %s8498_s17 = scalar_lea.hbm %s9822_s6, 16  ;;  %s8502_s14 = scalar_lea.hbm %s9941_s19, 32 }
 0xd00   : > { %p8499_p7 = scmp.ne.s32.totalorder %s9822_s6, %s8498_s17  ;;  %p8503_p4 = scmp.lt.u32.totalorder %s9822_s6, %s9941_s19 }
 0xd01   : > { %p8504_p13 = scmp.lt.u32.totalorder %s8502_s14, %s8498_s17  ;;  %p8506_p3 = scmp.lt.u32.totalorder %s8498_s17, %s9822_s6 }
 0xd02   : > { %p8500_p6 = pnand %p8499_p7, %p9942_p2 }
 0xd03   : > { %p8505_p1 = por %p8504_p13, %p8503_p4 }
 0xd04   : > { %p8501_p9 = pneg %p8500_p6 }
 0xd05   : > { %p8507_p0 = por %p8506_p3, %p8505_p1 }
 0xd07   : > { %p8508_p10 = pnand %p8507_p0, %p8501_p9 }
 0xd09   : > { %8511 = shalt.err (!%p8508_p10)
}
 0xd0a   : > { %7910 = dma.vmem_to_hbm [thread:$0]  (%p9942_p2), %s9824_s28, 16, %s9822_s6, %s6719_s27  }
 0xd0b PF: > { %s6743_s3 = sand.u32 1, %s8558_s21   ;;  %p9943_p11 = scmp.ne.s32.totalorder %s9917_s29, 0 }
 0xd0c   : > { %p9944_p12 = scmp.ge.s32.totalorder %s8570_s24, 2  ;;  %s6744_s1 = scalar_lea.sflag [#allocation4], %s6743_s3 }
 0xd0e   : > { %p7948_p8 = pnand %p9944_p12, %p9943_p11 }
 0xd10   : > { %8553 = dma.done.wait (!%p7948_p8), %s6744_s1, 16  }
 0xd11   : > { %8555 = vsyncadd (!%p7948_p8), %s6744_s1, 4294967280  ;;  %p34_p5 = scmp.ge.s32.totalorder %s8955_s0, 4   ;;  %s9945_s21 = smov %s8562_s22 }
 0xd12   : > { %s9946_s22 = smov %s8566_s23  ;;  %s9947_s23 = smov %s8966_s26 }
 0xd13   : > { %s9948_s24 = smov %s8955_s0  ;;  %36 = sbr.rel (!%p34_p5) target bundleno = 20 (0x14), region = 175 }
 0xd1a   :  { %6748 = vsyncpa [#allocation3], 1 }
 0xd1b   :  { %6750 = vsyncpa [#allocation3 + $0x1], 1 }
 0xd1c   :  { %6751 = vsyncpa [#allocation6], 1 }
 0xd1d   :  { %6752 = vsyncpa [#allocation9], 1 }
 0xd1e   :  { %6753 = vsyncpa [#allocation12], 1 }
 0xd1f   :  { %6754 = vsyncpa [#allocation15], 1 }
 0xd20   :  { %6755 = vsyncpa [#allocation18], 1 }
 0xd21   :  { %6756 = vsyncpa [#allocation4], 1 }
 0xd22   :  { %6758 = vsyncpa [#allocation4 + $0x1], 1 }

</bundles_post_ra>
